<compile_context>
chip_gen: v7x
topology: tpu7x:2x2x1
jax: 0.10.0
libtpu: 0.0.40
codegen_flags: <defaults>
</compile_context>

<pallas_src>
import functools

import jax
import jax.numpy as jnp
from jax.experimental import pallas as pl
from jax.experimental.pallas import tpu as pltpu

LANE = 128
_VMEM_LIMIT = 64 * 1024 * 1024  # fits v7x's 64 MiB physical VMEM


def _round_up(x, m):
    return ((x + m - 1) // m) * m


# -----------------------------------------------------------------------------
# Fused LayerNorm + matmul + bias (+GELU) (+residual) kernel
# -----------------------------------------------------------------------------
def _fused_linear_kernel(*refs, apply_ln, add_residual, activation, eps,
                         inv_norm_dim):
    it = iter(refs)
    x_ref = next(it)
    if apply_ln:
        g_ref = next(it)
        be_ref = next(it)
    w_ref = next(it)
    b_ref = next(it)
    if add_residual:
        r_ref = next(it)
    o_ref = next(it)

    x = x_ref[...].astype(jnp.float32)                       # (tm, K)

    if apply_ln:
        # Padded lanes of x are zero by construction, so sums over the padded
        # width divided by the *true* feature count give the exact moments.
        g = g_ref[...].astype(jnp.float32)                   # (1, K)
        be = be_ref[...].astype(jnp.float32)                 # (1, K)
        mean = jnp.sum(x, axis=-1, keepdims=True) * inv_norm_dim
        var = jnp.sum(x * x, axis=-1, keepdims=True) * inv_norm_dim - mean * mean
        x = (x - mean) * jax.lax.rsqrt(var + eps) * g + be   # gamma=0 on pads

    # bf16 MXU inputs, f32 accumulation.
    y = jnp.dot(x.astype(jnp.bfloat16), w_ref[...].astype(jnp.bfloat16),
                preferred_element_type=jnp.float32)
    y = y + b_ref[...].astype(jnp.float32)

    if activation == "gelu":
        # TODO(synk): PyTorch nn.GELU defaults to exact erf; tanh approximation
        # used here (EUP-friendly on TPU).
        c = jnp.float32(0.7978845608028654)                  # sqrt(2/pi)
        y = 0.5 * y * (1.0 + jnp.tanh(c * (y + 0.044715 * y * y * y)))

    if add_residual:
        y = y + r_ref[...].astype(jnp.float32)

    o_ref[...] = y.astype(o_ref.dtype)


def fused_linear(x, w, b, *, gamma=None, beta=None, residual=None,
                 activation=None, norm_dim=None, eps=1e-5,
                 tm_max=256, tn_max=512):
    """y = [+residual] [gelu]( LN?(x) @ w + b ); x:(M,K), w:(K,N), b:(1,N)."""
    M, K = x.shape
    Kw, N = w.shape
    assert Kw == K, (Kw, K)
    apply_ln = gamma is not None
    add_res = residual is not None

    tm = M if M <= tm_max else tm_max            # full-M block or 8-aligned tile
    tn = N if N <= tn_max else tn_max            # N is lane-padded -> 128-aligned
    grid = (pl.cdiv(N, tn), pl.cdiv(M, tm))      # N outer: weight tile stays
                                                 # resident across inner M tiles

    in_specs = [pl.BlockSpec((tm, K), lambda j, i: (i, 0))]
    args = [x]
    if apply_ln:
        in_specs.append(pl.BlockSpec((1, K), lambda j, i: (0, 0)))
        in_specs.append(pl.BlockSpec((1, K), lambda j, i: (0, 0)))
        args += [gamma, beta]
    in_specs.append(pl.BlockSpec((K, tn), lambda j, i: (0, j)))   # resident
    in_specs.append(pl.BlockSpec((1, tn), lambda j, i: (0, j)))
    args += [w, b]
    if add_res:
        in_specs.append(pl.BlockSpec((tm, tn), lambda j, i: (i, j)))
        args.append(residual)

    kern = functools.partial(
        _fused_linear_kernel,
        apply_ln=apply_ln, add_residual=add_res, activation=activation,
        eps=eps, inv_norm_dim=1.0 / float(norm_dim if norm_dim else K))

    return pl.pallas_call(
        kern,
        grid=grid,
        out_shape=jax.ShapeDtypeStruct((M, N), jnp.float32),
        in_specs=in_specs,
        out_specs=pl.BlockSpec((tm, tn), lambda j, i: (i, j)),
        compiler_params=pltpu.CompilerParams(
            dimension_semantics=("parallel", "parallel"),
            vmem_limit_bytes=_VMEM_LIMIT),
    )(*args)


# -----------------------------------------------------------------------------
# Multi-head self-attention kernel: one grid step per batch element,
# all heads processed from a packed (S, 3*Dp) QKV slab.
# -----------------------------------------------------------------------------
def _attention_kernel(qkv_ref, o_ref, *, num_heads, dh_pad, scale):
    qkv = qkv_ref[0].astype(jnp.float32)                     # (S, 3*Dp)
    dp = num_heads * dh_pad
    outs = []
    for h in range(num_heads):
        q = qkv[:, h * dh_pad:(h + 1) * dh_pad].astype(jnp.bfloat16)
        k = qkv[:, dp + h * dh_pad: dp + (h + 1) * dh_pad].astype(jnp.bfloat16)
        v = qkv[:, 2 * dp + h * dh_pad: 2 * dp + (h + 1) * dh_pad].astype(
            jnp.bfloat16)
        # scores: contract over the head dim (q @ k^T), f32 accumulation
        s = jax.lax.dot_general(q, k, (((1,), (1,)), ((), ())),
                                preferred_element_type=jnp.float32) * scale
        s = s - jnp.max(s, axis=-1, keepdims=True)
        p = jnp.exp(s)
        p = p * pl.reciprocal(jnp.sum(p, axis=-1, keepdims=True), approx=True)
        outs.append(jnp.dot(p.astype(jnp.bfloat16), v,
                            preferred_element_type=jnp.float32))
    # single lane-dense store of all heads
    o_ref[0] = jnp.concatenate(outs, axis=-1).astype(o_ref.dtype)


def attention(qkv, *, num_heads, dh_pad, scale):
    B, S, three_dp = qkv.shape
    Dp = num_heads * dh_pad
    assert three_dp == 3 * Dp
    kern = functools.partial(_attention_kernel, num_heads=num_heads,
                             dh_pad=dh_pad, scale=scale)
    return pl.pallas_call(
        kern,
        grid=(B,),
        out_shape=jax.ShapeDtypeStruct((B, S, Dp), jnp.float32),
        in_specs=[pl.BlockSpec((1, S, three_dp), lambda b: (b, 0, 0))],
        out_specs=pl.BlockSpec((1, S, Dp), lambda b: (b, 0, 0)),
        compiler_params=pltpu.CompilerParams(
            dimension_semantics=("parallel",),
            vmem_limit_bytes=_VMEM_LIMIT),
    )(qkv)


# -----------------------------------------------------------------------------
# Parameter init (deterministic, synthetic) — produced directly in padded,
# lane-dense (multiples of 128) layout; matmul weights stored in bf16.
# -----------------------------------------------------------------------------
def init_params(key, *, in_channels, patch_size, embed_dim, num_heads,
                num_layers, ll_dim, num_classes, num_patches):
    D = embed_dim
    H = num_heads
    assert D % H == 0
    Dh = D // H
    Dp = _round_up(D, LANE)
    assert Dp % H == 0, "padded embed dim must stay divisible by num_heads"
    Dhp = Dp // H
    Lp = _round_up(ll_dim, LANE)
    Cp = _round_up(num_classes, LANE)
    patch_dim = patch_size * patch_size * in_channels
    S = num_patches + 1

    def nrm(k, shape, scale=0.02):
        return (scale * jax.random.normal(k, shape)).astype(jnp.float32)

    def end_pad(a, shape):
        return jnp.pad(a, [(0, s - d) for d, s in zip(a.shape, shape)])

    def head_pad_out_cols(w):
        # (D, D) -> (Dp, Dp): input rows end-padded, output cols laid out so
        # head h occupies columns [h*Dhp, h*Dhp+Dh) (rest zero).
        w = jnp.pad(w, ((0, Dp - D), (0, 0)))
        out = jnp.zeros((Dp, Dp), jnp.float32)
        for h in range(H):
            out = out.at[:, h * Dhp:h * Dhp + Dh].set(w[:, h * Dh:(h + 1) * Dh])
        return out

    def head_pad_in_rows(w):
        # (D, D) -> (Dp, Dp): input rows in head-padded layout (matching the
        # attention output), output cols end-padded.
        w = jnp.pad(w, ((0, 0), (0, Dp - D)))
        out = jnp.zeros((Dp, Dp), jnp.float32)
        for h in range(H):
            out = out.at[h * Dhp:h * Dhp + Dh, :].set(w[h * Dh:(h + 1) * Dh, :])
        return out

    def ln_gamma():
        return end_pad(jnp.ones((1, D), jnp.float32), (1, Dp))

    keys = iter(jax.random.split(key, 6 * num_layers + 8))
    bf16 = jnp.bfloat16

    params = {
        "w_patch": end_pad(nrm(next(keys), (patch_dim, D)),
                           (patch_dim, Dp)).astype(bf16),
        "b_patch": jnp.zeros((1, Dp), jnp.float32),
        "cls_token": end_pad(nrm(next(keys), (1, 1, D)), (1, 1, Dp)),
        "pos_emb": end_pad(nrm(next(keys), (1, S, D)), (1, S, Dp)),
        "ln_f_g": ln_gamma(),
        "ln_f_b": jnp.zeros((1, Dp), jnp.float32),
        "w_cls": end_pad(nrm(next(keys), (D, num_classes)),
                         (Dp, Cp)).astype(bf16),
        "b_cls": jnp.zeros((1, Cp), jnp.float32),
        "layers": [],
    }

    for _ in range(num_layers):
        wq = nrm(next(keys), (D, D))
        wk = nrm(next(keys), (D, D))
        wv = nrm(next(keys), (D, D))
        wo = nrm(next(keys), (D, D))
        w1 = nrm(next(keys), (D, ll_dim))
        w2 = nrm(next(keys), (ll_dim, D))
        lp = {
            "ln1_g": ln_gamma(),
            "ln1_b": jnp.zeros((1, Dp), jnp.float32),
            # fused, head-padded QKV weight: (Dp, 3*Dp)
            "w_qkv": jnp.concatenate(
                [head_pad_out_cols(wq), head_pad_out_cols(wk),
                 head_pad_out_cols(wv)], axis=1).astype(bf16),
            "b_qkv": jnp.zeros((1, 3 * Dp), jnp.float32),
            "wo": head_pad_in_rows(wo).astype(bf16),
            "bo": jnp.zeros((1, Dp), jnp.float32),
            "ln2_g": ln_gamma(),
            "ln2_b": jnp.zeros((1, Dp), jnp.float32),
            "w1": end_pad(w1, (Dp, Lp)).astype(bf16),
            "b1": jnp.zeros((1, Lp), jnp.float32),
            "w2": end_pad(w2, (Lp, Dp)).astype(bf16),
            "b2": jnp.zeros((1, Dp), jnp.float32),
        }
        params["layers"].append(lp)
    return params


# -----------------------------------------------------------------------------
# Forward pass (thin XLA glue, hot paths in Pallas)
# -----------------------------------------------------------------------------
def vit_forward(x, params, *, patch_size, num_heads, embed_dim, num_classes):
    B, C, H, W = x.shape
    P = patch_size
    nH, nW = H // P, W // P
    NP = nH * nW
    S = NP + 1
    D = embed_dim
    Dp = params["b_patch"].shape[1]
    Dh = D // num_heads
    Dhp = Dp // num_heads

    # --- Patch embedding: patchify (XLA reshape/transpose) + Pallas matmul ---
    patches = x.reshape(B, C, nH, P, nW, P)
    patches = patches.transpose(0, 2, 4, 1, 3, 5).reshape(B * NP, C * P * P)
    emb = fused_linear(patches, params["w_patch"], params["b_patch"])  # (B*NP,Dp)
    emb = emb.reshape(B, NP, Dp)

    cls = jnp.broadcast_to(params["cls_token"], (B, 1, Dp))
    xseq = jnp.concatenate([cls, emb], axis=1) + params["pos_emb"]     # (B,S,Dp)
    x_flat = xseq.reshape(B * S, Dp)

    scale = 1.0 / (Dh ** 0.5)

    for lp in params["layers"]:
        # ---- pre-norm MHA: fused LN + QKV projection ----
        qkv = fused_linear(x_flat, lp["w_qkv"], lp["b_qkv"],
                           gamma=lp["ln1_g"], beta=lp["ln1_b"], norm_dim=D)
        attn = attention(qkv.reshape(B, S, 3 * Dp),
                         num_heads=num_heads, dh_pad=Dhp, scale=scale)
        # output projection with fused residual add
        x_flat = fused_linear(attn.reshape(B * S, Dp), lp["wo"], lp["bo"],
                              residual=x_flat)
        # ---- pre-norm MLP: fused LN + W1 + GELU, then W2 + fused residual ----
        h1 = fused_linear(x_flat, lp["w1"], lp["b1"],
                          gamma=lp["ln2_g"], beta=lp["ln2_b"], norm_dim=D,
                          activation="gelu")
        x_flat = fused_linear(h1, lp["w2"], lp["b2"], residual=x_flat)

    # ---- final LN + classifier, fused, applied only to the CLS tokens ----
    cls_tok = x_flat.reshape(B, S, Dp)[:, 0, :]                        # (B, Dp)
    logits = fused_linear(cls_tok, params["w_cls"], params["b_cls"],
                          gamma=params["ln_f_g"], beta=params["ln_f_b"],
                          norm_dim=D)
    return logits[:, :num_classes]                                     # (B, C)


# -----------------------------------------------------------------------------
if __name__ == "__main__":
    B, C, H, W = 2, 4, 16, 16
    patch_size = 4
    num_heads = 4
    num_layers = 2
    ll_dim = 128
    num_classes = 10
    dropout_rate = 0.0            # identity at inference

    embed_dim = patch_size * patch_size * C                  # 64
    num_patches = (H // patch_size) * (W // patch_size)      # 16

    key = jax.random.PRNGKey(0)
    key_p, key_x = jax.random.split(key)
    params = init_params(
        key_p,
        in_channels=C, patch_size=patch_size, embed_dim=embed_dim,
        num_heads=num_heads, num_layers=num_layers, ll_dim=ll_dim,
        num_classes=num_classes, num_patches=num_patches,
    )
    x = jax.random.normal(key_x, (B, C, H, W), dtype=jnp.float32)

    fwd = jax.jit(functools.partial(
        vit_forward, patch_size=patch_size, num_heads=num_heads,
        embed_dim=embed_dim, num_classes=num_classes))

    out = jax.block_until_ready(fwd(x, params))
    assert out.shape == (B, num_classes), out.shape
    assert bool(jnp.all(jnp.isfinite(out)))
    print("KERNEL_OK")
</pallas_src>

<mosaic_0001>
module attributes {stable_mosaic.version = 11 : i64} {
  func.func @_fused_linear_kernel(%arg0: i32, %arg1: i32, %arg2: memref<32x64xf32, #tpu.memory_space<vmem>>, %arg3: memref<64x128xbf16, #tpu.memory_space<vmem>>, %arg4: memref<1x128xf32, #tpu.memory_space<vmem>>, %arg5: memref<32x128xf32, #tpu.memory_space<vmem>>) attributes {dimension_semantics = [#tpu.dimension_semantics<parallel>, #tpu.dimension_semantics<parallel>], iteration_bounds = array<i64: 1, 1>, scalar_prefetch = 0 : i64, scratch_operands = 0 : i64, tpu.core_type = #tpu.core_type<tc>, window_params = [{transform_indices = @transform_0, window_bounds = array<i64: 32, 64>}, {transform_indices = @transform_1, window_bounds = array<i64: 64, 128>}, {transform_indices = @transform_2, window_bounds = array<i64: 1, 128>}, {transform_indices = @transform_3, window_bounds = array<i64: 32, 128>}]} {
    %c0 = arith.constant 0 : index
    %c0_0 = arith.constant 0 : index
    %0 = vector.load %arg2[%c0, %c0_0] : memref<32x64xf32, #tpu.memory_space<vmem>>, vector<32x64xf32>
    %1 = arith.truncf %0 : vector<32x64xf32> to vector<32x64xbf16>
    %c0_1 = arith.constant 0 : index
    %c0_2 = arith.constant 0 : index
    %2 = vector.load %arg3[%c0_1, %c0_2] : memref<64x128xbf16, #tpu.memory_space<vmem>>, vector<64x128xbf16>
    %cst = arith.constant dense<0.000000e+00> : vector<32x128xf32>
    %3 = tpu.matmul %1, %2, %cst {dimension_numbers = #tpu.dot_dimension_numbers<[1], [0], [0], [1], [0, 0, 1, 1], [], []>} : vector<32x64xbf16>, vector<64x128xbf16>, vector<32x128xf32> -> vector<32x128xf32>
    %c0_3 = arith.constant 0 : index
    %c0_4 = arith.constant 0 : index
    %4 = vector.load %arg4[%c0_3, %c0_4] : memref<1x128xf32, #tpu.memory_space<vmem>>, vector<1x128xf32>
    %5 = vector.broadcast %4 : vector<1x128xf32> to vector<32x128xf32>
    %6 = arith.addf %3, %5 : vector<32x128xf32>
    %c0_5 = arith.constant 0 : index
    %c0_6 = arith.constant 0 : index
    %7 = vector.load %arg5[%c0_5, %c0_6] : memref<32x128xf32, #tpu.memory_space<vmem>>, vector<32x128xf32>
    tpu.vector_store %arg5[%c0_5, %c0_6], %6 {strides = array<i32>} : memref<32x128xf32, #tpu.memory_space<vmem>>, vector<32x128xf32>,
    return
  }
  func.func @transform_0(%arg0: i32, %arg1: i32) -> (i32, i32) {
    %c0_i32 = arith.constant 0 : i32
    %c0_i32_0 = arith.constant 0 : i32
    return %arg1, %c0_i32 : i32, i32
  }
  func.func @transform_1(%arg0: i32, %arg1: i32) -> (i32, i32) {
    %c0_i32 = arith.constant 0 : i32
    %c0_i32_0 = arith.constant 0 : i32
    return %c0_i32, %arg0 : i32, i32
  }
  func.func @transform_2(%arg0: i32, %arg1: i32) -> (i32, i32) {
    %c0_i32 = arith.constant 0 : i32
    %c0_i32_0 = arith.constant 0 : i32
    return %c0_i32, %arg0 : i32, i32
  }
  func.func @transform_3(%arg0: i32, %arg1: i32) -> (i32, i32) {
    %c0_i32 = arith.constant 0 : i32
    return %arg1, %arg0 : i32, i32
  }
}

module attributes {stable_mosaic.version = 11 : i64} {
  func.func @_fused_linear_kernel(%arg0: i32, %arg1: i32, %arg2: memref<34x128xf32, #tpu.memory_space<vmem>>, %arg3: memref<1x128xf32, #tpu.memory_space<vmem>>, %arg4: memref<1x128xf32, #tpu.memory_space<vmem>>, %arg5: memref<128x384xbf16, #tpu.memory_space<vmem>>, %arg6: memref<1x384xf32, #tpu.memory_space<vmem>>, %arg7: memref<34x384xf32, #tpu.memory_space<vmem>>) attributes {dimension_semantics = [#tpu.dimension_semantics<parallel>, #tpu.dimension_semantics<parallel>], iteration_bounds = array<i64: 1, 1>, scalar_prefetch = 0 : i64, scratch_operands = 0 : i64, tpu.core_type = #tpu.core_type<tc>, window_params = [{transform_indices = @transform_0, window_bounds = array<i64: 34, 128>}, {pipeline_mode = #tpu.pipeline_mode<synchronous>, transform_indices = @transform_1, window_bounds = array<i64: 1, 128>}, {pipeline_mode = #tpu.pipeline_mode<synchronous>, transform_indices = @transform_2, window_bounds = array<i64: 1, 128>}, {transform_indices = @transform_3, window_bounds = array<i64: 128, 384>}, {transform_indices = @transform_4, window_bounds = array<i64: 1, 384>}, {transform_indices = @transform_5, window_bounds = array<i64: 34, 384>}]} {
    %c0 = arith.constant 0 : index
    %c0_0 = arith.constant 0 : index
    %0 = vector.load %arg2[%c0, %c0_0] : memref<34x128xf32, #tpu.memory_space<vmem>>, vector<34x128xf32>
    %c0_1 = arith.constant 0 : index
    %c0_2 = arith.constant 0 : index
    %1 = vector.load %arg3[%c0_1, %c0_2] : memref<1x128xf32, #tpu.memory_space<vmem>>, vector<1x128xf32>
    %c0_3 = arith.constant 0 : index
    %c0_4 = arith.constant 0 : index
    %2 = vector.load %arg4[%c0_3, %c0_4] : memref<1x128xf32, #tpu.memory_space<vmem>>, vector<1x128xf32>
    %cst = arith.constant dense<0.000000e+00> : vector<34xf32>
    %3 = vector.multi_reduction <add>, %0, %cst [1] : vector<34x128xf32> to vector<34xf32>
    %4 = vector.shape_cast %3 : vector<34xf32> to vector<34x1xf32>
    %cst_5 = arith.constant 1.562500e-02 : f32
    %5 = vector.broadcast %cst_5 : f32 to vector<34x1xf32>
    %6 = arith.mulf %4, %5 : vector<34x1xf32>
    %7 = arith.mulf %0, %0 : vector<34x128xf32>
    %cst_6 = arith.constant dense<0.000000e+00> : vector<34xf32>
    %8 = vector.multi_reduction <add>, %7, %cst_6 [1] : vector<34x128xf32> to vector<34xf32>
    %9 = vector.shape_cast %8 : vector<34xf32> to vector<34x1xf32>
    %cst_7 = arith.constant 1.562500e-02 : f32
    %10 = vector.broadcast %cst_7 : f32 to vector<34x1xf32>
    %11 = arith.mulf %9, %10 : vector<34x1xf32>
    %12 = arith.mulf %6, %6 : vector<34x1xf32>
    %13 = arith.subf %11, %12 : vector<34x1xf32>
    %14 = vector.broadcast %6 : vector<34x1xf32> to vector<34x128xf32>
    %15 = arith.subf %0, %14 : vector<34x128xf32>
    %cst_8 = arith.constant 9.99999974E-6 : f32
    %16 = vector.broadcast %cst_8 : f32 to vector<34x1xf32>
    %17 = arith.addf %13, %16 : vector<34x1xf32>
    %18 = math.rsqrt %17 : vector<34x1xf32>
    %19 = vector.broadcast %18 : vector<34x1xf32> to vector<34x128xf32>
    %20 = arith.mulf %15, %19 : vector<34x128xf32>
    %21 = vector.broadcast %1 : vector<1x128xf32> to vector<34x128xf32>
    %22 = arith.mulf %20, %21 : vector<34x128xf32>
    %23 = vector.broadcast %2 : vector<1x128xf32> to vector<34x128xf32>
    %24 = arith.addf %22, %23 : vector<34x128xf32>
    %25 = arith.truncf %24 : vector<34x128xf32> to vector<34x128xbf16>
    %c0_9 = arith.constant 0 : index
    %c0_10 = arith.constant 0 : index
    %26 = vector.load %arg5[%c0_9, %c0_10] : memref<128x384xbf16, #tpu.memory_space<vmem>>, vector<128x384xbf16>
    %cst_11 = arith.constant dense<0.000000e+00> : vector<34x384xf32>
    %27 = tpu.matmul %25, %26, %cst_11 {dimension_numbers = #tpu.dot_dimension_numbers<[1], [0], [0], [1], [0, 0, 1, 1], [], []>} : vector<34x128xbf16>, vector<128x384xbf16>, vector<34x384xf32> -> vector<34x384xf32>
    %c0_12 = arith.constant 0 : index
    %c0_13 = arith.constant 0 : index
    %28 = vector.load %arg6[%c0_12, %c0_13] : memref<1x384xf32, #tpu.memory_space<vmem>>, vector<1x384xf32>
    %29 = vector.broadcast %28 : vector<1x384xf32> to vector<34x384xf32>
    %30 = arith.addf %27, %29 : vector<34x384xf32>
    %c0_14 = arith.constant 0 : index
    %c0_15 = arith.constant 0 : index
    %31 = vector.load %arg7[%c0_14, %c0_15] : memref<34x384xf32, #tpu.memory_space<vmem>>, vector<34x384xf32>
    tpu.vector_store %arg7[%c0_14, %c0_15], %30 {strides = array<i32>} : memref<34x384xf32, #tpu.memory_space<vmem>>, vector<34x384xf32>,
    return
  }
  func.func @transform_0(%arg0: i32, %arg1: i32) -> (i32, i32) {
    %c0_i32 = arith.constant 0 : i32
    %c0_i32_0 = arith.constant 0 : i32
    return %arg1, %c0_i32 : i32, i32
  }
  func.func @transform_1(%arg0: i32, %arg1: i32) -> (i32, i32) {
    %c0_i32 = arith.constant 0 : i32
    %c0_i32_0 = arith.constant 0 : i32
    %c0_i32_1 = arith.constant 0 : i32
    return %c0_i32, %c0_i32_0 : i32, i32
  }
  func.func @transform_2(%arg0: i32, %arg1: i32) -> (i32, i32) {
    %c0_i32 = arith.constant 0 : i32
    %c0_i32_0 = arith.constant 0 : i32
    %c0_i32_1 = arith.constant 0 : i32
    return %c0_i32, %c0_i32_0 : i32, i32
  }
  func.func @transform_3(%arg0: i32, %arg1: i32) -> (i32, i32) {
    %c0_i32 = arith.constant 0 : i32
    %c0_i32_0 = arith.constant 0 : i32
    return %c0_i32, %arg0 : i32, i32
  }
  func.func @transform_4(%arg0: i32, %arg1: i32) -> (i32, i32) {
    %c0_i32 = arith.constant 0 : i32
    %c0_i32_0 = arith.constant 0 : i32
    return %c0_i32, %arg0 : i32, i32
  }
  func.func @transform_5(%arg0: i32, %arg1: i32) -> (i32, i32) {
    %c0_i32 = arith.constant 0 : i32
    return %arg1, %arg0 : i32, i32
  }
}

module attributes {stable_mosaic.version = 11 : i64} {
  func.func @_attention_kernel(%arg0: i32, %arg1: memref<1x17x384xf32, #tpu.memory_space<vmem>>, %arg2: memref<1x17x128xf32, #tpu.memory_space<vmem>>) attributes {dimension_semantics = [#tpu.dimension_semantics<parallel>], iteration_bounds = array<i64: 2>, scalar_prefetch = 0 : i64, scratch_operands = 0 : i64, tpu.core_type = #tpu.core_type<tc>, window_params = [{transform_indices = @transform_0, window_bounds = array<i64: 1, 17, 384>}, {transform_indices = @transform_1, window_bounds = array<i64: 1, 17, 128>}]} {
    %c0 = arith.constant 0 : index
    %c0_0 = arith.constant 0 : index
    %c0_1 = arith.constant 0 : index
    %0 = vector.load %arg1[%c0, %c0_0, %c0_1] : memref<1x17x384xf32, #tpu.memory_space<vmem>>, vector<1x17x384xf32>
    %1 = vector.shape_cast %0 : vector<1x17x384xf32> to vector<17x384xf32>
    %2 = vector.extract_strided_slice %1 {offsets = [0, 0], sizes = [17, 32], strides = [1, 1]} : vector<17x384xf32> to vector<17x32xf32>
    %3 = arith.truncf %2 : vector<17x32xf32> to vector<17x32xbf16>
    %4 = vector.extract_strided_slice %1 {offsets = [0, 128], sizes = [17, 32], strides = [1, 1]} : vector<17x384xf32> to vector<17x32xf32>
    %5 = arith.truncf %4 : vector<17x32xf32> to vector<17x32xbf16>
    %6 = vector.extract_strided_slice %1 {offsets = [0, 256], sizes = [17, 32], strides = [1, 1]} : vector<17x384xf32> to vector<17x32xf32>
    %7 = arith.truncf %6 : vector<17x32xf32> to vector<17x32xbf16>
    %cst = arith.constant dense<0.000000e+00> : vector<17x17xf32>
    %8 = tpu.matmul %3, %5, %cst {dimension_numbers = #tpu.dot_dimension_numbers<[1], [1], [0], [0], [0, 0, 1, 0], [], []>} : vector<17x32xbf16>, vector<17x32xbf16>, vector<17x17xf32> -> vector<17x17xf32>
    %cst_2 = arith.constant 2.500000e-01 : f32
    %9 = vector.broadcast %cst_2 : f32 to vector<17x17xf32>
    %10 = arith.mulf %8, %9 : vector<17x17xf32>
    %cst_3 = arith.constant dense<0xFF800000> : vector<17xf32>
    %11 = vector.multi_reduction <maximumf>, %10, %cst_3 [1] : vector<17x17xf32> to vector<17xf32>
    %12 = vector.shape_cast %11 : vector<17xf32> to vector<17x1xf32>
    %13 = vector.broadcast %12 : vector<17x1xf32> to vector<17x17xf32>
    %14 = arith.subf %10, %13 : vector<17x17xf32>
    %15 = math.exp %14 : vector<17x17xf32>
    %cst_4 = arith.constant dense<0.000000e+00> : vector<17xf32>
    %16 = vector.multi_reduction <add>, %15, %cst_4 [1] : vector<17x17xf32> to vector<17xf32>
    %17 = vector.shape_cast %16 : vector<17xf32> to vector<17x1xf32>
    %18 = tpu.reciprocal %17 {approx = true} : vector<17x1xf32> -> vector<17x1xf32>
    %19 = vector.broadcast %18 : vector<17x1xf32> to vector<17x17xf32>
    %20 = arith.mulf %15, %19 : vector<17x17xf32>
    %21 = arith.truncf %20 : vector<17x17xf32> to vector<17x17xbf16>
    %cst_5 = arith.constant dense<0.000000e+00> : vector<17x32xf32>
    %22 = tpu.matmul %21, %7, %cst_5 {dimension_numbers = #tpu.dot_dimension_numbers<[1], [0], [0], [1], [0, 0, 1, 1], [], []>} : vector<17x17xbf16>, vector<17x32xbf16>, vector<17x32xf32> -> vector<17x32xf32>
    %23 = vector.extract_strided_slice %1 {offsets = [0, 32], sizes = [17, 32], strides = [1, 1]} : vector<17x384xf32> to vector<17x32xf32>
    %24 = arith.truncf %23 : vector<17x32xf32> to vector<17x32xbf16>
    %25 = vector.extract_strided_slice %1 {offsets = [0, 160], sizes = [17, 32], strides = [1, 1]} : vector<17x384xf32> to vector<17x32xf32>
    %26 = arith.truncf %25 : vector<17x32xf32> to vector<17x32xbf16>
    %27 = vector.extract_strided_slice %1 {offsets = [0, 288], sizes = [17, 32], strides = [1, 1]} : vector<17x384xf32> to vector<17x32xf32>
    %28 = arith.truncf %27 : vector<17x32xf32> to vector<17x32xbf16>
    %cst_6 = arith.constant dense<0.000000e+00> : vector<17x17xf32>
    %29 = tpu.matmul %24, %26, %cst_6 {dimension_numbers = #tpu.dot_dimension_numbers<[1], [1], [0], [0], [0, 0, 1, 0], [], []>} : vector<17x32xbf16>, vector<17x32xbf16>, vector<17x17xf32> -> vector<17x17xf32>
    %cst_7 = arith.constant 2.500000e-01 : f32
    %30 = vector.broadcast %cst_7 : f32 to vector<17x17xf32>
    %31 = arith.mulf %29, %30 : vector<17x17xf32>
    %cst_8 = arith.constant dense<0xFF800000> : vector<17xf32>
    %32 = vector.multi_reduction <maximumf>, %31, %cst_8 [1] : vector<17x17xf32> to vector<17xf32>
    %33 = vector.shape_cast %32 : vector<17xf32> to vector<17x1xf32>
    %34 = vector.broadcast %33 : vector<17x1xf32> to vector<17x17xf32>
    %35 = arith.subf %31, %34 : vector<17x17xf32>
    %36 = math.exp %35 : vector<17x17xf32>
    %cst_9 = arith.constant dense<0.000000e+00> : vector<17xf32>
    %37 = vector.multi_reduction <add>, %36, %cst_9 [1] : vector<17x17xf32> to vector<17xf32>
    %38 = vector.shape_cast %37 : vector<17xf32> to vector<17x1xf32>
    %39 = tpu.reciprocal %38 {approx = true} : vector<17x1xf32> -> vector<17x1xf32>
    %40 = vector.broadcast %39 : vector<17x1xf32> to vector<17x17xf32>
    %41 = arith.mulf %36, %40 : vector<17x17xf32>
    %42 = arith.truncf %41 : vector<17x17xf32> to vector<17x17xbf16>
    %cst_10 = arith.constant dense<0.000000e+00> : vector<17x32xf32>
    %43 = tpu.matmul %42, %28, %cst_10 {dimension_numbers = #tpu.dot_dimension_numbers<[1], [0], [0], [1], [0, 0, 1, 1], [], []>} : vector<17x17xbf16>, vector<17x32xbf16>, vector<17x32xf32> -> vector<17x32xf32>
    %44 = vector.extract_strided_slice %1 {offsets = [0, 64], sizes = [17, 32], strides = [1, 1]} : vector<17x384xf32> to vector<17x32xf32>
    %45 = arith.truncf %44 : vector<17x32xf32> to vector<17x32xbf16>
    %46 = vector.extract_strided_slice %1 {offsets = [0, 192], sizes = [17, 32], strides = [1, 1]} : vector<17x384xf32> to vector<17x32xf32>
    %47 = arith.truncf %46 : vector<17x32xf32> to vector<17x32xbf16>
    %48 = vector.extract_strided_slice %1 {offsets = [0, 320], sizes = [17, 32], strides = [1, 1]} : vector<17x384xf32> to vector<17x32xf32>
    %49 = arith.truncf %48 : vector<17x32xf32> to vector<17x32xbf16>
    %cst_11 = arith.constant dense<0.000000e+00> : vector<17x17xf32>
    %50 = tpu.matmul %45, %47, %cst_11 {dimension_numbers = #tpu.dot_dimension_numbers<[1], [1], [0], [0], [0, 0, 1, 0], [], []>} : vector<17x32xbf16>, vector<17x32xbf16>, vector<17x17xf32> -> vector<17x17xf32>
    %cst_12 = arith.constant 2.500000e-01 : f32
    %51 = vector.broadcast %cst_12 : f32 to vector<17x17xf32>
    %52 = arith.mulf %50, %51 : vector<17x17xf32>
    %cst_13 = arith.constant dense<0xFF800000> : vector<17xf32>
    %53 = vector.multi_reduction <maximumf>, %52, %cst_13 [1] : vector<17x17xf32> to vector<17xf32>
    %54 = vector.shape_cast %53 : vector<17xf32> to vector<17x1xf32>
    %55 = vector.broadcast %54 : vector<17x1xf32> to vector<17x17xf32>
    %56 = arith.subf %52, %55 : vector<17x17xf32>
    %57 = math.exp %56 : vector<17x17xf32>
    %cst_14 = arith.constant dense<0.000000e+00> : vector<17xf32>
    %58 = vector.multi_reduction <add>, %57, %cst_14 [1] : vector<17x17xf32> to vector<17xf32>
    %59 = vector.shape_cast %58 : vector<17xf32> to vector<17x1xf32>
    %60 = tpu.reciprocal %59 {approx = true} : vector<17x1xf32> -> vector<17x1xf32>
    %61 = vector.broadcast %60 : vector<17x1xf32> to vector<17x17xf32>
    %62 = arith.mulf %57, %61 : vector<17x17xf32>
    %63 = arith.truncf %62 : vector<17x17xf32> to vector<17x17xbf16>
    %cst_15 = arith.constant dense<0.000000e+00> : vector<17x32xf32>
    %64 = tpu.matmul %63, %49, %cst_15 {dimension_numbers = #tpu.dot_dimension_numbers<[1], [0], [0], [1], [0, 0, 1, 1], [], []>} : vector<17x17xbf16>, vector<17x32xbf16>, vector<17x32xf32> -> vector<17x32xf32>
    %65 = vector.extract_strided_slice %1 {offsets = [0, 96], sizes = [17, 32], strides = [1, 1]} : vector<17x384xf32> to vector<17x32xf32>
    %66 = arith.truncf %65 : vector<17x32xf32> to vector<17x32xbf16>
    %67 = vector.extract_strided_slice %1 {offsets = [0, 224], sizes = [17, 32], strides = [1, 1]} : vector<17x384xf32> to vector<17x32xf32>
    %68 = arith.truncf %67 : vector<17x32xf32> to vector<17x32xbf16>
    %69 = vector.extract_strided_slice %1 {offsets = [0, 352], sizes = [17, 32], strides = [1, 1]} : vector<17x384xf32> to vector<17x32xf32>
    %70 = arith.truncf %69 : vector<17x32xf32> to vector<17x32xbf16>
    %cst_16 = arith.constant dense<0.000000e+00> : vector<17x17xf32>
    %71 = tpu.matmul %66, %68, %cst_16 {dimension_numbers = #tpu.dot_dimension_numbers<[1], [1], [0], [0], [0, 0, 1, 0], [], []>} : vector<17x32xbf16>, vector<17x32xbf16>, vector<17x17xf32> -> vector<17x17xf32>
    %cst_17 = arith.constant 2.500000e-01 : f32
    %72 = vector.broadcast %cst_17 : f32 to vector<17x17xf32>
    %73 = arith.mulf %71, %72 : vector<17x17xf32>
    %cst_18 = arith.constant dense<0xFF800000> : vector<17xf32>
    %74 = vector.multi_reduction <maximumf>, %73, %cst_18 [1] : vector<17x17xf32> to vector<17xf32>
    %75 = vector.shape_cast %74 : vector<17xf32> to vector<17x1xf32>
    %76 = vector.broadcast %75 : vector<17x1xf32> to vector<17x17xf32>
    %77 = arith.subf %73, %76 : vector<17x17xf32>
    %78 = math.exp %77 : vector<17x17xf32>
    %cst_19 = arith.constant dense<0.000000e+00> : vector<17xf32>
    %79 = vector.multi_reduction <add>, %78, %cst_19 [1] : vector<17x17xf32> to vector<17xf32>
    %80 = vector.shape_cast %79 : vector<17xf32> to vector<17x1xf32>
    %81 = tpu.reciprocal %80 {approx = true} : vector<17x1xf32> -> vector<17x1xf32>
    %82 = vector.broadcast %81 : vector<17x1xf32> to vector<17x17xf32>
    %83 = arith.mulf %78, %82 : vector<17x17xf32>
    %84 = arith.truncf %83 : vector<17x17xf32> to vector<17x17xbf16>
    %cst_20 = arith.constant dense<0.000000e+00> : vector<17x32xf32>
    %85 = tpu.matmul %84, %70, %cst_20 {dimension_numbers = #tpu.dot_dimension_numbers<[1], [0], [0], [1], [0, 0, 1, 1], [], []>} : vector<17x17xbf16>, vector<17x32xbf16>, vector<17x32xf32> -> vector<17x32xf32>
    %86 = tpu.concatenate %22, %43, %64, %85 in 1 : vector<17x32xf32>, vector<17x32xf32>, vector<17x32xf32>, vector<17x32xf32> -> vector<17x128xf32>
    %c0_21 = arith.constant 0 : index
    %c0_22 = arith.constant 0 : index
    %c0_23 = arith.constant 0 : index
    %87 = vector.load %arg2[%c0_21, %c0_22, %c0_23] : memref<1x17x128xf32, #tpu.memory_space<vmem>>, vector<1x17x128xf32>
    %88 = vector.shape_cast %87 : vector<1x17x128xf32> to vector<17x128xf32>
    %89 = vector.shape_cast %86 : vector<17x128xf32> to vector<1x17x128xf32>
    tpu.vector_store %arg2[%c0_21, %c0_22, %c0_23], %89 {strides = array<i32>} : memref<1x17x128xf32, #tpu.memory_space<vmem>>, vector<1x17x128xf32>,
    return
  }
  func.func @transform_0(%arg0: i32) -> (i32, i32, i32) {
    %c0_i32 = arith.constant 0 : i32
    %c0_i32_0 = arith.constant 0 : i32
    %c0_i32_1 = arith.constant 0 : i32
    return %arg0, %c0_i32, %c0_i32_0 : i32, i32, i32
  }
  func.func @transform_1(%arg0: i32) -> (i32, i32, i32) {
    %c0_i32 = arith.constant 0 : i32
    %c0_i32_0 = arith.constant 0 : i32
    %c0_i32_1 = arith.constant 0 : i32
    return %arg0, %c0_i32, %c0_i32_0 : i32, i32, i32
  }
}

module attributes {stable_mosaic.version = 11 : i64} {
  func.func @_fused_linear_kernel(%arg0: i32, %arg1: i32, %arg2: memref<34x128xf32, #tpu.memory_space<vmem>>, %arg3: memref<128x128xbf16, #tpu.memory_space<vmem>>, %arg4: memref<1x128xf32, #tpu.memory_space<vmem>>, %arg5: memref<34x128xf32, #tpu.memory_space<vmem>>, %arg6: memref<34x128xf32, #tpu.memory_space<vmem>>) attributes {dimension_semantics = [#tpu.dimension_semantics<parallel>, #tpu.dimension_semantics<parallel>], iteration_bounds = array<i64: 1, 1>, scalar_prefetch = 0 : i64, scratch_operands = 0 : i64, tpu.core_type = #tpu.core_type<tc>, window_params = [{transform_indices = @transform_0, window_bounds = array<i64: 34, 128>}, {transform_indices = @transform_1, window_bounds = array<i64: 128, 128>}, {transform_indices = @transform_2, window_bounds = array<i64: 1, 128>}, {transform_indices = @transform_3, window_bounds = array<i64: 34, 128>}, {transform_indices = @transform_4, window_bounds = array<i64: 34, 128>}]} {
    %c0 = arith.constant 0 : index
    %c0_0 = arith.constant 0 : index
    %0 = vector.load %arg2[%c0, %c0_0] : memref<34x128xf32, #tpu.memory_space<vmem>>, vector<34x128xf32>
    %1 = arith.truncf %0 : vector<34x128xf32> to vector<34x128xbf16>
    %c0_1 = arith.constant 0 : index
    %c0_2 = arith.constant 0 : index
    %2 = vector.load %arg3[%c0_1, %c0_2] : memref<128x128xbf16, #tpu.memory_space<vmem>>, vector<128x128xbf16>
    %cst = arith.constant dense<0.000000e+00> : vector<34x128xf32>
    %3 = tpu.matmul %1, %2, %cst {dimension_numbers = #tpu.dot_dimension_numbers<[1], [0], [0], [1], [0, 0, 1, 1], [], []>} : vector<34x128xbf16>, vector<128x128xbf16>, vector<34x128xf32> -> vector<34x128xf32>
    %c0_3 = arith.constant 0 : index
    %c0_4 = arith.constant 0 : index
    %4 = vector.load %arg4[%c0_3, %c0_4] : memref<1x128xf32, #tpu.memory_space<vmem>>, vector<1x128xf32>
    %5 = vector.broadcast %4 : vector<1x128xf32> to vector<34x128xf32>
    %6 = arith.addf %3, %5 : vector<34x128xf32>
    %c0_5 = arith.constant 0 : index
    %c0_6 = arith.constant 0 : index
    %7 = vector.load %arg5[%c0_5, %c0_6] : memref<34x128xf32, #tpu.memory_space<vmem>>, vector<34x128xf32>
    %8 = arith.addf %6, %7 : vector<34x128xf32>
    %c0_7 = arith.constant 0 : index
    %c0_8 = arith.constant 0 : index
    %9 = vector.load %arg6[%c0_7, %c0_8] : memref<34x128xf32, #tpu.memory_space<vmem>>, vector<34x128xf32>
    tpu.vector_store %arg6[%c0_7, %c0_8], %8 {strides = array<i32>} : memref<34x128xf32, #tpu.memory_space<vmem>>, vector<34x128xf32>,
    return
  }
  func.func @transform_0(%arg0: i32, %arg1: i32) -> (i32, i32) {
    %c0_i32 = arith.constant 0 : i32
    %c0_i32_0 = arith.constant 0 : i32
    return %arg1, %c0_i32 : i32, i32
  }
  func.func @transform_1(%arg0: i32, %arg1: i32) -> (i32, i32) {
    %c0_i32 = arith.constant 0 : i32
    %c0_i32_0 = arith.constant 0 : i32
    return %c0_i32, %arg0 : i32, i32
  }
  func.func @transform_2(%arg0: i32, %arg1: i32) -> (i32, i32) {
    %c0_i32 = arith.constant 0 : i32
    %c0_i32_0 = arith.constant 0 : i32
    return %c0_i32, %arg0 : i32, i32
  }
  func.func @transform_3(%arg0: i32, %arg1: i32) -> (i32, i32) {
    %c0_i32 = arith.constant 0 : i32
    return %arg1, %arg0 : i32, i32
  }
  func.func @transform_4(%arg0: i32, %arg1: i32) -> (i32, i32) {
    %c0_i32 = arith.constant 0 : i32
    return %arg1, %arg0 : i32, i32
  }
}

module attributes {stable_mosaic.version = 11 : i64} {
  func.func @_fused_linear_kernel(%arg0: i32, %arg1: i32, %arg2: memref<34x128xf32, #tpu.memory_space<vmem>>, %arg3: memref<1x128xf32, #tpu.memory_space<vmem>>, %arg4: memref<1x128xf32, #tpu.memory_space<vmem>>, %arg5: memref<128x128xbf16, #tpu.memory_space<vmem>>, %arg6: memref<1x128xf32, #tpu.memory_space<vmem>>, %arg7: memref<34x128xf32, #tpu.memory_space<vmem>>) attributes {dimension_semantics = [#tpu.dimension_semantics<parallel>, #tpu.dimension_semantics<parallel>], iteration_bounds = array<i64: 1, 1>, scalar_prefetch = 0 : i64, scratch_operands = 0 : i64, tpu.core_type = #tpu.core_type<tc>, window_params = [{transform_indices = @transform_0, window_bounds = array<i64: 34, 128>}, {pipeline_mode = #tpu.pipeline_mode<synchronous>, transform_indices = @transform_1, window_bounds = array<i64: 1, 128>}, {pipeline_mode = #tpu.pipeline_mode<synchronous>, transform_indices = @transform_2, window_bounds = array<i64: 1, 128>}, {transform_indices = @transform_3, window_bounds = array<i64: 128, 128>}, {transform_indices = @transform_4, window_bounds = array<i64: 1, 128>}, {transform_indices = @transform_5, window_bounds = array<i64: 34, 128>}]} {
    %c0 = arith.constant 0 : index
    %c0_0 = arith.constant 0 : index
    %0 = vector.load %arg2[%c0, %c0_0] : memref<34x128xf32, #tpu.memory_space<vmem>>, vector<34x128xf32>
    %c0_1 = arith.constant 0 : index
    %c0_2 = arith.constant 0 : index
    %1 = vector.load %arg3[%c0_1, %c0_2] : memref<1x128xf32, #tpu.memory_space<vmem>>, vector<1x128xf32>
    %c0_3 = arith.constant 0 : index
    %c0_4 = arith.constant 0 : index
    %2 = vector.load %arg4[%c0_3, %c0_4] : memref<1x128xf32, #tpu.memory_space<vmem>>, vector<1x128xf32>
    %cst = arith.constant dense<0.000000e+00> : vector<34xf32>
    %3 = vector.multi_reduction <add>, %0, %cst [1] : vector<34x128xf32> to vector<34xf32>
    %4 = vector.shape_cast %3 : vector<34xf32> to vector<34x1xf32>
    %cst_5 = arith.constant 1.562500e-02 : f32
    %5 = vector.broadcast %cst_5 : f32 to vector<34x1xf32>
    %6 = arith.mulf %4, %5 : vector<34x1xf32>
    %7 = arith.mulf %0, %0 : vector<34x128xf32>
    %cst_6 = arith.constant dense<0.000000e+00> : vector<34xf32>
    %8 = vector.multi_reduction <add>, %7, %cst_6 [1] : vector<34x128xf32> to vector<34xf32>
    %9 = vector.shape_cast %8 : vector<34xf32> to vector<34x1xf32>
    %cst_7 = arith.constant 1.562500e-02 : f32
    %10 = vector.broadcast %cst_7 : f32 to vector<34x1xf32>
    %11 = arith.mulf %9, %10 : vector<34x1xf32>
    %12 = arith.mulf %6, %6 : vector<34x1xf32>
    %13 = arith.subf %11, %12 : vector<34x1xf32>
    %14 = vector.broadcast %6 : vector<34x1xf32> to vector<34x128xf32>
    %15 = arith.subf %0, %14 : vector<34x128xf32>
    %cst_8 = arith.constant 9.99999974E-6 : f32
    %16 = vector.broadcast %cst_8 : f32 to vector<34x1xf32>
    %17 = arith.addf %13, %16 : vector<34x1xf32>
    %18 = math.rsqrt %17 : vector<34x1xf32>
    %19 = vector.broadcast %18 : vector<34x1xf32> to vector<34x128xf32>
    %20 = arith.mulf %15, %19 : vector<34x128xf32>
    %21 = vector.broadcast %1 : vector<1x128xf32> to vector<34x128xf32>
    %22 = arith.mulf %20, %21 : vector<34x128xf32>
    %23 = vector.broadcast %2 : vector<1x128xf32> to vector<34x128xf32>
    %24 = arith.addf %22, %23 : vector<34x128xf32>
    %25 = arith.truncf %24 : vector<34x128xf32> to vector<34x128xbf16>
    %c0_9 = arith.constant 0 : index
    %c0_10 = arith.constant 0 : index
    %26 = vector.load %arg5[%c0_9, %c0_10] : memref<128x128xbf16, #tpu.memory_space<vmem>>, vector<128x128xbf16>
    %cst_11 = arith.constant dense<0.000000e+00> : vector<34x128xf32>
    %27 = tpu.matmul %25, %26, %cst_11 {dimension_numbers = #tpu.dot_dimension_numbers<[1], [0], [0], [1], [0, 0, 1, 1], [], []>} : vector<34x128xbf16>, vector<128x128xbf16>, vector<34x128xf32> -> vector<34x128xf32>
    %c0_12 = arith.constant 0 : index
    %c0_13 = arith.constant 0 : index
    %28 = vector.load %arg6[%c0_12, %c0_13] : memref<1x128xf32, #tpu.memory_space<vmem>>, vector<1x128xf32>
    %29 = vector.broadcast %28 : vector<1x128xf32> to vector<34x128xf32>
    %30 = arith.addf %27, %29 : vector<34x128xf32>
    %cst_14 = arith.constant 5.000000e-01 : f32
    %31 = vector.broadcast %cst_14 : f32 to vector<34x128xf32>
    %32 = arith.mulf %31, %30 : vector<34x128xf32>
    %cst_15 = arith.constant 4.471500e-02 : f32
    %33 = vector.broadcast %cst_15 : f32 to vector<34x128xf32>
    %34 = arith.mulf %33, %30 : vector<34x128xf32>
    %35 = arith.mulf %34, %30 : vector<34x128xf32>
    %36 = arith.mulf %35, %30 : vector<34x128xf32>
    %37 = arith.addf %30, %36 : vector<34x128xf32>
    %cst_16 = arith.constant 0.797884583 : f32
    %38 = vector.broadcast %cst_16 : f32 to vector<34x128xf32>
    %39 = arith.mulf %38, %37 : vector<34x128xf32>
    %40 = math.tanh %39 : vector<34x128xf32>
    %cst_17 = arith.constant 1.000000e+00 : f32
    %41 = vector.broadcast %cst_17 : f32 to vector<34x128xf32>
    %42 = arith.addf %41, %40 : vector<34x128xf32>
    %43 = arith.mulf %32, %42 : vector<34x128xf32>
    %c0_18 = arith.constant 0 : index
    %c0_19 = arith.constant 0 : index
    %44 = vector.load %arg7[%c0_18, %c0_19] : memref<34x128xf32, #tpu.memory_space<vmem>>, vector<34x128xf32>
    tpu.vector_store %arg7[%c0_18, %c0_19], %43 {strides = array<i32>} : memref<34x128xf32, #tpu.memory_space<vmem>>, vector<34x128xf32>,
    return
  }
  func.func @transform_0(%arg0: i32, %arg1: i32) -> (i32, i32) {
    %c0_i32 = arith.constant 0 : i32
    %c0_i32_0 = arith.constant 0 : i32
    return %arg1, %c0_i32 : i32, i32
  }
  func.func @transform_1(%arg0: i32, %arg1: i32) -> (i32, i32) {
    %c0_i32 = arith.constant 0 : i32
    %c0_i32_0 = arith.constant 0 : i32
    %c0_i32_1 = arith.constant 0 : i32
    return %c0_i32, %c0_i32_0 : i32, i32
  }
  func.func @transform_2(%arg0: i32, %arg1: i32) -> (i32, i32) {
    %c0_i32 = arith.constant 0 : i32
    %c0_i32_0 = arith.constant 0 : i32
    %c0_i32_1 = arith.constant 0 : i32
    return %c0_i32, %c0_i32_0 : i32, i32
  }
  func.func @transform_3(%arg0: i32, %arg1: i32) -> (i32, i32) {
    %c0_i32 = arith.constant 0 : i32
    %c0_i32_0 = arith.constant 0 : i32
    return %c0_i32, %arg0 : i32, i32
  }
  func.func @transform_4(%arg0: i32, %arg1: i32) -> (i32, i32) {
    %c0_i32 = arith.constant 0 : i32
    %c0_i32_0 = arith.constant 0 : i32
    return %c0_i32, %arg0 : i32, i32
  }
  func.func @transform_5(%arg0: i32, %arg1: i32) -> (i32, i32) {
    %c0_i32 = arith.constant 0 : i32
    return %arg1, %arg0 : i32, i32
  }
}

module attributes {stable_mosaic.version = 11 : i64} {
  func.func @_fused_linear_kernel(%arg0: i32, %arg1: i32, %arg2: memref<2x128xf32, #tpu.memory_space<vmem>>, %arg3: memref<1x128xf32, #tpu.memory_space<vmem>>, %arg4: memref<1x128xf32, #tpu.memory_space<vmem>>, %arg5: memref<128x128xbf16, #tpu.memory_space<vmem>>, %arg6: memref<1x128xf32, #tpu.memory_space<vmem>>, %arg7: memref<2x128xf32, #tpu.memory_space<vmem>>) attributes {dimension_semantics = [#tpu.dimension_semantics<parallel>, #tpu.dimension_semantics<parallel>], iteration_bounds = array<i64: 1, 1>, scalar_prefetch = 0 : i64, scratch_operands = 0 : i64, tpu.core_type = #tpu.core_type<tc>, window_params = [{transform_indices = @transform_0, window_bounds = array<i64: 2, 128>}, {pipeline_mode = #tpu.pipeline_mode<synchronous>, transform_indices = @transform_1, window_bounds = array<i64: 1, 128>}, {pipeline_mode = #tpu.pipeline_mode<synchronous>, transform_indices = @transform_2, window_bounds = array<i64: 1, 128>}, {transform_indices = @transform_3, window_bounds = array<i64: 128, 128>}, {transform_indices = @transform_4, window_bounds = array<i64: 1, 128>}, {transform_indices = @transform_5, window_bounds = array<i64: 2, 128>}]} {
    %c0 = arith.constant 0 : index
    %c0_0 = arith.constant 0 : index
    %0 = vector.load %arg2[%c0, %c0_0] : memref<2x128xf32, #tpu.memory_space<vmem>>, vector<2x128xf32>
    %c0_1 = arith.constant 0 : index
    %c0_2 = arith.constant 0 : index
    %1 = vector.load %arg3[%c0_1, %c0_2] : memref<1x128xf32, #tpu.memory_space<vmem>>, vector<1x128xf32>
    %c0_3 = arith.constant 0 : index
    %c0_4 = arith.constant 0 : index
    %2 = vector.load %arg4[%c0_3, %c0_4] : memref<1x128xf32, #tpu.memory_space<vmem>>, vector<1x128xf32>
    %cst = arith.constant dense<0.000000e+00> : vector<2xf32>
    %3 = vector.multi_reduction <add>, %0, %cst [1] : vector<2x128xf32> to vector<2xf32>
    %4 = vector.shape_cast %3 : vector<2xf32> to vector<2x1xf32>
    %cst_5 = arith.constant 1.562500e-02 : f32
    %5 = vector.broadcast %cst_5 : f32 to vector<2x1xf32>
    %6 = arith.mulf %4, %5 : vector<2x1xf32>
    %7 = arith.mulf %0, %0 : vector<2x128xf32>
    %cst_6 = arith.constant dense<0.000000e+00> : vector<2xf32>
    %8 = vector.multi_reduction <add>, %7, %cst_6 [1] : vector<2x128xf32> to vector<2xf32>
    %9 = vector.shape_cast %8 : vector<2xf32> to vector<2x1xf32>
    %cst_7 = arith.constant 1.562500e-02 : f32
    %10 = vector.broadcast %cst_7 : f32 to vector<2x1xf32>
    %11 = arith.mulf %9, %10 : vector<2x1xf32>
    %12 = arith.mulf %6, %6 : vector<2x1xf32>
    %13 = arith.subf %11, %12 : vector<2x1xf32>
    %14 = vector.broadcast %6 : vector<2x1xf32> to vector<2x128xf32>
    %15 = arith.subf %0, %14 : vector<2x128xf32>
    %cst_8 = arith.constant 9.99999974E-6 : f32
    %16 = vector.broadcast %cst_8 : f32 to vector<2x1xf32>
    %17 = arith.addf %13, %16 : vector<2x1xf32>
    %18 = math.rsqrt %17 : vector<2x1xf32>
    %19 = vector.broadcast %18 : vector<2x1xf32> to vector<2x128xf32>
    %20 = arith.mulf %15, %19 : vector<2x128xf32>
    %21 = vector.broadcast %1 : vector<1x128xf32> to vector<2x128xf32>
    %22 = arith.mulf %20, %21 : vector<2x128xf32>
    %23 = vector.broadcast %2 : vector<1x128xf32> to vector<2x128xf32>
    %24 = arith.addf %22, %23 : vector<2x128xf32>
    %25 = arith.truncf %24 : vector<2x128xf32> to vector<2x128xbf16>
    %c0_9 = arith.constant 0 : index
    %c0_10 = arith.constant 0 : index
    %26 = vector.load %arg5[%c0_9, %c0_10] : memref<128x128xbf16, #tpu.memory_space<vmem>>, vector<128x128xbf16>
    %cst_11 = arith.constant dense<0.000000e+00> : vector<2x128xf32>
    %27 = tpu.matmul %25, %26, %cst_11 {dimension_numbers = #tpu.dot_dimension_numbers<[1], [0], [0], [1], [0, 0, 1, 1], [], []>} : vector<2x128xbf16>, vector<128x128xbf16>, vector<2x128xf32> -> vector<2x128xf32>
    %c0_12 = arith.constant 0 : index
    %c0_13 = arith.constant 0 : index
    %28 = vector.load %arg6[%c0_12, %c0_13] : memref<1x128xf32, #tpu.memory_space<vmem>>, vector<1x128xf32>
    %29 = vector.broadcast %28 : vector<1x128xf32> to vector<2x128xf32>
    %30 = arith.addf %27, %29 : vector<2x128xf32>
    %c0_14 = arith.constant 0 : index
    %c0_15 = arith.constant 0 : index
    %31 = vector.load %arg7[%c0_14, %c0_15] : memref<2x128xf32, #tpu.memory_space<vmem>>, vector<2x128xf32>
    tpu.vector_store %arg7[%c0_14, %c0_15], %30 {strides = array<i32>} : memref<2x128xf32, #tpu.memory_space<vmem>>, vector<2x128xf32>,
    return
  }
  func.func @transform_0(%arg0: i32, %arg1: i32) -> (i32, i32) {
    %c0_i32 = arith.constant 0 : i32
    %c0_i32_0 = arith.constant 0 : i32
    return %arg1, %c0_i32 : i32, i32
  }
  func.func @transform_1(%arg0: i32, %arg1: i32) -> (i32, i32) {
    %c0_i32 = arith.constant 0 : i32
    %c0_i32_0 = arith.constant 0 : i32
    %c0_i32_1 = arith.constant 0 : i32
    return %c0_i32, %c0_i32_0 : i32, i32
  }
  func.func @transform_2(%arg0: i32, %arg1: i32) -> (i32, i32) {
    %c0_i32 = arith.constant 0 : i32
    %c0_i32_0 = arith.constant 0 : i32
    %c0_i32_1 = arith.constant 0 : i32
    return %c0_i32, %c0_i32_0 : i32, i32
  }
  func.func @transform_3(%arg0: i32, %arg1: i32) -> (i32, i32) {
    %c0_i32 = arith.constant 0 : i32
    %c0_i32_0 = arith.constant 0 : i32
    return %c0_i32, %arg0 : i32, i32
  }
  func.func @transform_4(%arg0: i32, %arg1: i32) -> (i32, i32) {
    %c0_i32 = arith.constant 0 : i32
    %c0_i32_0 = arith.constant 0 : i32
    return %c0_i32, %arg0 : i32, i32
  }
  func.func @transform_5(%arg0: i32, %arg1: i32) -> (i32, i32) {
    %c0_i32 = arith.constant 0 : i32
    return %arg1, %arg0 : i32, i32
  }
}

</mosaic_0001>

<bundles_post_ra>
// kernel: vit_forward.12
= control target key start
LH: loop header
LB: loop body
LE: loop exit
PB: predicated region body
PF: predicated region fallthrough
CT: control target
= control target key end

     0   :  { %8 = vsyncpa [#allocation3], 0  ;;  %s391_s0 = inlined_call_operand.hbm [shape: f32[32,64], index: 0, kind: input, shape index: {}]   ;;  %s392_s1 = inlined_call_operand.hbm [shape: bf16[64,128], index: 1, kind: input, shape index: {}]   ;;  %s393_s2 = inlined_call_operand.hbm [shape: f32[1,128], index: 2, kind: input, shape index: {}]   ;;  %s394_s3 = inlined_call_operand.hbm [shape: f32[32,128], index: 3, kind: output, shape index: {}]  }
   0x1   :  { %9 = vsyncpa [#allocation6], 0 }
   0x2   :  { %10 = vsyncpa [#allocation4], 0  ;;  %s309_s12 = smov [#allocation5]   ;;  %s215_s16 = scalar_lea.hbm %s392_s1, 512 }
   0x3   :  { %s28_s13 = sshll.u32 %s309_s12, 4  ;;  %p216_p0 = scmp.ne.s32.totalorder %s392_s1, %s215_s16  ;;  %s29_s13 = int_to_ptr.vmem [resolvable:$true] %s28_s13 }
   0x4   :  { %p219_p1 = scmp.lt.u32.totalorder %s215_s16, %s392_s1 }
   0x6   :  { %p221_p2 = pnand %p219_p1, %p216_p0 }
   0x8   :  { %224 = shalt.err (!%p221_p2)
}
   0x9   :  { %s225_s21 = scalar_lea.vmem %s29_s13, 512  ;;  %p230_p4 = scmp.lt.s32.totalorder %s29_s13, %s29_s13 }
   0xa   :  { %p226_p3 = scmp.ne.s32.totalorder %s29_s13, %s225_s21  ;;  %p231_p5 = scmp.lt.s32.totalorder %s225_s21, %s225_s21 }
   0xc   :  { %p232_p6 = por %p231_p5, %p230_p4 }
   0xe   :  { %p233_p7 = pnand %p232_p6, %p226_p3 }
  0x10   :  { %236 = shalt.err (!%p233_p7)
}
  0x11   :  { %s310_s22 = smov 64   ;;  %s311_s23 = smov 4  }
  0x12   :  { %34 = dma.hbm_to_vmem [thread:$0]  %s392_s1, 512, %s29_s13, [#allocation6], %s310_s22, %s310_s22, %s311_s23  }
  0x13   :  { %s312_s26 = smov [#allocation2]   ;;  %s237_s30 = scalar_lea.hbm %s391_s0, 512 }
  0x14   :  { %s16_s27 = sshll.u32 %s312_s26, 4  ;;  %p238_p8 = scmp.ne.s32.totalorder %s391_s0, %s237_s30  ;;  %s17_s27 = int_to_ptr.vmem [resolvable:$true] %s16_s27 }
  0x15   :  { %p241_p9 = scmp.lt.u32.totalorder %s237_s30, %s391_s0 }
  0x17   :  { %p243_p10 = pnand %p241_p9, %p238_p8 }
  0x19   :  { %246 = shalt.err (!%p243_p10)
}
  0x1a   :  { %s247_s8 = scalar_lea.vmem %s17_s27, 512  ;;  %p252_p12 = scmp.lt.s32.totalorder %s17_s27, %s17_s27 }
  0x1b   :  { %p248_p11 = scmp.ne.s32.totalorder %s17_s27, %s247_s8  ;;  %p253_p13 = scmp.lt.s32.totalorder %s247_s8, %s247_s8 }
  0x1d   :  { %p254_p0 = por %p253_p13, %p252_p12 }
  0x1f   :  { %p255_p1 = pnand %p254_p0, %p248_p11 }
  0x21   :  { %258 = shalt.err (!%p255_p1)
}
  0x22   :  { %s313_s1 = smov 128   ;;  %s314_s9 = smov 8  }
  0x23   :  { %22 = dma.hbm_to_vmem [thread:$0]  %s391_s0, 512, %s17_s27, [#allocation3], %s313_s1, %s313_s1, %s314_s9  }
  0x24   :  { %s315_s12 = smov [#allocation7]   ;;  %s259_s16 = scalar_lea.hbm %s393_s2, 16 }
  0x25   :  { %s41_s13 = sshll.u32 %s315_s12, 4  ;;  %p260_p2 = scmp.ne.s32.totalorder %s393_s2, %s259_s16  ;;  %s42_s13 = int_to_ptr.vmem [resolvable:$true] %s41_s13 }
  0x26   :  { %p263_p3 = scmp.lt.u32.totalorder %s259_s16, %s393_s2 }
  0x28   :  { %p265_p4 = pnand %p263_p3, %p260_p2 }
  0x2a   :  { %268 = shalt.err (!%p265_p4)
}
  0x2b   :  { %s269_s21 = scalar_lea.vmem %s42_s13, 16  ;;  %s273_s0 = scalar_lea.vmem %s42_s13, 32 }
  0x2c   :  { %p270_p5 = scmp.ne.s32.totalorder %s42_s13, %s269_s21  ;;  %p274_p6 = scmp.lt.s32.totalorder %s42_s13, %s42_s13 }
  0x2d   :  { %p275_p7 = scmp.lt.s32.totalorder %s273_s0, %s269_s21 }
  0x2f   :  { %p276_p8 = por %p275_p7, %p274_p6 }
  0x31   :  { %p277_p9 = pnand %p276_p8, %p270_p5 }
  0x33   :  { %280 = shalt.err (!%p277_p9)
}
  0x34   :  { %44 = dma.hbm_to_vmem [thread:$0]  %s393_s2, 16, %s42_s13, [#allocation6]  }
  0x35   :  { %303 = dma.done.wait [#allocation3], 512  }
  0x36   :  { %304 = vsyncadd [#allocation3], 4294966784 }
  0x37   :  { %305 = dma.done.wait [#allocation6], 528  }
  0x38   :  { %306 = vsyncadd [#allocation6], 4294966768  ;;  %v211_v0 = vld [vmem:[#allocation5] sm:$0xff]   ;;  %v212_v1 = vld [vmem:[#allocation5 + $0x8] sm:$0xff]   ;;  %vm100_vm0 = vcmask 523264   ;;  %s316_s2 = smov [#allocation8]  }
  0x39   :  { %191 = vmatprep.subr.bf16.mxu0 %v211_v0  ;;  %v213_v2 = vld [vmem:[#allocation5 + $0x10] sm:$0xff]   ;;  %v55_v3 = vld [vmem:[#allocation2] sm:$0xff]  ;;  %v56_v4 = vld [vmem:[#allocation2 + $0x8] sm:$0xff]  ;;  %s165_s24 = sshll.u32 %s316_s2, 4  ;;  %s166_s24 = int_to_ptr.vmem [resolvable:$true] %s165_s24 }
  0x3a   :  { %192 = vmatpush3.bf16.msra.mxu0 %v211_v0  ;;  %v59_v5 = vpack.c.bf16 %v56_v4, %v55_v3  ;;  %v214_v6 = vld [vmem:[#allocation5 + $0x18] sm:$0xff]   ;;  %v57_v7 = vld [vmem:[#allocation2 + $0x10] sm:$0xff]  ;;  %v178_v10 = vld [vmem:[#allocation7] ss:$0 sm:$0xff]  ;;  %s281_s25 = scalar_lea.vmem %s166_s24, 512  ;;  %p286_p11 = scmp.lt.s32.totalorder %s166_s24, %s166_s24 }
  0x3b   :  { %193 = vmatprep.subr.bf16.mxu0 %v212_v1  ;;  %v58_v8 = vld [vmem:[#allocation2 + $0x18] sm:$0xff]  ;;  %p282_p10 = scmp.ne.s32.totalorder %s166_s24, %s281_s25  ;;  %p287_p12 = scmp.lt.s32.totalorder %s281_s25, %s281_s25 }
  0x3c   :  { %199 = vmatprep.mubr.msk.bf16.mxu0 %vm100_vm0, %v59_v5  ;;  %v60_v9 = vpack.c.bf16 %v58_v8, %v57_v7 }
  0x3d   :  { %p288_p13 = por %p287_p12, %p286_p11 }
  0x3e   :  { %194 = vmatpush3.bf16.msra.mxu0 %v212_v1 }
  0x3f   :  { %195 = vmatprep.subr.bf16.mxu0 %v213_v2  ;;  %p289_p0 = pnand %p288_p13, %p282_p10 }
  0x42   :  { %196 = vmatpush3.bf16.msra.mxu0 %v213_v2 }
  0x43   :  { %197 = vmatprep.subr.bf16.mxu0 %v214_v6 }
  0x46   :  { %198 = vmatpush3.bf16.msra.mxu0 %v214_v6 }
  0x49   :  { %200 = vmatmul.mubr.msk.bf16.vlgmr.msra.gmra.mrb[0].mxu0 %vm100_vm0, %v60_v9 }
 0x11c   :  { %v201_v11 = vpop.f32.mrb[0].mxu0 }
 0x11d   :  { %v150_v12 = vadd.f32 %v201_v11, %v178_v10  ;;  %v141_v13 = vpop.f32.mrb[1].mxu0 }
 0x11e   :  { %v142_v14 = vadd.f32 %v178_v10, %v141_v13  ;;  %v202_v15 = vpop.f32.mrb[2].mxu0 }
 0x11f   :  { %158 = vst [vmem:[#allocation8 + $0x10] sm:$0xff] %v150_v12  ;;  %v153_v16 = vadd.f32 %v202_v15, %v178_v10  ;;  %v144_v17 = vpop.f32.mrb[3].mxu0 }
 0x120   :  { %156 = vst [vmem:[#allocation8] sm:$0xff] %v142_v14  ;;  %v145_v18 = vadd.f32 %v178_v10, %v144_v17 }
 0x121   :  { %159 = vst [vmem:[#allocation8 + $0x18] sm:$0xff] %v153_v16 }
 0x122   :  { %157 = vst [vmem:[#allocation8 + $0x8] sm:$0xff] %v145_v18 }
 0x123   :  { %292 = shalt.err (!%p289_p0)
}
 0x124   :  { %s293_s28 = scalar_lea.hbm %s394_s3, 512 }
 0x125   :  { %p294_p1 = scmp.ne.s32.totalorder %s394_s3, %s293_s28  ;;  %p297_p2 = scmp.lt.u32.totalorder %s293_s28, %s394_s3 }
 0x127   :  { %p299_p3 = pnand %p297_p2, %p294_p1 }
 0x129   :  { %302 = shalt.err (!%p299_p3)
}
 0x12a   :  { %171 = dma.vmem_to_hbm [thread:$0]  %s166_s24, 512, %s394_s3, [#allocation4], %s313_s1, %s313_s1, %s314_s9  }
 0x12b   :  { %307 = dma.done.wait [#allocation4], 512  }
 0x12c   :  { %308 = vsyncadd [#allocation4], 4294966784 }
 0x12d   :  { %175 = vsyncpa [#allocation3], 1 }
 0x12e   :  { %176 = vsyncpa [#allocation6], 1 }
 0x12f   :  { %177 = vsyncpa [#allocation4], 1 }

// kernel: vit_forward.15
= control target key start
LH: loop header
LB: loop body
LE: loop exit
PB: predicated region body
PF: predicated region fallthrough
CT: control target
= control target key end

     0   :  { %9 = vsyncpa [#allocation3], 0  ;;  %s557_s0 = inlined_call_operand.hbm [shape: f32[34,128], index: 0, kind: input, shape index: {}]   ;;  %s558_s1 = inlined_call_operand.hbm [shape: bf16[128,128], index: 1, kind: input, shape index: {}]   ;;  %s559_s2 = inlined_call_operand.hbm [shape: f32[1,128], index: 2, kind: input, shape index: {}]   ;;  %s560_s3 = inlined_call_operand.hbm [shape: f32[34,128], index: 3, kind: input, shape index: {}]   ;;  %s561_s4 = inlined_call_operand.hbm [shape: f32[34,128], index: 4, kind: output, shape index: {}]  }
   0x1   :  { %10 = vsyncpa [#allocation6], 0 }
   0x2   :  { %11 = vsyncpa [#allocation9], 0 }
   0x3   :  { %12 = vsyncpa [#allocation4], 0  ;;  %s442_s15 = smov [#allocation5]   ;;  %s324_s19 = scalar_lea.hbm %s558_s1, 1024 }
   0x4   :  { %s30_s16 = sshll.u32 %s442_s15, 4  ;;  %p325_p0 = scmp.ne.s32.totalorder %s558_s1, %s324_s19  ;;  %s31_s16 = int_to_ptr.vmem [resolvable:$true] %s30_s16 }
   0x5   :  { %p328_p1 = scmp.lt.u32.totalorder %s324_s19, %s558_s1 }
   0x7   :  { %p330_p2 = pnand %p328_p1, %p325_p0 }
   0x9   :  { %333 = shalt.err (!%p330_p2)
}
   0xa   :  { %s334_s24 = scalar_lea.vmem %s31_s16, 1024  ;;  %p339_p4 = scmp.lt.s32.totalorder %s31_s16, %s31_s16 }
   0xb   :  { %p335_p3 = scmp.ne.s32.totalorder %s31_s16, %s334_s24  ;;  %p340_p5 = scmp.lt.s32.totalorder %s334_s24, %s334_s24 }
   0xd   :  { %p341_p6 = por %p340_p5, %p339_p4 }
   0xf   :  { %p342_p7 = pnand %p341_p6, %p335_p3 }
  0x11   :  { %345 = shalt.err (!%p342_p7)
}
  0x12   :  { %s443_s25 = smov 64   ;;  %s444_s26 = smov 4  }
  0x13   :  { %36 = dma.hbm_to_vmem [thread:$0]  %s558_s1, 1024, %s31_s16, [#allocation6], %s443_s25, %s443_s25, %s444_s26  }
  0x14   :  { %s445_s29 = smov [#allocation2]   ;;  %s346_s7 = scalar_lea.hbm %s557_s0, 640 }
  0x15   :  { %s18_s30 = sshll.u32 %s445_s29, 4  ;;  %p347_p8 = scmp.ne.s32.totalorder %s557_s0, %s346_s7  ;;  %s19_s30 = int_to_ptr.vmem [resolvable:$true] %s18_s30 }
  0x16   :  { %p350_p9 = scmp.lt.u32.totalorder %s346_s7, %s557_s0 }
  0x18   :  { %p352_p10 = pnand %p350_p9, %p347_p8 }
  0x1a   :  { %355 = shalt.err (!%p352_p10)
}
  0x1b   :  { %s356_s12 = scalar_lea.vmem %s19_s30, 640  ;;  %p361_p12 = scmp.lt.s32.totalorder %s19_s30, %s19_s30 }
  0x1c   :  { %p357_p11 = scmp.ne.s32.totalorder %s19_s30, %s356_s12  ;;  %p362_p13 = scmp.lt.s32.totalorder %s356_s12, %s356_s12 }
  0x1e   :  { %p363_p0 = por %p362_p13, %p361_p12 }
  0x20   :  { %p364_p1 = pnand %p363_p0, %p357_p11 }
  0x22   :  { %367 = shalt.err (!%p364_p1)
}
  0x23   :  { %s446_s1 = smov 128   ;;  %s447_s13 = smov 8  }
  0x24   :  { %24 = dma.hbm_to_vmem [thread:$0]  %s557_s0, 640, %s19_s30, [#allocation3], %s446_s1, %s446_s1, %s447_s13  }
  0x25   :  { %s448_s16 = smov [#allocation7]   ;;  %s449_s18 = smov [#allocation8]  }
  0x26   :  { %s43_s17 = sshll.u32 %s448_s16, 4  ;;  %s52_s19 = sshll.u32 %s449_s18, 4  ;;  %s44_s17 = int_to_ptr.vmem [resolvable:$true] %s43_s17  ;;  %s505_s19 = int_to_ptr.vmem [resolvable:$true] %s52_s19 }
  0x27   :  { %s368_s22 = scalar_lea.hbm %s559_s2, 16 }
  0x28   :  { %p369_p2 = scmp.ne.s32.totalorder %s559_s2, %s368_s22  ;;  %p372_p3 = scmp.lt.u32.totalorder %s368_s22, %s559_s2 }
  0x2a   :  { %p374_p4 = pnand %p372_p3, %p369_p2 }
  0x2c   :  { %377 = shalt.err (!%p374_p4)
}
  0x2d   :  { %s378_s0 = scalar_lea.vmem %s44_s17, 16  ;;  %s382_s27 = scalar_lea.vmem %s44_s17, 32 }
  0x2e   :  { %p379_p5 = scmp.ne.s32.totalorder %s44_s17, %s378_s0  ;;  %p383_p6 = scmp.lt.s32.totalorder %s44_s17, %s44_s17 }
  0x2f   :  { %p384_p7 = scmp.lt.s32.totalorder %s382_s27, %s378_s0 }
  0x31   :  { %p385_p8 = por %p384_p7, %p383_p6 }
  0x33   :  { %p386_p9 = pnand %p385_p8, %p379_p5 }
  0x35   :  { %389 = shalt.err (!%p386_p9)
}
  0x36   :  { %46 = dma.hbm_to_vmem [thread:$0]  %s559_s2, 16, %s44_s17, [#allocation6]  }
  0x37   :  { %s390_s6 = scalar_lea.hbm %s560_s3, 640 }
  0x38   :  { %p391_p10 = scmp.ne.s32.totalorder %s560_s3, %s390_s6  ;;  %p394_p11 = scmp.lt.u32.totalorder %s390_s6, %s560_s3 }
  0x3a   :  { %p396_p12 = pnand %p394_p11, %p391_p10 }
  0x3c   :  { %399 = shalt.err (!%p396_p12)
}
  0x3d   :  { %s400_s11 = scalar_lea.vmem %s505_s19, 640  ;;  %p405_p0 = scmp.lt.s32.totalorder %s505_s19, %s505_s19 }
  0x3e   :  { %p401_p13 = scmp.ne.s32.totalorder %s505_s19, %s400_s11  ;;  %p406_p1 = scmp.lt.s32.totalorder %s400_s11, %s400_s11 }
  0x40   :  { %p407_p2 = por %p406_p1, %p405_p0 }
  0x42   :  { %p408_p3 = pnand %p407_p2, %p401_p13 }
  0x44   :  { %411 = shalt.err (!%p408_p3)
}
  0x45   :  { %58 = dma.hbm_to_vmem [thread:$0]  %s560_s3, 640, %s505_s19, [#allocation9], %s446_s1, %s446_s1, %s447_s13  }
  0x46   :  { %434 = dma.done.wait [#allocation3], 640  }
  0x47   :  { %435 = vsyncadd [#allocation3], 4294966656 }
  0x48   :  { %436 = dma.done.wait [#allocation6], 1040  }
  0x49   :  { %437 = vsyncadd [#allocation6], 4294966256 }
  0x4a   :  { %438 = dma.done.wait [#allocation9], 640  }
  0x4b   :  { %439 = vsyncadd [#allocation9], 4294966656  ;;  %v450_v0 = vmov 0.0   ;;  %vm451_vm0 = vmmov 0   ;;  %v316_v1 = vld [vmem:[#allocation5] sm:$0xff]   ;;  %v317_v2 = vld [vmem:[#allocation5 + $0x8] sm:$0xff]  }
  0x4c   :  { %289 = vmatprep.subr.bf16.mxu1 %v450_v0  ;;  %261 = vmatprep.subr.bf16.mxu0 %v450_v0  ;;  %v318_v3 = vld [vmem:[#allocation5 + $0x10] sm:$0xff]   ;;  %v319_v4 = vld [vmem:[#allocation5 + $0x18] sm:$0xff]   ;;  %v320_v5 = vld [vmem:[#allocation5 + $0x20] sm:$0xff]   ;;  %s452_s3 = smov [#allocation10]  }
  0x4d   :  { %281 = vmatprep.mubr.msk.bf16.mxu1 %vm451_vm0, %v450_v0  ;;  %277 = vmatprep.mubr.msk.bf16.mxu0 %vm451_vm0, %v450_v0  ;;  %v321_v6 = vld [vmem:[#allocation5 + $0x28] sm:$0xff]   ;;  %v322_v7 = vld [vmem:[#allocation5 + $0x30] sm:$0xff]   ;;  %v323_v8 = vld [vmem:[#allocation5 + $0x38] sm:$0xff]   ;;  %s227_s14 = sshll.u32 %s452_s3, 4  ;;  %s228_s14 = int_to_ptr.vmem [resolvable:$true] %s227_s14 }
  0x4e   :  { %297 = vmatpush3.bf16.msra.mxu1 %v316_v1  ;;  %262 = vmatpush3.bf16.msra.mxu0 %v316_v1  ;;  %v74_v9 = vld [vmem:[#allocation2 + $0x10] sm:$0xff]  ;;  %v75_v10 = vld [vmem:[#allocation2 + $0x18] sm:$0xff]  ;;  %v72_v11 = vld [vmem:[#allocation2] sm:$0xff]  ;;  %s412_s15 = scalar_lea.vmem %s228_s14, 640  ;;  %p417_p5 = scmp.lt.s32.totalorder %s228_s14, %s228_s14 }
  0x4f   :  { %290 = vmatprep.subr.bf16.mxu1 %v450_v0  ;;  %263 = vmatprep.subr.bf16.mxu0 %v450_v0  ;;  %v73_v12 = vld [vmem:[#allocation2 + $0x8] sm:$0xff]  ;;  %v78_v13 = vpack.c.bf16 %v75_v10, %v74_v9  ;;  %v76_v15 = vld [vmem:[#allocation2 + $0x20] sm:$0x3]  ;;  %v208_v29 = vld [vmem:[#allocation8 + $0x8] sm:$0xff]  ;;  %p413_p4 = scmp.ne.s32.totalorder %s228_s14, %s412_s15  ;;  %p418_p6 = scmp.lt.s32.totalorder %s412_s15, %s412_s15 }
  0x50   :  { %v77_v14 = vpack.c.bf16 %v73_v12, %v72_v11  ;;  %v79_v16 = vpack.c.bf16 %v76_v15, %v76_v15  ;;  %v241_v17 = vld [vmem:[#allocation7] ss:$0 sm:$0xff]  ;;  %v209_v19 = vld [vmem:[#allocation8 + $0x10] sm:$0xff]  ;;  %v207_v21 = vld [vmem:[#allocation8] sm:$0xff] }
  0x51   :  { %v210_v27 = vld [vmem:[#allocation8 + $0x18] sm:$0xff]  ;;  %v211_v39 = vld [vmem:[#allocation8 + $0x20] sm:$0x3]  ;;  %p419_p7 = por %p418_p6, %p417_p5 }
  0x52   :  { %298 = vmatpush3.bf16.msra.mxu1 %v317_v2  ;;  %264 = vmatpush3.bf16.msra.mxu0 %v317_v2 }
  0x53   :  { %291 = vmatprep.subr.bf16.mxu1 %v450_v0  ;;  %265 = vmatprep.subr.bf16.mxu0 %v450_v0  ;;  %p420_p8 = pnand %p419_p7, %p413_p4 }
  0x56   :  { %299 = vmatpush3.bf16.msra.mxu1 %v318_v3  ;;  %266 = vmatpush3.bf16.msra.mxu0 %v318_v3 }
  0x57   :  { %292 = vmatprep.subr.bf16.mxu1 %v450_v0  ;;  %267 = vmatprep.subr.bf16.mxu0 %v450_v0 }
  0x5a   :  { %300 = vmatpush3.bf16.msra.mxu1 %v319_v4  ;;  %268 = vmatpush3.bf16.msra.mxu0 %v319_v4 }
  0x5b   :  { %293 = vmatprep.subr.bf16.mxu1 %v450_v0  ;;  %269 = vmatprep.subr.bf16.mxu0 %v450_v0 }
  0x5e   :  { %301 = vmatpush3.bf16.msra.mxu1 %v320_v5  ;;  %270 = vmatpush3.bf16.msra.mxu0 %v320_v5 }
  0x5f   :  { %294 = vmatprep.subr.bf16.mxu1 %v450_v0  ;;  %271 = vmatprep.subr.bf16.mxu0 %v450_v0 }
  0x62   :  { %302 = vmatpush3.bf16.msra.mxu1 %v321_v6  ;;  %272 = vmatpush3.bf16.msra.mxu0 %v321_v6 }
  0x63   :  { %295 = vmatprep.subr.bf16.mxu1 %v450_v0  ;;  %273 = vmatprep.subr.bf16.mxu0 %v450_v0 }
  0x66   :  { %303 = vmatpush3.bf16.msra.mxu1 %v322_v7  ;;  %274 = vmatpush3.bf16.msra.mxu0 %v322_v7 }
  0x67   :  { %296 = vmatprep.subr.bf16.mxu1 %v450_v0  ;;  %275 = vmatprep.subr.bf16.mxu0 %v450_v0 }
  0x6a   :  { %304 = vmatpush3.bf16.msra.mxu1 %v323_v8  ;;  %276 = vmatpush3.bf16.msra.mxu0 %v323_v8 }
  0x6d   :  { %282 = vmatmul.mubr.bf16.vlgmr.msra.gmra.mrb[0].mxu1 %v78_v13  ;;  %278 = vmatmul.mubr.bf16.vlgmr.msra.gmra.mrb[0].mxu0 %v77_v14 }
  0x6e   :  { %285 = vmatprep.mubr.msk.bf16.mxu1 %vm451_vm0, %v450_v0 }
  0x75   :  { %286 = vmatmul.mubr.bf16.gmra.mrb[4].mxu1 %v79_v16 }
 0x140   :  { %v193_v18 = vpop.f32.mrb[0].mxu1  ;;  %v185_v20 = vpop.f32.mrb[0].mxu0 }
 0x141   :  { %v194_v22 = vadd.f32 %v241_v17, %v193_v18  ;;  %v283_v23 = vpop.f32.mrb[1].mxu1  ;;  %v186_v24 = vadd.f32 %v241_v17, %v185_v20  ;;  %v279_v25 = vpop.f32.mrb[1].mxu0 }
 0x142   :  { %v196_v26 = vpop.f32.mrb[2].mxu1  ;;  %v188_v28 = vpop.f32.mrb[2].mxu0 }
 0x143   :  { %v214_v30 = vadd.f32 %v209_v19, %v194_v22  ;;  %v197_v31 = vadd.f32 %v241_v17, %v196_v26  ;;  %v212_v32 = vadd.f32 %v207_v21, %v186_v24  ;;  %v284_v33 = vpop.f32.mrb[3].mxu1  ;;  %v189_v34 = vadd.f32 %v241_v17, %v188_v28  ;;  %v280_v35 = vpop.f32.mrb[3].mxu0 }
 0x145   :  { %219 = vst [vmem:[#allocation10 + $0x10] sm:$0xff] %v214_v30  ;;  %v215_v36 = vadd.f32 %v210_v27, %v197_v31  ;;  %217 = vst [vmem:[#allocation10] sm:$0xff] %v212_v32  ;;  %v213_v37 = vadd.f32 %v208_v29, %v189_v34 }
 0x147   :  { %220 = vst [vmem:[#allocation10 + $0x18] sm:$0xff] %v215_v36  ;;  %218 = vst [vmem:[#allocation10 + $0x8] sm:$0xff] %v213_v37 }
 0x148   :  { %v201_v38 = vpop.f32.mrb[4].mxu1 }
 0x149   :  { %v202_v40 = vadd.f32 %v241_v17, %v201_v38  ;;  %v287_v41 = vpop.f32.mrb[5].mxu1 }
 0x14a   :  { %v204_v42 = vpop.f32.mrb[6].mxu1 }
 0x14b   :  { %v216_v43 = vadd.f32 %v211_v39, %v202_v40  ;;  %v288_v44 = vpop.f32.mrb[7].mxu1 }
 0x14d   :  { %221 = vst [vmem:[#allocation10 + $0x20] sm:$0x3] %v216_v43 }
 0x14e   :  { %423 = shalt.err (!%p420_p8)
}
 0x14f   :  { %s424_s18 = scalar_lea.hbm %s561_s4, 640 }
 0x150   :  { %p425_p9 = scmp.ne.s32.totalorder %s561_s4, %s424_s18  ;;  %p428_p10 = scmp.lt.u32.totalorder %s424_s18, %s561_s4 }
 0x152   :  { %p430_p11 = pnand %p428_p10, %p425_p9 }
 0x154   :  { %433 = shalt.err (!%p430_p11)
}
 0x155   :  { %233 = dma.vmem_to_hbm [thread:$0]  %s228_s14, 640, %s561_s4, [#allocation4], %s446_s1, %s446_s1, %s447_s13  }
 0x156   :  { %440 = dma.done.wait [#allocation4], 640  }
 0x157   :  { %441 = vsyncadd [#allocation4], 4294966656 }
 0x158   :  { %237 = vsyncpa [#allocation3], 1 }
 0x159   :  { %238 = vsyncpa [#allocation6], 1 }
 0x15a   :  { %239 = vsyncpa [#allocation9], 1 }
 0x15b   :  { %240 = vsyncpa [#allocation4], 1 }

// kernel: vit_forward.13
= control target key start
LH: loop header
LB: loop body
LE: loop exit
PB: predicated region body
PF: predicated region fallthrough
CT: control target
= control target key end

     0   :  { %10 = vsyncpa [#allocation3], 0  ;;  %s945_s0 = inlined_call_operand.hbm [shape: f32[34,128], index: 0, kind: input, shape index: {}]   ;;  %s946_s1 = inlined_call_operand.hbm [shape: f32[1,128], index: 1, kind: input, shape index: {}]   ;;  %s947_s2 = inlined_call_operand.hbm [shape: f32[1,128], index: 2, kind: input, shape index: {}]   ;;  %s948_s3 = inlined_call_operand.hbm [shape: bf16[128,384], index: 3, kind: input, shape index: {}]   ;;  %s949_s4 = inlined_call_operand.hbm [shape: f32[1,384], index: 4, kind: input, shape index: {}]   ;;  %s950_s5 = inlined_call_operand.hbm [shape: f32[34,384], index: 5, kind: output, shape index: {}]  }
   0x1   :  { %11 = vsyncpa [#allocation6], 0 }
   0x2   :  { %12 = vsyncpa [#allocation9], 0 }
   0x3   :  { %13 = vsyncpa [#allocation4], 0  ;;  %s774_s18 = smov [#allocation5]   ;;  %s775_s20 = smov [#allocation8]  }
   0x4   :  { %s32_s19 = sshll.u32 %s774_s18, 4  ;;  %s51_s21 = sshll.u32 %s775_s20, 4  ;;  %s33_s19 = int_to_ptr.vmem [resolvable:$true] %s32_s19  ;;  %s819_s21 = int_to_ptr.vmem [resolvable:$true] %s51_s21 }
   0x5   :  { %s634_s24 = scalar_lea.hbm %s946_s1, 16 }
   0x6   :  { %p635_p0 = scmp.ne.s32.totalorder %s946_s1, %s634_s24  ;;  %p638_p1 = scmp.lt.u32.totalorder %s634_s24, %s946_s1 }
   0x8   :  { %p640_p2 = pnand %p638_p1, %p635_p0 }
   0xa   :  { %643 = shalt.err (!%p640_p2)
}
   0xb   :  { %s644_s29 = scalar_lea.vmem %s33_s19, 16  ;;  %s648_s30 = scalar_lea.vmem %s33_s19, 32 }
   0xc   :  { %p645_p3 = scmp.ne.s32.totalorder %s33_s19, %s644_s29  ;;  %p649_p4 = scmp.lt.s32.totalorder %s33_s19, %s33_s19 }
   0xd   :  { %p650_p5 = scmp.lt.s32.totalorder %s648_s30, %s644_s29 }
   0xf   :  { %p651_p6 = por %p650_p5, %p649_p4 }
  0x11   :  { %p652_p7 = pnand %p651_p6, %p645_p3 }
  0x13   :  { %655 = shalt.err (!%p652_p7)
}
  0x14   :  { %35 = dma.hbm_to_vmem [thread:$0]  %s946_s1, 16, %s33_s19, [#allocation6]  }
  0x15   :  { %s656_s10 = scalar_lea.hbm %s948_s3, 3072 }
  0x16   :  { %p657_p8 = scmp.ne.s32.totalorder %s948_s3, %s656_s10  ;;  %p660_p9 = scmp.lt.u32.totalorder %s656_s10, %s948_s3 }
  0x18   :  { %p662_p10 = pnand %p660_p9, %p657_p8 }
  0x1a   :  { %665 = shalt.err (!%p662_p10)
}
  0x1b   :  { %s666_s15 = scalar_lea.vmem %s819_s21, 3072  ;;  %p671_p12 = scmp.lt.s32.totalorder %s819_s21, %s819_s21 }
  0x1c   :  { %p667_p11 = scmp.ne.s32.totalorder %s819_s21, %s666_s15  ;;  %p672_p13 = scmp.lt.s32.totalorder %s666_s15, %s666_s15 }
  0x1e   :  { %p673_p0 = por %p672_p13, %p671_p12 }
  0x20   :  { %p674_p1 = pnand %p673_p0, %p667_p11 }
  0x22   :  { %677 = shalt.err (!%p674_p1)
}
  0x23   :  { %s776_s1 = smov 192   ;;  %s777_s16 = smov 12  }
  0x24   :  { %57 = dma.hbm_to_vmem [thread:$0]  %s948_s3, 3072, %s819_s21, [#allocation9], %s776_s1, %s776_s1, %s777_s16  }
  0x25   :  { %s778_s19 = smov [#allocation2]   ;;  %s678_s24 = scalar_lea.hbm %s945_s0, 640 }
  0x26   :  { %s19_s20 = sshll.u32 %s778_s19, 4  ;;  %p679_p2 = scmp.ne.s32.totalorder %s945_s0, %s678_s24  ;;  %s20_s20 = int_to_ptr.vmem [resolvable:$true] %s19_s20 }
  0x27   :  { %p682_p3 = scmp.lt.u32.totalorder %s678_s24, %s945_s0 }
  0x29   :  { %p684_p4 = pnand %p682_p3, %p679_p2 }
  0x2b   :  { %687 = shalt.err (!%p684_p4)
}
  0x2c   :  { %s688_s29 = scalar_lea.vmem %s20_s20, 640  ;;  %p693_p6 = scmp.lt.s32.totalorder %s20_s20, %s20_s20 }
  0x2d   :  { %p689_p5 = scmp.ne.s32.totalorder %s20_s20, %s688_s29  ;;  %p694_p7 = scmp.lt.s32.totalorder %s688_s29, %s688_s29 }
  0x2f   :  { %p695_p8 = por %p694_p7, %p693_p6 }
  0x31   :  { %p696_p9 = pnand %p695_p8, %p689_p5 }
  0x33   :  { %699 = shalt.err (!%p696_p9)
}
  0x34   :  { %s779_s3 = smov 128   ;;  %s780_s21 = smov 8  }
  0x35   :  { %25 = dma.hbm_to_vmem [thread:$0]  %s945_s0, 640, %s20_s20, [#allocation3], %s779_s3, %s779_s3, %s780_s21  }
  0x36   :  { %s781_s7 = smov [#allocation7]   ;;  %s782_s9 = smov [#allocation10]  }
  0x37   :  { %s42_s8 = sshll.u32 %s781_s7, 4  ;;  %s64_s10 = sshll.u32 %s782_s9, 4  ;;  %s43_s8 = int_to_ptr.vmem [resolvable:$true] %s42_s8  ;;  %s65_s10 = int_to_ptr.vmem [resolvable:$true] %s64_s10 }
  0x38   :  { %s700_s13 = scalar_lea.hbm %s947_s2, 16 }
  0x39   :  { %p701_p10 = scmp.ne.s32.totalorder %s947_s2, %s700_s13  ;;  %p704_p11 = scmp.lt.u32.totalorder %s700_s13, %s947_s2 }
  0x3b   :  { %p706_p12 = pnand %p704_p11, %p701_p10 }
  0x3d   :  { %709 = shalt.err (!%p706_p12)
}
  0x3e   :  { %s710_s0 = scalar_lea.vmem %s43_s8, 16  ;;  %s714_s17 = scalar_lea.vmem %s43_s8, 32 }
  0x3f   :  { %p711_p13 = scmp.ne.s32.totalorder %s43_s8, %s710_s0  ;;  %p715_p0 = scmp.lt.s32.totalorder %s43_s8, %s43_s8 }
  0x40   :  { %p716_p1 = scmp.lt.s32.totalorder %s714_s17, %s710_s0 }
  0x42   :  { %p717_p2 = por %p716_p1, %p715_p0 }
  0x44   :  { %p718_p3 = pnand %p717_p2, %p711_p13 }
  0x46   :  { %721 = shalt.err (!%p718_p3)
}
  0x47   :  { %45 = dma.hbm_to_vmem [thread:$0]  %s947_s2, 16, %s43_s8, [#allocation6]  }
  0x48   :  { %s722_s23 = scalar_lea.hbm %s949_s4, 48 }
  0x49   :  { %p723_p4 = scmp.ne.s32.totalorder %s949_s4, %s722_s23  ;;  %p726_p5 = scmp.lt.u32.totalorder %s722_s23, %s949_s4 }
  0x4b   :  { %p728_p6 = pnand %p726_p5, %p723_p4 }
  0x4d   :  { %731 = shalt.err (!%p728_p6)
}
  0x4e   :  { %s732_s28 = scalar_lea.vmem %s65_s10, 48  ;;  %s736_s29 = scalar_lea.vmem %s65_s10, 64 }
  0x4f   :  { %p733_p7 = scmp.ne.s32.totalorder %s65_s10, %s732_s28  ;;  %p737_p8 = scmp.lt.s32.totalorder %s65_s10, %s65_s10 }
  0x50   :  { %p738_p9 = scmp.lt.s32.totalorder %s736_s29, %s732_s28 }
  0x52   :  { %p739_p10 = por %p738_p9, %p737_p8 }
  0x54   :  { %p740_p11 = pnand %p739_p10, %p733_p7 }
  0x56   :  { %743 = shalt.err (!%p740_p11)
}
  0x57   :  { %67 = dma.hbm_to_vmem [thread:$0]  %s949_s4, 48, %s65_s10, [#allocation9]  }
  0x58   :  { %766 = dma.done.wait [#allocation3], 640  }
  0x59   :  { %767 = vsyncadd [#allocation3], 4294966656 }
  0x5a   :  { %768 = dma.done.wait [#allocation6], 32  }
  0x5b   :  { %769 = vsyncadd [#allocation6], 4294967264 }
  0x5c   :  { %770 = dma.done.wait [#allocation9], 3120  }
  0x5d   :  { %771 = vsyncadd [#allocation9], 4294964176  ;;  %v783_v0 = vmov 0.0   ;;  %v887_v1 = vld [vmem:[#allocation2] sm:$0xff]  ;;  %v889_v2 = vld [vmem:[#allocation2 + $0x8] sm:$0xff]  ;;  %vm99_vm0 = vcmask 1041408  }
  0x5e   :  { %549 = vmatprep.subr.bf16.mxu1 %v783_v0  ;;  %91 = vadd.xlane.f32.xlu0 %v887_v1  ;;  %v108_v3 = vmul.f32 %v887_v1, %v887_v1  ;;  %v592_v4 = vld [vmem:[#allocation8 + $0x4] ss:$12 sps:$4 sm:$0xff]   ;;  %v109_v5 = vmul.f32 %v889_v2, %v889_v2  ;;  %v901_v8 = vld [vmem:[#allocation2 + $0x20] sm:$0x3]  ;;  %v594_v12 = vld [vmem:[#allocation8] ss:$12 sps:$4 sm:$0xff]  }
  0x5f   :  { %v896_v6 = vld [vmem:[#allocation2 + $0x10] sm:$0xff]  ;;  %361 = vmatprep.subr.bf16.mxu0 %v592_v4  ;;  %v899_v7 = vld [vmem:[#allocation2 + $0x18] sm:$0xff]  ;;  %v112_v11 = vmul.f32 %v901_v8, %v901_v8  ;;  %v100_v14 = vsel %vm99_vm0, %v901_v8, 0.0  ;;  %v600_v19 = vld [vmem:[#allocation8 + $0x34] ss:$12 sps:$4 sm:$0xff]   ;;  %v784_v37 = vmov 0  }
  0x60   :  { %113 = vadd.xlane.f32.xlu1 %v108_v3  ;;  %v110_v9 = vmul.f32 %v896_v6, %v896_v6  ;;  %v111_v10 = vmul.f32 %v899_v7, %v899_v7  ;;  %v595_v13 = vld [vmem:[#allocation8 + $0x8] ss:$12 sps:$4 sm:$0xff]   ;;  %362 = vmatpush1.bf16.msra.mxu0 %v594_v12  ;;  %v598_v17 = vld [vmem:[#allocation8 + $0x18] ss:$12 sps:$4 sm:$0xff]   ;;  %v599_v18 = vld [vmem:[#allocation8 + $0x20] ss:$12 sps:$4 sm:$0xff]  }
  0x61   :  { %v121_v15 = vsel %vm99_vm0, %v112_v11, 0.0  ;;  %550 = vmatpush3.bf16.msra.mxu1 %v595_v13  ;;  %v596_v16 = vld [vmem:[#allocation8 + $0x1c] ss:$12 sps:$4 sm:$0xff]   ;;  %v603_v21 = vld [vmem:[#allocation8 + $0x38] ss:$12 sps:$4 sm:$0xff]   ;;  %393 = vmatprep.mubr.bf16.mxu0 %v784_v37  ;;  %vm785_vm1 = vmmov 0  }
  0x62   :  { %93 = vadd.xlane.f32.xlu0 %v889_v2  ;;  %551 = vmatprep.subr.bf16.mxu1 %v783_v0  ;;  %v602_v20 = vld [vmem:[#allocation8 + $0x30] ss:$12 sps:$4 sm:$0xff]   ;;  %v604_v22 = vld [vmem:[#allocation8 + $0x4c] ss:$12 sps:$4 sm:$0xff]   ;;  %v606_v23 = vld [vmem:[#allocation8 + $0x48] ss:$12 sps:$4 sm:$0xff]  }
  0x63   :  { %363 = vmatprep.subr.bf16.mxu0 %v596_v16  ;;  %v607_v24 = vld [vmem:[#allocation8 + $0x50] ss:$12 sps:$4 sm:$0xff]   ;;  %v610_v26 = vld [vmem:[#allocation8 + $0x60] ss:$12 sps:$4 sm:$0xff]   ;;  %v611_v27 = vld [vmem:[#allocation8 + $0x68] ss:$12 sps:$4 sm:$0xff]   ;;  %565 = vmatprep.mubr.msk.bf16.mxu1 %vm785_vm1, %v783_v0 }
  0x64   :  { %115 = vadd.xlane.f32.xlu1 %v109_v5  ;;  %364 = vmatpush1.bf16.msra.mxu0 %v598_v17  ;;  %v608_v25 = vld [vmem:[#allocation8 + $0x64] ss:$12 sps:$4 sm:$0xff]   ;;  %v612_v28 = vld [vmem:[#allocation8 + $0x7c] ss:$12 sps:$4 sm:$0xff]   ;;  %v615_v30 = vld [vmem:[#allocation8 + $0x80] ss:$12 sps:$4 sm:$0xff]  }
  0x65   :  { %552 = vmatpush3.bf16.msra.mxu1 %v599_v18  ;;  %365 = vmatprep.subr.bf16.mxu0 %v600_v19  ;;  %v614_v29 = vld [vmem:[#allocation8 + $0x78] ss:$12 sps:$4 sm:$0xff]   ;;  %v616_v31 = vld [vmem:[#allocation8 + $0x94] ss:$12 sps:$4 sm:$0xff]   ;;  %v618_v32 = vld [vmem:[#allocation8 + $0x90] ss:$12 sps:$4 sm:$0xff]  }
  0x66   :  { %95 = vadd.xlane.f32.xlu0 %v896_v6  ;;  %553 = vmatprep.subr.bf16.mxu1 %v783_v0  ;;  %v619_v33 = vld [vmem:[#allocation8 + $0x98] ss:$12 sps:$4 sm:$0xff]   ;;  %v622_v35 = vld [vmem:[#allocation8 + $0xa8] ss:$12 sps:$4 sm:$0xff]   ;;  %v623_v36 = vld [vmem:[#allocation8 + $0xb0] ss:$12 sps:$4 sm:$0xff]  }
  0x67   :  { %v620_v34 = vld [vmem:[#allocation8 + $0xac] ss:$12 sps:$4 sm:$0xff]   ;;  %v512_v16 = vld [vmem:[#allocation5] ss:$0 sm:$0xff]  ;;  %s786_s4 = smov [#allocation11]  }
  0x68   :  { %97 = vadd.xlane.f32.xlu1 %v899_v7  ;;  %366 = vmatpush1.bf16.msra.mxu0 %v602_v20  ;;  %s498_s21 = sshll.u32 %s786_s4, 4  ;;  %s499_s21 = int_to_ptr.vmem [resolvable:$true] %s498_s21 }
  0x69   :  { %554 = vmatpush3.bf16.msra.mxu1 %v603_v21  ;;  %367 = vmatprep.subr.bf16.mxu0 %v604_v22  ;;  %s744_s30 = scalar_lea.vmem %s499_s21, 1920  ;;  %p749_p13 = scmp.lt.s32.totalorder %s499_s21, %s499_s21 }
  0x6a   :  { %117 = vadd.xlane.f32.xlu0 %v110_v9  ;;  %555 = vmatprep.subr.bf16.mxu1 %v783_v0  ;;  %p745_p12 = scmp.ne.s32.totalorder %s499_s21, %s744_s30  ;;  %p750_p0 = scmp.lt.s32.totalorder %s744_s30, %s744_s30 }
  0x6c   :  { %119 = vadd.xlane.f32.xlu1 %v111_v10  ;;  %368 = vmatpush1.bf16.msra.mxu0 %v606_v23  ;;  %v513_v23 = vld [vmem:[#allocation7] ss:$0 sm:$0xff]  ;;  %p751_p1 = por %p750_p0, %p749_p13 }
  0x6d   :  { %556 = vmatpush3.bf16.msra.mxu1 %v607_v24  ;;  %369 = vmatprep.subr.bf16.mxu0 %v608_v25 }
  0x6e   :  { %101 = vadd.xlane.f32.xlu0 %v100_v14  ;;  %557 = vmatprep.subr.bf16.mxu1 %v783_v0  ;;  %p752_p2 = pnand %p751_p1, %p745_p12 }
  0x70   :  { %122 = vadd.xlane.f32.xlu1 %v121_v15  ;;  %370 = vmatpush1.bf16.msra.mxu0 %v610_v26 }
  0x71   :  { %558 = vmatpush3.bf16.msra.mxu1 %v611_v27  ;;  %371 = vmatprep.subr.bf16.mxu0 %v612_v28 }
  0x72   :  { %559 = vmatprep.subr.bf16.mxu1 %v783_v0 }
  0x74   :  { %372 = vmatpush1.bf16.msra.mxu0 %v614_v29 }
  0x75   :  { %560 = vmatpush3.bf16.msra.mxu1 %v615_v30  ;;  %373 = vmatprep.subr.bf16.mxu0 %v616_v31 }
  0x76   :  { %561 = vmatprep.subr.bf16.mxu1 %v783_v0 }
  0x78   :  { %374 = vmatpush1.bf16.msra.mxu0 %v618_v32 }
  0x79   :  { %562 = vmatpush3.bf16.msra.mxu1 %v619_v33  ;;  %375 = vmatprep.subr.bf16.mxu0 %v620_v34 }
  0x7a   :  { %563 = vmatprep.subr.bf16.mxu1 %v783_v0 }
  0x7c   :  { %376 = vmatpush1.bf16.msra.mxu0 %v622_v35 }
  0x7d   :  { %564 = vmatpush3.bf16.msra.mxu1 %v623_v36 }
  0xeb   :  { %v92_v38 = vpop.xlane.xlu0 %91 }
  0xec   :  { %v103_v39 = vmul.f32 0.015625, %v92_v38 }
  0xed   :  { %v114_v40 = vpop.xlane.xlu1 %113 }
  0xee   :  { %v129_v41 = vmul.f32 %v103_v39, %v103_v39  ;;  %v124_v42 = vmul.f32 0.015625, %v114_v40  ;;  %v139_v9 = vsub.f32 %v887_v1, %v103_v39 }
  0xef   :  { %v94_v43 = vpop.xlane.xlu0 %93 }
  0xf0   :  { %v134_v44 = vsub.f32 %v124_v42, %v129_v41  ;;  %v104_v45 = vmul.f32 0.015625, %v94_v43  ;;  %v218_v42 = vlaneseq }
  0xf1   :  { %v116_v46 = vpop.xlane.xlu1 %115 }
  0xf2   :  { %v144_v47 = vadd.f32 1e-05, %v134_v44  ;;  %v130_v48 = vmul.f32 %v104_v45, %v104_v45  ;;  %v125_v49 = vmul.f32 0.015625, %v116_v46  ;;  %v140_v17 = vsub.f32 %v889_v2, %v104_v45  ;;  %v216_v45 = vld [vmem:[#allocation10] sm:$0x7] }
  0xf3   :  { %v96_v50 = vpop.xlane.xlu0 %95  ;;  %v219_v43 = vshrl.u32 %v218_v42, 7 }
  0xf4   :  { %624 = vrsqrt.f32 %v144_v47  ;;  %v135_v51 = vsub.f32 %v125_v49, %v130_v48  ;;  %v105_v52 = vmul.f32 0.015625, %v96_v50 }
  0xf5   :  { %v98_v53 = vpop.xlane.xlu1 %97  ;;  %v228_v44 = vsub.s32 2, %v219_v43  ;;  %v224_v46 = vsub.s32 1, %v219_v43 }
  0xf6   :  { %v145_v54 = vadd.f32 1e-05, %v135_v51  ;;  %v131_v55 = vmul.f32 %v105_v52, %v105_v52  ;;  %v106_v56 = vmul.f32 0.015625, %v98_v53  ;;  %v141_v1 = vsub.f32 %v896_v6, %v105_v52 }
  0xf7   :  { %v118_v57 = vpop.xlane.xlu0 %117  ;;  %v229_v48 = vrot.slane %v216_v45, %v228_v44  ;;  %v225_v49 = vrot.slane %v216_v45, %v224_v46 }
  0xf8   :  { %626 = vrsqrt.f32 %v145_v54  ;;  %v126_v58 = vmul.f32 0.015625, %v118_v57  ;;  %v132_v60 = vmul.f32 %v106_v56, %v106_v56  ;;  %v142_v28 = vsub.f32 %v899_v7, %v106_v56 }
  0xf9   :  { %v120_v59 = vpop.xlane.xlu1 %119 }
  0xfa   :  { %v136_v61 = vsub.f32 %v126_v58, %v131_v55  ;;  %v127_v62 = vmul.f32 0.015625, %v120_v59 }
  0xfb   :  { %v102_v63 = vpop.xlane.xlu0 %101 }
  0xfc   :  { %v146_v3 = vadd.f32 1e-05, %v136_v61  ;;  %v137_v4 = vsub.f32 %v127_v62, %v132_v60  ;;  %v107_v5 = vmul.f32 0.015625, %v102_v63 }
  0xfd   :  { %v123_v10 = vpop.xlane.xlu1 %122 }
  0xfe   :  { %v625_v11 = vpop.eup %624  ;;  %628 = vrsqrt.f32 %v146_v3  ;;  %v147_v12 = vadd.f32 1e-05, %v137_v4  ;;  %v133_v13 = vmul.f32 %v107_v5, %v107_v5  ;;  %v128_v14 = vmul.f32 0.015625, %v123_v10 }
  0xff   :  { %v154_v15 = vmul.f32 %v625_v11, %v139_v9  ;;  %v143_v6 = vsub.f32 %v901_v8, %v107_v5  ;;  %v220_v8 = vsub.s32 0, %v219_v43 }
 0x100   :  { %630 = vrsqrt.f32 %v147_v12  ;;  %v138_v18 = vsub.f32 %v128_v14, %v133_v13 }
 0x101   :  { %v165_v22 = vmul.f32 %v512_v16, %v154_v15  ;;  %v221_v47 = vrot.slane %v216_v45, %v220_v8 }
 0x102   :  { %v627_v19 = vpop.eup %626  ;;  %v148_v20 = vadd.f32 1e-05, %v138_v18 }
 0x103   :  { %v155_v21 = vmul.f32 %v627_v19, %v140_v17  ;;  %v176_v25 = vadd.f32 %v513_v23, %v165_v22 }
 0x104   :  { %632 = vrsqrt.f32 %v148_v20 }
 0x105   :  { %v166_v24 = vmul.f32 %v512_v16, %v155_v21 }
 0x107   :  { %v177_v26 = vadd.f32 %v513_v23, %v166_v24 }
 0x108   :  { %v629_v27 = vpop.eup %628 }
 0x109   :  { %v181_v29 = vpack.c.bf16 %v177_v26, %v176_v25  ;;  %v156_v30 = vmul.f32 %v629_v27, %v141_v1 }
 0x10a   :  { %v631_v31 = vpop.eup %630 }
 0x10b   :  { %394 = vmatmul.mubr.bf16.vlgmr.msra.gmra.mrb[0].mxu0 %v181_v29  ;;  %566 = vmatmul.mubr.bf16.vlgmr.msra.gmra.mrb[0].mxu1 %v181_v29  ;;  %v157_v2 = vmul.f32 %v631_v31, %v142_v28  ;;  %v167_v32 = vmul.f32 %v512_v16, %v156_v30 }
 0x10c   :  { %403 = vmatprep.mubr.bf16.mxu0 %v784_v37  ;;  %569 = vmatprep.mubr.msk.bf16.mxu1 %vm785_vm1, %v783_v0 }
 0x10d   :  { %v168_v33 = vmul.f32 %v512_v16, %v157_v2  ;;  %v178_v35 = vadd.f32 %v513_v23, %v167_v32 }
 0x10e   :  { %v633_v34 = vpop.eup %632 }
 0x10f   :  { %v179_v36 = vadd.f32 %v513_v23, %v168_v33  ;;  %v158_v38 = vmul.f32 %v633_v34, %v143_v6 }
 0x111   :  { %v182_v7 = vpack.c.bf16 %v179_v36, %v178_v35  ;;  %v169_v39 = vmul.f32 %v512_v16, %v158_v38 }
 0x113   :  { %404 = vmatmul.mubr.bf16.gmra.mrb[4].mxu0 %v182_v7  ;;  %570 = vmatmul.mubr.bf16.gmra.mrb[4].mxu1 %v182_v7  ;;  %v180_v40 = vadd.f32 %v513_v23, %v169_v39 }
 0x114   :  { %413 = vmatprep.mubr.bf16.mxu0 %v784_v37  ;;  %573 = vmatprep.mubr.msk.bf16.mxu1 %vm785_vm1, %v783_v0 }
 0x115   :  { %v183_v41 = vpack.c.bf16 %v180_v40, %v180_v40 }
 0x11b   :  { %414 = vmatmul.mubr.bf16.gmra.mrb[8].mxu0 %v183_v41  ;;  %574 = vmatmul.mubr.bf16.gmra.mrb[8].mxu1 %v183_v41 }
 0x1de   :  { %v395_v50 = vpop.f32.mrb[0].mxu0  ;;  %v456_v51 = vpop.f32.mrb[0].mxu1 }
 0x1df   :  { %v396_v52 = vadd.f32 %v395_v50, %v221_v47  ;;  %v457_v37 = vadd.f32 %v456_v51, %v229_v48  ;;  %v397_v53 = vpop.f32.mrb[1].mxu0  ;;  %v567_v54 = vpop.f32.mrb[1].mxu1 }
 0x1e0   :  { %v398_v0 = vadd.f32 %v397_v53, %v225_v49  ;;  %v399_v55 = vpop.f32.mrb[2].mxu0  ;;  %v459_v56 = vpop.f32.mrb[2].mxu1 }
 0x1e1   :  { %478 = vst [vmem:[#allocation11] sm:$0xff] %v396_v52  ;;  %480 = vst [vmem:[#allocation11 + $0x10] sm:$0xff] %v457_v37  ;;  %v400_v57 = vadd.f32 %v399_v55, %v221_v47  ;;  %v460_v58 = vadd.f32 %v459_v56, %v229_v48  ;;  %v401_v59 = vpop.f32.mrb[3].mxu0  ;;  %v568_v60 = vpop.f32.mrb[3].mxu1 }
 0x1e2   :  { %479 = vst [vmem:[#allocation11 + $0x8] sm:$0xff] %v398_v0  ;;  %v402_v61 = vadd.f32 %v401_v59, %v225_v49 }
 0x1e3   :  { %481 = vst [vmem:[#allocation11 + $0x18] sm:$0xff] %v400_v57  ;;  %483 = vst [vmem:[#allocation11 + $0x28] sm:$0xff] %v460_v58 }
 0x1e4   :  { %482 = vst [vmem:[#allocation11 + $0x20] sm:$0xff] %v402_v61 }
 0x1e6   :  { %v405_v62 = vpop.f32.mrb[4].mxu0  ;;  %v464_v63 = vpop.f32.mrb[4].mxu1 }
 0x1e7   :  { %v406_v3 = vadd.f32 %v405_v62, %v221_v47  ;;  %v465_v4 = vadd.f32 %v464_v63, %v229_v48  ;;  %v407_v5 = vpop.f32.mrb[5].mxu0  ;;  %v571_v9 = vpop.f32.mrb[5].mxu1 }
 0x1e8   :  { %v408_v10 = vadd.f32 %v407_v5, %v225_v49  ;;  %v409_v11 = vpop.f32.mrb[6].mxu0  ;;  %v467_v12 = vpop.f32.mrb[6].mxu1 }
 0x1e9   :  { %484 = vst [vmem:[#allocation11 + $0x30] sm:$0xff] %v406_v3  ;;  %486 = vst [vmem:[#allocation11 + $0x40] sm:$0xff] %v465_v4  ;;  %v410_v13 = vadd.f32 %v409_v11, %v221_v47  ;;  %v468_v14 = vadd.f32 %v467_v12, %v229_v48  ;;  %v411_v15 = vpop.f32.mrb[7].mxu0  ;;  %v572_v16 = vpop.f32.mrb[7].mxu1 }
 0x1ea   :  { %485 = vst [vmem:[#allocation11 + $0x38] sm:$0xff] %v408_v10  ;;  %v412_v17 = vadd.f32 %v411_v15, %v225_v49 }
 0x1eb   :  { %487 = vst [vmem:[#allocation11 + $0x48] sm:$0xff] %v410_v13  ;;  %489 = vst [vmem:[#allocation11 + $0x58] sm:$0xff] %v468_v14 }
 0x1ec   :  { %488 = vst [vmem:[#allocation11 + $0x50] sm:$0xff] %v412_v17 }
 0x1ee   :  { %v415_v18 = vpop.f32.mrb[8].mxu0  ;;  %v472_v19 = vpop.f32.mrb[8].mxu1 }
 0x1ef   :  { %v416_v20 = vadd.f32 %v415_v18, %v221_v47  ;;  %v473_v21 = vadd.f32 %v472_v19, %v229_v48  ;;  %v417_v22 = vpop.f32.mrb[9].mxu0  ;;  %v575_v23 = vpop.f32.mrb[9].mxu1 }
 0x1f0   :  { %v418_v24 = vadd.f32 %v417_v22, %v225_v49  ;;  %v419_v1 = vpop.f32.mrb[10].mxu0  ;;  %v475_v25 = vpop.f32.mrb[10].mxu1 }
 0x1f1   :  { %490 = vst [vmem:[#allocation11 + $0x60] sm:$0x3] %v416_v20  ;;  %492 = vst [vmem:[#allocation11 + $0x70] sm:$0x3] %v473_v21  ;;  %v420_v26 = vpop.f32.mrb[11].mxu0  ;;  %v576_v27 = vpop.f32.mrb[11].mxu1 }
 0x1f2   :  { %491 = vst [vmem:[#allocation11 + $0x68] sm:$0x3] %v418_v24 }
 0x1f3   :  { %755 = shalt.err (!%p752_p2)
}
 0x1f4   :  { %s756_s8 = scalar_lea.hbm %s950_s5, 1920 }
 0x1f5   :  { %p757_p3 = scmp.ne.s32.totalorder %s950_s5, %s756_s8  ;;  %p760_p4 = scmp.lt.u32.totalorder %s756_s8, %s950_s5 }
 0x1f7   :  { %p762_p5 = pnand %p760_p4, %p757_p3 }
 0x1f9   :  { %765 = shalt.err (!%p762_p5)
}
 0x1fa   :  { %s787_s13 = smov 384   ;;  %s788_s14 = smov 24  }
 0x1fb   :  { %504 = dma.vmem_to_hbm [thread:$0]  %s499_s21, 1920, %s950_s5, [#allocation4], %s787_s13, %s787_s13, %s788_s14  }
 0x1fc   :  { %772 = dma.done.wait [#allocation4], 1920  }
 0x1fd   :  { %773 = vsyncadd [#allocation4], 4294965376 }
 0x1fe   :  { %508 = vsyncpa [#allocation3], 1 }
 0x1ff   :  { %509 = vsyncpa [#allocation6], 1 }
 0x200   :  { %510 = vsyncpa [#allocation9], 1 }
 0x201   :  { %511 = vsyncpa [#allocation4], 1 }

// kernel: vit_forward.14
= control target key start
LH: loop header
LB: loop body
LE: loop exit
PB: predicated region body
PF: predicated region fallthrough
CT: control target
= control target key end

     0   :  { %6 = vsyncpa [#allocation3], 0  ;;  %s1632_s0 = inlined_call_operand.hbm [shape: f32[2,17,384], index: 0, kind: input, shape index: {}]   ;;  %s1633_s1 = inlined_call_operand.hbm [shape: f32[2,17,128], index: 1, kind: output, shape index: {}]  }
   0x1   :  { %8 = vsyncpa [#allocation3 + $0x1], 0 }
   0x2   :  { %9 = vsyncpa [#allocation4], 0 }
   0x3   :  { %11 = vsyncpa [#allocation4 + $0x1], 0  ;;  %s1312_s6 = smov 0   ;;  %s1314_s7 = smov 0  }
   0x4   :  { %s1316_s8 = smov 0   ;;  %s1318_s9 = smov 0  }
   0x5 LB: > { %s1333_s10 = sadd.s32 4294967295, %s1290_s9   ;;  %s959_s11 = sadd.s32 4294967294, %s1290_s9   ;;  %s1290_s9 = sphi %s1318_s9, %s1645_s9   ;;  %s1286_s8 = sphi %s1316_s8, %s1644_s8   ;;  %s1282_s7 = sphi %s1314_s7, %s1643_s7   ;;  %s1278_s6 = sphi %s1312_s6, %s1642_s6  }
   0x6   : > { %s1337_s12 = sadd.s32 1, %s1290_s9   ;;  %s24_s13 = sadd.s32 1, %s1286_s8 }
   0x7   : > { %s21_s14 = ssub.s32 %s1290_s9, %s1337_s12  ;;  %p31_p0 = scmp.ne.s32.totalorder %s1286_s8, %s1282_s7 }
   0x8   : > { %p22_p1 = scmp.eq.s32.totalorder %s21_s14, 0  ;;  %p32_p2 = scmp.eq.s32.totalorder %s1290_s9, 0 }
   0x9   : > { %p37_p3 = scmp.ne.s32.totalorder %s1282_s7, %s1278_s6  ;;  %p38_p4 = scmp.eq.s32.totalorder %s1333_s10, 0 }
   0xa   : > { %s1349_s15 = scalar_select %p22_p1, %s1286_s8, %s24_s13  }
   0xb   : > { %p33_p5 = por %p32_p2, %p31_p0  ;;  %p1351_p6 = por %p38_p4, %p37_p3 }
   0xc   : > { %p61_p7 = scmp.eq.s32.totalorder %s1333_s10, 1  ;;  %p67_p8 = scmp.eq.s32.totalorder %s959_s11, 1 }
   0xd   : > { %p1104_p10 = scmp.lt.s32.totalorder %s1290_s9, 2  ;;  %s87_s19 = sand.u32 1, %s1286_s8  }
   0xe   : > { %p1358_p11 = por %p61_p7, %p31_p0  ;;  %p1362_p12 = por %p67_p8, %p37_p3 }
   0xf   : > { %s1088_s20 = smul.u32 1152, %s1290_s9  ;;  %p1373_p13 = pnand %p1104_p10, %p33_p5 }
  0x10   : > { %s1636_s17 = scalar_select %p1358_p11, 1, 0 }
  0x11   : > { %s1637_s18 = scalar_select %p1362_p12, 1, 0 }
  0x12   : > { %s1087_s21 = smul.u32 72, %s87_s19  ;;  %s1371_s24 = scalar_lea.hbm %s1632_s0, %s1088_s20 }
  0x13   : > { %s1379_s28 = scalar_lea.sflag [#allocation3], %s87_s19  ;;  %s1194_s29 = scalar_lea.hbm %s1371_s24, 1152 }
  0x14   : > { %s91_s26 = scalar_lea.vmem [#allocation2], %s1087_s21  ;;  %p1195_p0 = scmp.ne.s32.totalorder %s1371_s24, %s1194_s29 }
  0x15   : > { %s98_s27 = sshll.u32 %s91_s26, 4  ;;  %p1196_p1 = pneg %p1373_p13  ;;  %s1377_s27 = int_to_ptr.vmem [resolvable:$true] %s98_s27 }
  0x16   : > { %s1199_s3 = scalar_lea.hbm %s1632_s0, 2304  ;;  %p1200_p4 = scmp.lt.u32.totalorder %s1371_s24, %s1632_s0 }
  0x17   : > { %p1197_p2 = pnand %p1196_p1, %p1195_p0  ;;  %p1201_p5 = scmp.lt.u32.totalorder %s1199_s3, %s1194_s29 }
  0x18   : > { %p1203_p8 = scmp.lt.u32.totalorder %s1194_s29, %s1371_s24 }
  0x19   : > { %p1198_p3 = pneg %p1197_p2  ;;  %p1202_p7 = por %p1201_p5, %p1200_p4 }
  0x1b   : > { %p1204_p10 = por %p1203_p8, %p1202_p7 }
  0x1d   : > { %p1205_p9 = pnand %p1204_p10, %p1198_p3 }
  0x1f   : > { %1208 = shalt.err (!%p1205_p9)
}
  0x20   : > { %s1209_s11 = scalar_lea.vmem %s1377_s27, 1152  ;;  %s1292_s13 = smov [#allocation2]  }
  0x21   : > { %p1210_p0 = scmp.ne.s32.totalorder %s1377_s27, %s1209_s11  ;;  %s1214_s14 = sshll.u32 %s1292_s13, 4  ;;  %s1215_s14 = int_to_ptr.vmem [resolvable:$false] %s1214_s14 }
  0x22   : > { %s1216_s19 = scalar_lea.vmem %s1215_s14, 2304  ;;  %p1217_p11 = scmp.lt.s32.totalorder %s1377_s27, %s1215_s14 }
  0x23   : > { %p1212_p2 = pnand %p1210_p0, %p1196_p1  ;;  %p1218_p4 = scmp.lt.s32.totalorder %s1216_s19, %s1209_s11 }
  0x25   : > { %p1213_p12 = pneg %p1212_p2  ;;  %p1219_p5 = por %p1218_p4, %p1217_p11 }
  0x27   : > { %p1220_p7 = pnand %p1219_p5, %p1213_p12 }
  0x29   : > { %1223 = shalt.err (!%p1220_p7)
}
  0x2a   : > { %s1293_s20 = smov 384   ;;  %s1294_s21 = smov 24  }
  0x2b   : > { %1099 = dma.hbm_to_vmem [thread:$0]  (!%p1373_p13), %s1371_s24, 1152, %s1377_s27, %s1379_s28, %s1293_s20, %s1293_s20, %s1294_s21  }
  0x2c   : > { %p963_p9 = scmp.ge.s32.totalorder %s1290_s9, 1  ;;  %p106_p1 = scmp.lt.s32.totalorder %s1290_s9, 3 }
  0x2e   : > { %p107_p3 = pnand %p963_p9, %p106_p1 }
  0x2f   : > { %s1410_s22 = sand.u32 (!%p107_p3), 1, %s1282_s7  }
  0x30   : > { %110 = sbr.rel (%p107_p3) target bundleno = 2618 (0xa3a), region = 24  ;;  %s113_s26 = scalar_lea.sflag (!%p107_p3), [#allocation3], %s1410_s22 }
  0x31   : > { %s1089_s23 = smul.u32 (!%p107_p3), 72, %s1410_s22 }
  0x33   : > { %s1414_s29 = scalar_lea.vmem (!%p107_p3), [#allocation2], %s1089_s23 }
  0x37   : > { %1269 = dma.done.wait (%p1351_p6), %s113_s26, 1152  }
  0x38   : > { %1271 = vsyncadd (%p1351_p6), %s113_s26, 4294966144  ;;  %v137_v0 = vld [vmem:[%s1414_s29 + $0x8] sm:$0xff]  ;;  %v140_v1 = vld [vmem:[%s1414_s29 + $0x20] sm:$0xff]  ;;  %vm151_vm0 = vcmask 261120   ;;  %vm222_vm1 = vcmask 131072   ;;  %vm215_vm2 = vcmask 138240  }
  0x39   : > { %v143_v2 = vld [vmem:[%s1414_s29 + $0x38] sm:$0x1]  ;;  %v1423_v3 = vpack.c.bf16 %v140_v1, %v137_v0  ;;  %v136_v5 = vld [vmem:[%s1414_s29] sm:$0xff]  ;;  %v142_v10 = vld [vmem:[%s1414_s29 + $0x30] sm:$0x1]  ;;  %vm258_vm3 = vcmask 1040384  }
  0x3a   : > { %v1425_v4 = vpack.c.bf16 %v143_v2, %v143_v2  ;;  %v139_v6 = vld [vmem:[%s1414_s29 + $0x18] sm:$0xff]  ;;  %v1442_v11 = vpack.c.bf16 %v142_v10, %v142_v10  ;;  %v138_v37 = vld [vmem:[%s1414_s29 + $0x10] sm:$0xff]  ;;  %v141_v38 = vld [vmem:[%s1414_s29 + $0x28] sm:$0xff]  ;;  %v1295_v42 = vmov 0   ;;  %s1296_s16 = smov 96   ;;  %s1297_s24 = smov 64  }
  0x3b   : > { %v1429_v7 = vpack.c.bf16 %v139_v6, %v136_v5  ;;  %1079 = vmatprep.subr.msk.bf16.mxu0 %vm151_vm0, %v1423_v3  ;;  %v159_v8 = vsel %vm151_vm0, %v1423_v3, 0  ;;  %v1454_v39 = vpack.c.bf16 %v141_v38, %v138_v37  ;;  %v144_v40 = vld [vmem:[%s1414_s29 + $0x40] sm:$0x1]  ;;  %v1459_v43 = vsel %vm258_vm3, 65535, %v1295_v42  ;;  %s1298_s25 = smov 32   ;;  %s1090_s27 = smul.u32 24, %s1410_s22 }
  0x3c   : > { %1016 = vmatpush3.bf16.xpose.msra.mxu0 %v159_v8  ;;  %v162_v9 = vsel %vm151_vm0, %v1425_v4, 0  ;;  %v1457_v41 = vpack.c.bf16 %v144_v40, %v144_v40  ;;  %vm865_vm4 = vcmask 785408   ;;  %vm861_vm5 = vcmask 523264   ;;  %s1091_s2 = smul.u32 384, %s1333_s10  ;;  %s873_s5 = scalar_lea.sflag [#allocation4], %s1410_s22 }
  0x3d   : > { %1019 = vmatprep.mubr.msk.bf16.mxu0 %vm151_vm0, %v1429_v7  ;;  %1080 = vmatprep.subr.msk.bf16.mxu0 %vm151_vm0, %v1425_v4  ;;  %s134_s28 = scalar_lea.vmem [#allocation5], %s1090_s27  ;;  %p1639_p11 = scmp.ne.s32.totalorder %s1636_s17, 0 }
  0x3e   : > { %1023 = vmatprep.subr.bf16.mxu1 %v1454_v39  ;;  %v262_v44 = vand.u32 %v1459_v43, %v1457_v41  ;;  %s886_s30 = sshll.u32 %s134_s28, 4  ;;  %s1587_s4 = scalar_lea.hbm %s1633_s1, %s1091_s2  ;;  %s1579_s30 = int_to_ptr.vmem [resolvable:$true] %s886_s30 }
  0x3f   : > { %1024 = vmatpush3.bf16.msra.mxu1 %v1454_v39  ;;  %s1224_s11 = scalar_lea.vmem %s1579_s30, 384  ;;  %s1299_s13 = smov [#allocation5]  }
  0x40   : > { %1025 = vmatprep.subr.bf16.mxu1 %v262_v44  ;;  %p1225_p6 = scmp.ne.s32.totalorder %s1579_s30, %s1224_s11  ;;  %s1228_s14 = sshll.u32 %s1299_s13, 4  ;;  %s1229_s14 = int_to_ptr.vmem [resolvable:$false] %s1228_s14 }
  0x41   : > { %s1230_s19 = scalar_lea.vmem %s1229_s14, 768  ;;  %p1231_p8 = scmp.lt.s32.totalorder %s1579_s30, %s1229_s14 }
  0x42   : > { %p1226_p12 = pnand %p1225_p6, %p1639_p11  ;;  %p1232_p10 = scmp.lt.s32.totalorder %s1230_s19, %s1224_s11 }
  0x43   : > { %1026 = vmatpush3.bf16.msra.mxu1 %v262_v44 }
  0x44   : > { %1018 = vmatpush3.bf16.xpose.msra.mxu0 %v162_v9  ;;  %p1227_p13 = pneg %p1226_p12  ;;  %p1233_p0 = por %p1232_p10, %p1231_p8 }
  0x46   : > { %p1234_p2 = pnand %p1233_p0, %p1227_p13 }
  0x4b   : > { %1020 = vmatmul.mubr.msk.bf16.vlgmr.msra.gmra.mrb[0].mxu0 %vm151_vm0, %v1442_v11 }
 0x11e   : > { %v1021_v12 = vpop.f32.mrb[0].mxu0 }
 0x11f   : > { %v214_v13 = vmul.f32 0.25, %v1021_v12  ;;  %v198_v14 = vpop.f32.mrb[1].mxu0 }
 0x120   : > { %v212_v15 = vmul.f32 0.25, %v198_v14  ;;  %v1022_v16 = vpop.f32.mrb[2].mxu0 }
 0x121   : > { %v201_v17 = vpop.f32.mrb[3].mxu0  ;;  %v223_v18 = vsel %vm222_vm1, %v214_v13, -inf }
 0x122   : > { %v213_v19 = vmul.f32 0.25, %v201_v17  ;;  %224 = vmax.xlane.f32.xlu1 %v223_v18  ;;  %v216_v20 = vsel %vm215_vm2, %v212_v15, -inf }
 0x123   : > { %217 = vmax.xlane.f32.xlu0 %v216_v20 }
 0x124   : > { %v219_v21 = vsel %vm215_vm2, %v213_v19, -inf }
 0x127   : > { %220 = vmax.xlane.f32.xlu0 %v219_v21 }
 0x1af   : > { %v225_v22 = vpop.xlane.xlu1 %224 }
 0x1b0   : > { %v228_v23 = vsub.f32 %v214_v13, %v225_v22  ;;  %v218_v24 = vpop.xlane.xlu0 %217 }
 0x1b1   : > { %v226_v25 = vsub.f32 %v212_v15, %v218_v24 }
 0x1b2   : > { %v233_v26 = vmul.f32 1.442695, %v228_v23 }
 0x1b3   : > { %v229_v27 = vmul.f32 1.442695, %v226_v25 }
 0x1b4   : > { %v221_v28 = vpop.xlane.xlu0 %220 }
 0x1b5   : > { %1146 = vpow2.f32 %v229_v27  ;;  %v227_v29 = vsub.f32 %v213_v19, %v221_v28 }
 0x1b6   : > { %1148 = vpow2.f32 %v233_v26 }
 0x1b7   : > { %v231_v30 = vmul.f32 1.442695, %v227_v29 }
 0x1b9   : > { %1150 = vpow2.f32 %v231_v30 }
 0x1bf   : > { %v1147_v31 = vpop.eup %1146 }
 0x1c0   : > { %v235_v32 = vsel %vm215_vm2, %v1147_v31, 0.0  ;;  %v1149_v33 = vpop.eup %1148 }
 0x1c1   : > { %236 = vadd.xlane.f32.xlu1 %v235_v32  ;;  %v241_v35 = vsel %vm222_vm1, %v1149_v33, 0.0 }
 0x1c3   : > { %v1151_v34 = vpop.eup %1150 }
 0x1c4   : > { %v238_v36 = vsel %vm215_vm2, %v1151_v34, 0.0 }
 0x1c5   : > { %242 = vadd.xlane.f32.xlu1 %v241_v35  ;;  %239 = vadd.xlane.f32.xlu0 %v238_v36 }
 0x1d6   : > { %322 = vrot.lane.b32.xlu1 %v1425_v4, %s1296_s16 }
 0x1da   : > { %314 = vrot.lane.b32.xlu1 %v1429_v7, %s1296_s16 }
 0x1db   : > { %320 = vrot.lane.b32.xlu0 %v1423_v3, %s1296_s16 }
 0x1de   : > { %316 = vrot.lane.b32.xlu1 %v1442_v11, %s1296_s16 }
 0x24e   : > { %v237_v45 = vpop.xlane.xlu1 %236 }
 0x24f   : > { %1152 = vrcp.f32 %v237_v45 }
 0x252   : > { %v243_v46 = vpop.xlane.xlu1 %242  ;;  %v240_v47 = vpop.xlane.xlu0 %239 }
 0x253   : > { %1154 = vrcp.f32 %v243_v46 }
 0x254   : > { %1156 = vrcp.f32 %v240_v47 }
 0x256   : > { %v321_v48 = vpop.permute.xlu0 %320  ;;  %v323_v50 = vpop.permute.xlu1 %322 }
 0x257   : > { %1081 = vmatprep.subr.msk.bf16.mxu1 %vm151_vm0, %v321_v48  ;;  %v331_v58 = vsel %vm151_vm0, %v321_v48, 0  ;;  %v334_v60 = vsel %vm151_vm0, %v323_v50, 0 }
 0x259   : > { %v1153_v49 = vpop.eup %1152 }
 0x25a   : > { %v247_v54 = vmul.f32 %v1153_v49, %v1147_v31  ;;  %v315_v59 = vpop.permute.xlu1 %314 }
 0x25d   : > { %v1155_v51 = vpop.eup %1154 }
 0x25e   : > { %v1157_v52 = vpop.eup %1156  ;;  %v249_v53 = vmul.f32 %v1155_v51, %v1149_v33  ;;  %v317_v61 = vpop.permute.xlu1 %316 }
 0x25f   : > { %v248_v55 = vmul.f32 %v1157_v52, %v1151_v34 }
 0x260   : > { %v251_v56 = vpack.c.bf16 %v249_v53, %v249_v53 }
 0x261   : > { %v250_v57 = vpack.c.bf16 %v248_v55, %v247_v54 }
 0x263   : > { %1027 = vmatprep.mubr.msk.bf16.mxu1 %vm215_vm2, %v250_v57 }
 0x264   : > { %1028 = vmatmul.mubr.msk.bf16.vlgmr.msra.gmra.mrb[0].mxu1 %vm215_vm2, %v251_v56 }
 0x265   : > { %1032 = vmatpush3.bf16.xpose.msra.mxu1 %v331_v58  ;;  %1035 = vmatprep.mubr.msk.bf16.mxu1 %vm151_vm0, %v315_v59 }
 0x266   : > { %1082 = vmatprep.subr.msk.bf16.mxu1 %vm151_vm0, %v323_v50 }
 0x26d   : > { %1034 = vmatpush3.bf16.xpose.msra.mxu1 %v334_v60 }
 0x274   : > { %1036 = vmatmul.mubr.msk.bf16.vlgmr.msra.gmra.mrb[4].mxu1 %vm151_vm0, %v317_v61 }
 0x337   : > { %v1481_v62 = vpop.f32.mrb[0].mxu1 }
 0x338   : > { %v1483_v63 = vpop.f32.mrb[1].mxu1 }
 0x339   : > { %v1030_v0 = vpop.f32.mrb[2].mxu1 }
 0x33a   : > { %v1485_v1 = vpop.f32.mrb[3].mxu1 }
 0x347   : > { %v1037_v2 = vpop.f32.mrb[4].mxu1 }
 0x348   : > { %v370_v5 = vpop.f32.mrb[5].mxu1  ;;  %v386_v10 = vmul.f32 0.25, %v1037_v2 }
 0x349   : > { %v384_v6 = vmul.f32 0.25, %v370_v5  ;;  %v1038_v8 = vpop.f32.mrb[6].mxu1 }
 0x34a   : > { %v373_v9 = vpop.f32.mrb[7].mxu1  ;;  %v393_v15 = vsel %vm222_vm1, %v386_v10, -inf }
 0x34b   : > { %v385_v12 = vmul.f32 0.25, %v373_v9  ;;  %v387_v13 = vsel %vm215_vm2, %v384_v6, -inf }
 0x34c   : > { %388 = vmax.xlane.f32.xlu0 %v387_v13 }
 0x34d   : > { %v390_v14 = vsel %vm215_vm2, %v385_v12, -inf }
 0x34e   : > { %391 = vmax.xlane.f32.xlu1 %v390_v14 }
 0x350   : > { %394 = vmax.xlane.f32.xlu0 %v393_v15 }
 0x3d9   : > { %v389_v16 = vpop.xlane.xlu0 %388 }
 0x3da   : > { %v396_v17 = vsub.f32 %v384_v6, %v389_v16 }
 0x3db   : > { %v392_v18 = vpop.xlane.xlu1 %391 }
 0x3dc   : > { %v399_v19 = vmul.f32 1.442695, %v396_v17  ;;  %v397_v20 = vsub.f32 %v385_v12, %v392_v18 }
 0x3dd   : > { %v395_v21 = vpop.xlane.xlu0 %394 }
 0x3de   : > { %1158 = vpow2.f32 %v399_v19  ;;  %v401_v22 = vmul.f32 1.442695, %v397_v20  ;;  %v398_v23 = vsub.f32 %v386_v10, %v395_v21 }
 0x3e0   : > { %1160 = vpow2.f32 %v401_v22  ;;  %v403_v24 = vmul.f32 1.442695, %v398_v23 }
 0x3e2   : > { %1162 = vpow2.f32 %v403_v24 }
 0x3e8   : > { %v1159_v25 = vpop.eup %1158 }
 0x3e9   : > { %v405_v26 = vsel %vm215_vm2, %v1159_v25, 0.0 }
 0x3ea   : > { %v1161_v27 = vpop.eup %1160  ;;  %406 = vadd.xlane.f32.xlu0 %v405_v26 }
 0x3eb   : > { %v408_v30 = vsel %vm215_vm2, %v1161_v27, 0.0 }
 0x3ec   : > { %v1163_v28 = vpop.eup %1162 }
 0x3ed   : > { %v411_v29 = vsel %vm222_vm1, %v1163_v28, 0.0 }
 0x3ee   : > { %412 = vadd.xlane.f32.xlu1 %v411_v29  ;;  %409 = vadd.xlane.f32.xlu0 %v408_v30 }
 0x3ff   : > { %426 = vrot.lane.b32.xlu1 %v1457_v41, %s1296_s16 }
 0x403   : > { %490 = vrot.lane.b32.xlu1 %v1423_v3, %s1297_s24 }
 0x404   : > { %424 = vrot.lane.b32.xlu0 %v1454_v39, %s1296_s16 }
 0x407   : > { %492 = vrot.lane.b32.xlu1 %v1425_v4, %s1297_s24 }
 0x408   : > { %486 = vrot.lane.b32.xlu0 %v1429_v7, %s1297_s24 }
 0x40b   : > { %488 = vrot.lane.b32.xlu1 %v1442_v11, %s1297_s24 }
 0x477   : > { %v407_v31 = vpop.xlane.xlu0 %406 }
 0x478   : > { %1164 = vrcp.f32 %v407_v31 }
 0x47b   : > { %v410_v32 = vpop.xlane.xlu0 %409  ;;  %v413_v33 = vpop.xlane.xlu1 %412 }
 0x47c   : > { %1166 = vrcp.f32 %v410_v32 }
 0x47d   : > { %1168 = vrcp.f32 %v413_v33 }
 0x47f   : > { %v425_v34 = vpop.permute.xlu0 %424  ;;  %v427_v35 = vpop.permute.xlu1 %426 }
 0x480   : > { %1039 = vmatprep.subr.bf16.mxu0 %v425_v34  ;;  %v436_v36 = vand.u32 %v427_v35, %v1459_v43 }
 0x481   : > { %1040 = vmatpush3.bf16.msra.mxu0 %v425_v34 }
 0x482   : > { %1041 = vmatprep.subr.bf16.mxu0 %v436_v36  ;;  %v1165_v38 = vpop.eup %1164 }
 0x483   : > { %v491_v37 = vpop.permute.xlu1 %490  ;;  %v417_v44 = vmul.f32 %v1165_v38, %v1159_v25  ;;  %v487_v49 = vpop.permute.xlu0 %486 }
 0x484   : > { %v501_v50 = vsel %vm151_vm0, %v491_v37, 0 }
 0x485   : > { %1042 = vmatpush3.bf16.msra.mxu0 %v436_v36 }
 0x486   : > { %v1167_v40 = vpop.eup %1166  ;;  %1083 = vmatprep.subr.msk.bf16.mxu0 %vm151_vm0, %v491_v37 }
 0x487   : > { %v1169_v42 = vpop.eup %1168  ;;  %v418_v45 = vmul.f32 %v1167_v40, %v1161_v27  ;;  %v493_v51 = vpop.permute.xlu1 %492 }
 0x488   : > { %v419_v46 = vmul.f32 %v1169_v42, %v1163_v28  ;;  %v504_v52 = vsel %vm151_vm0, %v493_v51, 0 }
 0x489   : > { %v420_v47 = vpack.c.bf16 %v418_v45, %v417_v44 }
 0x48a   : > { %v421_v48 = vpack.c.bf16 %v419_v46, %v419_v46 }
 0x48b   : > { %1043 = vmatprep.mubr.msk.bf16.mxu0 %vm215_vm2, %v420_v47  ;;  %v489_v53 = vpop.permute.xlu1 %488 }
 0x48c   : > { %1044 = vmatmul.mubr.msk.bf16.vlgmr.msra.gmra.mrb[4].mxu0 %vm215_vm2, %v421_v48 }
 0x48d   : > { %1051 = vmatprep.mubr.msk.bf16.mxu0 %vm151_vm0, %v487_v49 }
 0x48e   : > { %1048 = vmatpush3.bf16.xpose.msra.mxu0 %v501_v50 }
 0x48f   : > { %1084 = vmatprep.subr.msk.bf16.mxu0 %vm151_vm0, %v493_v51 }
 0x496   : > { %1050 = vmatpush3.bf16.xpose.msra.mxu0 %v504_v52 }
 0x49d   : > { %1052 = vmatmul.mubr.msk.bf16.vlgmr.msra.gmra.mrb[8].mxu0 %vm151_vm0, %v489_v53 }
 0x55f   : > { %v1514_v54 = vpop.f32.mrb[4].mxu0 }
 0x560   : > { %v1516_v55 = vpop.f32.mrb[5].mxu0 }
 0x561   : > { %v1046_v56 = vpop.f32.mrb[6].mxu0 }
 0x562   : > { %v1518_v57 = vpop.f32.mrb[7].mxu0 }
 0x570   : > { %v1053_v58 = vpop.f32.mrb[8].mxu0 }
 0x571   : > { %v540_v59 = vpop.f32.mrb[9].mxu0  ;;  %v556_v2 = vmul.f32 0.25, %v1053_v58 }
 0x572   : > { %v554_v60 = vmul.f32 0.25, %v540_v59  ;;  %v1054_v61 = vpop.f32.mrb[10].mxu0 }
 0x573   : > { %v543_v0 = vpop.f32.mrb[11].mxu0  ;;  %v563_v9 = vsel %vm222_vm1, %v556_v2, -inf }
 0x574   : > { %v555_v5 = vmul.f32 0.25, %v543_v0  ;;  %v557_v6 = vsel %vm215_vm2, %v554_v60, -inf }
 0x575   : > { %558 = vmax.xlane.f32.xlu0 %v557_v6 }
 0x576   : > { %v560_v8 = vsel %vm215_vm2, %v555_v5, -inf }
 0x577   : > { %561 = vmax.xlane.f32.xlu1 %v560_v8 }
 0x579   : > { %564 = vmax.xlane.f32.xlu0 %v563_v9 }
 0x602   : > { %v559_v10 = vpop.xlane.xlu0 %558 }
 0x603   : > { %v566_v12 = vsub.f32 %v554_v60, %v559_v10 }
 0x604   : > { %v562_v13 = vpop.xlane.xlu1 %561 }
 0x605   : > { %v569_v14 = vmul.f32 1.442695, %v566_v12  ;;  %v567_v15 = vsub.f32 %v555_v5, %v562_v13 }
 0x606   : > { %v565_v16 = vpop.xlane.xlu0 %564 }
 0x607   : > { %1170 = vpow2.f32 %v569_v14  ;;  %v571_v17 = vmul.f32 1.442695, %v567_v15  ;;  %v568_v18 = vsub.f32 %v556_v2, %v565_v16 }
 0x609   : > { %1172 = vpow2.f32 %v571_v17  ;;  %v573_v19 = vmul.f32 1.442695, %v568_v18 }
 0x60b   : > { %1174 = vpow2.f32 %v573_v19 }
 0x611   : > { %v1171_v20 = vpop.eup %1170 }
 0x612   : > { %v575_v21 = vsel %vm215_vm2, %v1171_v20, 0.0 }
 0x613   : > { %v1173_v22 = vpop.eup %1172  ;;  %576 = vadd.xlane.f32.xlu0 %v575_v21 }
 0x614   : > { %v578_v25 = vsel %vm215_vm2, %v1173_v22, 0.0 }
 0x615   : > { %v1175_v23 = vpop.eup %1174 }
 0x616   : > { %v581_v24 = vsel %vm222_vm1, %v1175_v23, 0.0 }
 0x617   : > { %582 = vadd.xlane.f32.xlu1 %v581_v24  ;;  %579 = vadd.xlane.f32.xlu0 %v578_v25 }
 0x628   : > { %594 = vrot.lane.b32.xlu1 %v1457_v41, %s1297_s24 }
 0x62c   : > { %658 = vrot.lane.b32.xlu1 %v1423_v3, %s1298_s25 }
 0x62d   : > { %592 = vrot.lane.b32.xlu0 %v1454_v39, %s1297_s24 }
 0x630   : > { %660 = vrot.lane.b32.xlu1 %v1425_v4, %s1298_s25 }
 0x631   : > { %654 = vrot.lane.b32.xlu0 %v1429_v7, %s1298_s25 }
 0x634   : > { %656 = vrot.lane.b32.xlu1 %v1442_v11, %s1298_s25 }
 0x6a0   : > { %v577_v26 = vpop.xlane.xlu0 %576 }
 0x6a1   : > { %1176 = vrcp.f32 %v577_v26 }
 0x6a4   : > { %v580_v27 = vpop.xlane.xlu0 %579  ;;  %v583_v28 = vpop.xlane.xlu1 %582 }
 0x6a5   : > { %1178 = vrcp.f32 %v580_v27 }
 0x6a6   : > { %1180 = vrcp.f32 %v583_v28 }
 0x6a8   : > { %v593_v29 = vpop.permute.xlu0 %592  ;;  %v595_v3 = vpop.permute.xlu1 %594 }
 0x6a9   : > { %1055 = vmatprep.subr.bf16.mxu1 %v593_v29  ;;  %v604_v30 = vand.u32 %v595_v3, %v1459_v43 }
 0x6aa   : > { %1056 = vmatpush3.bf16.msra.mxu1 %v593_v29 }
 0x6ab   : > { %1057 = vmatprep.subr.bf16.mxu1 %v604_v30  ;;  %v1177_v31 = vpop.eup %1176 }
 0x6ac   : > { %v659_v4 = vpop.permute.xlu1 %658  ;;  %v587_v32 = vmul.f32 %v1177_v31, %v1171_v20  ;;  %v655_v37 = vpop.permute.xlu0 %654 }
 0x6ad   : > { %v669_v38 = vsel %vm151_vm0, %v659_v4, 0 }
 0x6ae   : > { %1058 = vmatpush3.bf16.msra.mxu1 %v604_v30 }
 0x6af   : > { %v1179_v7 = vpop.eup %1178  ;;  %1085 = vmatprep.subr.msk.bf16.mxu1 %vm151_vm0, %v659_v4 }
 0x6b0   : > { %v1181_v11 = vpop.eup %1180  ;;  %v588_v33 = vmul.f32 %v1179_v7, %v1173_v22  ;;  %v661_v40 = vpop.permute.xlu1 %660 }
 0x6b1   : > { %v589_v34 = vmul.f32 %v1181_v11, %v1175_v23  ;;  %v672_v42 = vsel %vm151_vm0, %v661_v40, 0 }
 0x6b2   : > { %v590_v35 = vpack.c.bf16 %v588_v33, %v587_v32 }
 0x6b3   : > { %v591_v36 = vpack.c.bf16 %v589_v34, %v589_v34 }
 0x6b4   : > { %1059 = vmatprep.mubr.msk.bf16.mxu1 %vm215_vm2, %v590_v35  ;;  %v657_v44 = vpop.permute.xlu1 %656 }
 0x6b5   : > { %1060 = vmatmul.mubr.msk.bf16.vlgmr.msra.gmra.mrb[8].mxu1 %vm215_vm2, %v591_v36 }
 0x6b6   : > { %1067 = vmatprep.mubr.msk.bf16.mxu1 %vm151_vm0, %v655_v37 }
 0x6b7   : > { %1064 = vmatpush3.bf16.xpose.msra.mxu1 %v669_v38 }
 0x6b8   : > { %1086 = vmatprep.subr.msk.bf16.mxu1 %vm151_vm0, %v661_v40 }
 0x6bf   : > { %1066 = vmatpush3.bf16.xpose.msra.mxu1 %v672_v42 }
 0x6c6   : > { %1068 = vmatmul.mubr.msk.bf16.vlgmr.msra.gmra.mrb[12].mxu1 %vm151_vm0, %v657_v44 }
 0x788   : > { %v1061_v45 = vpop.f32.mrb[8].mxu1 }
 0x789   : > { %v640_v46 = vpop.f32.mrb[9].mxu1 }
 0x78a   : > { %v1062_v47 = vpop.f32.mrb[10].mxu1 }
 0x78b   : > { %v643_v48 = vpop.f32.mrb[11].mxu1 }
 0x799   : > { %v1069_v49 = vpop.f32.mrb[12].mxu1 }
 0x79a   : > { %v708_v50 = vpop.f32.mrb[13].mxu1  ;;  %v724_v56 = vmul.f32 0.25, %v1069_v49 }
 0x79b   : > { %v722_v51 = vmul.f32 0.25, %v708_v50  ;;  %v1070_v52 = vpop.f32.mrb[14].mxu1 }
 0x79c   : > { %v711_v53 = vpop.f32.mrb[15].mxu1  ;;  %v731_v61 = vsel %vm222_vm1, %v724_v56, -inf }
 0x79d   : > { %v723_v58 = vmul.f32 0.25, %v711_v53  ;;  %v725_v59 = vsel %vm215_vm2, %v722_v51, -inf }
 0x79e   : > { %726 = vmax.xlane.f32.xlu0 %v725_v59 }
 0x79f   : > { %v728_v60 = vsel %vm215_vm2, %v723_v58, -inf }
 0x7a0   : > { %729 = vmax.xlane.f32.xlu1 %v728_v60 }
 0x7a2   : > { %732 = vmax.xlane.f32.xlu0 %v731_v61 }
 0x82b   : > { %v727_v0 = vpop.xlane.xlu0 %726 }
 0x82c   : > { %v734_v2 = vsub.f32 %v722_v51, %v727_v0 }
 0x82d   : > { %v730_v5 = vpop.xlane.xlu1 %729 }
 0x82e   : > { %v737_v6 = vmul.f32 1.442695, %v734_v2  ;;  %v735_v8 = vsub.f32 %v723_v58, %v730_v5 }
 0x82f   : > { %v733_v9 = vpop.xlane.xlu0 %732 }
 0x830   : > { %1182 = vpow2.f32 %v737_v6  ;;  %v739_v10 = vmul.f32 1.442695, %v735_v8  ;;  %v736_v12 = vsub.f32 %v724_v56, %v733_v9 }
 0x832   : > { %1184 = vpow2.f32 %v739_v10  ;;  %v741_v13 = vmul.f32 1.442695, %v736_v12 }
 0x834   : > { %1186 = vpow2.f32 %v741_v13 }
 0x83a   : > { %v1183_v14 = vpop.eup %1182 }
 0x83b   : > { %v743_v15 = vsel %vm215_vm2, %v1183_v14, 0.0 }
 0x83c   : > { %v1185_v16 = vpop.eup %1184  ;;  %744 = vadd.xlane.f32.xlu0 %v743_v15 }
 0x83d   : > { %v746_v19 = vsel %vm215_vm2, %v1185_v16, 0.0 }
 0x83e   : > { %v1187_v17 = vpop.eup %1186 }
 0x83f   : > { %v749_v18 = vsel %vm222_vm1, %v1187_v17, 0.0 }
 0x840   : > { %750 = vadd.xlane.f32.xlu1 %v749_v18  ;;  %747 = vadd.xlane.f32.xlu0 %v746_v19 }
 0x851   : > { %762 = vrot.lane.b32.xlu1 %v1457_v41, %s1298_s25 }
 0x855   : > { %825 = vrot.lane.b32.xlu1 %v1516_v55, %s1298_s25 }
 0x856   : > { %760 = vrot.lane.b32.xlu0 %v1454_v39, %s1298_s25 }
 0x859   : > { %827 = vrot.lane.b32.xlu1 %v1518_v57, %s1298_s25 }
 0x85a   : > { %829 = vrot.lane.b32.xlu0 %v1514_v54, %s1298_s25 }
 0x85d   : > { %837 = vrot.lane.b32.xlu1 %v640_v46, %s1297_s24 }
 0x85e   : > { %839 = vrot.lane.b32.xlu0 %v643_v48, %s1297_s24 }
 0x861   : > { %841 = vrot.lane.b32.xlu1 %v1061_v45, %s1297_s24 }
 0x8c9   : > { %v745_v20 = vpop.xlane.xlu0 %744 }
 0x8ca   : > { %1188 = vrcp.f32 %v745_v20 }
 0x8cd   : > { %v748_v41 = vpop.xlane.xlu0 %747  ;;  %v751_v21 = vpop.xlane.xlu1 %750 }
 0x8ce   : > { %1190 = vrcp.f32 %v748_v41 }
 0x8cf   : > { %1192 = vrcp.f32 %v751_v21 }
 0x8d1   : > { %v761_v55 = vpop.permute.xlu0 %760  ;;  %v763_v39 = vpop.permute.xlu1 %762 }
 0x8d2   : > { %v772_v22 = vand.u32 %v763_v39, %v1459_v43  ;;  %1071 = vmatprep.subr.bf16.mxu0 %v761_v55 }
 0x8d3   : > { %1072 = vmatpush3.bf16.msra.mxu0 %v761_v55 }
 0x8d4   : > { %1073 = vmatprep.subr.bf16.mxu0 %v772_v22  ;;  %v1189_v54 = vpop.eup %1188 }
 0x8d5   : > { %v755_v24 = vmul.f32 %v1189_v54, %v1183_v14  ;;  %v826_v4 = vpop.permute.xlu1 %825  ;;  %v830_v7 = vpop.permute.xlu0 %829 }
 0x8d6   : > { %v858_v34 = vsel %vm151_vm0, %v1483_v63, %v826_v4 }
 0x8d7   : > { %1074 = vmatpush3.bf16.msra.mxu0 %v772_v22 }
 0x8d8   : > { %v1191_v57 = vpop.eup %1190 }
 0x8d9   : > { %v1193_v23 = vpop.eup %1192  ;;  %v756_v25 = vmul.f32 %v1191_v57, %v1185_v16  ;;  %v828_v31 = vpop.permute.xlu1 %827 }
 0x8da   : > { %v757_v26 = vmul.f32 %v1193_v23, %v1187_v17  ;;  %v840_v32 = vpop.permute.xlu0 %839  ;;  %v859_v35 = vsel %vm151_vm0, %v1485_v1, %v828_v31  ;;  %v860_v1 = vsel %vm151_vm0, %v1481_v62, %v830_v7 }
 0x8db   : > { %v758_v27 = vpack.c.bf16 %v756_v25, %v755_v24  ;;  %v863_v40 = vsel %vm861_vm5, %v859_v35, %v840_v32 }
 0x8dc   : > { %v759_v28 = vpack.c.bf16 %v757_v26, %v757_v26 }
 0x8dd   : > { %1075 = vmatprep.mubr.msk.bf16.mxu0 %vm215_vm2, %v758_v27  ;;  %v838_v11 = vpop.permute.xlu1 %837 }
 0x8de   : > { %1076 = vmatmul.mubr.msk.bf16.vlgmr.msra.gmra.mrb[12].mxu0 %vm215_vm2, %v759_v28  ;;  %v862_v36 = vsel %vm861_vm5, %v858_v34, %v838_v11 }
 0x8e1   : > { %v842_v33 = vpop.permute.xlu1 %841 }
 0x8e2   : > { %v864_v44 = vsel %vm861_vm5, %v860_v1, %v842_v33 }
 0x9b1   : > { %v1077_v29 = vpop.f32.mrb[12].mxu0 }
 0x9b2   : > { %v808_v3 = vpop.f32.mrb[13].mxu0 }
 0x9b3   : > { %849 = vrot.lane.b32.xlu0 %v808_v3, %s1296_s16  ;;  %v1078_v43 = vpop.f32.mrb[14].mxu0 }
 0x9b4   : > { %v811_v30 = vpop.f32.mrb[15].mxu0 }
 0x9b5   : > { %851 = vrot.lane.b32.xlu1 %v811_v30, %s1296_s16 }
 0x9b7   : > { %853 = vrot.lane.b32.xlu0 %v1077_v29, %s1296_s16 }
 0xa25   : > { %v850_v37 = vpop.permute.xlu0 %849 }
 0xa26   : > { %v866_v38 = vsel %vm865_vm4, %v862_v36, %v850_v37 }
 0xa27   : > { %869 = vst [vmem:[%s134_s28] sm:$0xff] %v866_v38  ;;  %v852_v63 = vpop.permute.xlu1 %851 }
 0xa28   : > { %v867_v42 = vsel %vm865_vm4, %v863_v40, %v852_v63 }
 0xa29   : > { %870 = vst [vmem:[%s134_s28 + $0x8] sm:$0xff] %v867_v42  ;;  %v854_v45 = vpop.permute.xlu0 %853 }
 0xa2a   : > { %v868_v46 = vsel %vm865_vm4, %v864_v44, %v854_v45 }
 0xa2b   : > { %871 = vst [vmem:[%s134_s28 + $0x10] sm:$0x1] %v868_v46 }
 0xa2c   : > { %1237 = shalt.err (!%p1234_p2)
}
 0xa2d   : > { %s1238_s20 = scalar_lea.hbm %s1587_s4, 384  ;;  %s1242_s26 = scalar_lea.hbm %s1633_s1, 768 }
 0xa2e   : > { %p1239_p4 = scmp.ne.s32.totalorder %s1587_s4, %s1238_s20  ;;  %p1243_p9 = scmp.lt.u32.totalorder %s1587_s4, %s1633_s1 }
 0xa2f   : > { %p1244_p1 = scmp.lt.u32.totalorder %s1242_s26, %s1238_s20  ;;  %p1246_p6 = scmp.lt.u32.totalorder %s1238_s20, %s1587_s4 }
 0xa30   : > { %p1240_p5 = pnand %p1239_p4, %p1639_p11 }
 0xa31   : > { %p1245_p3 = por %p1244_p1, %p1243_p9 }
 0xa32   : > { %p1241_p7 = pneg %p1240_p5 }
 0xa33   : > { %p1247_p12 = por %p1246_p6, %p1245_p3 }
 0xa35   : > { %p1248_p13 = pnand %p1247_p12, %p1241_p7 }
 0xa37   : > { %1251 = shalt.err (!%p1248_p13)
}
 0xa38   : > { %s1300_s24 = smov 128   ;;  %s1301_s25 = smov 8  }
 0xa39   : > { %1094 = dma.vmem_to_hbm [thread:$0]  (%p1639_p11), %s1579_s30, 384, %s1587_s4, %s873_s5, %s1300_s24, %s1300_s24, %s1301_s25  }
 0xa3a PF: > { %s901_s27 = sand.u32 1, %s1278_s6   ;;  %p1640_p8 = scmp.ne.s32.totalorder %s1637_s18, 0 }
 0xa3b   : > { %p1641_p10 = scmp.ge.s32.totalorder %s1290_s9, 2  ;;  %s902_s28 = scalar_lea.sflag [#allocation4], %s901_s27 }
 0xa3d   : > { %p1101_p0 = pnand %p1641_p10, %p1640_p8 }
 0xa3f   : > { %1273 = dma.done.wait (!%p1101_p0), %s902_s28, 384  }
 0xa40   : > { %1275 = vsyncadd (!%p1101_p0), %s902_s28, 4294966912  ;;  %p14_p2 = scmp.ge.s32.totalorder %s1337_s12, 4   ;;  %s1642_s6 = smov %s1282_s7 }
 0xa41   : > { %s1643_s7 = smov %s1286_s8  ;;  %s1644_s8 = smov %s1349_s15 }
 0xa42   : > { %s1645_s9 = smov %s1337_s12  ;;  %16 = sbr.rel (!%p14_p2) target bundleno = 5 (0x5), region = 69 }
 0xa49   :  { %907 = vsyncpa [#allocation3], 1 }
 0xa4a   :  { %909 = vsyncpa [#allocation3 + $0x1], 1 }
 0xa4b   :  { %910 = vsyncpa [#allocation4], 1 }
 0xa4c   :  { %912 = vsyncpa [#allocation4 + $0x1], 1 }

// kernel: vit_forward.16
= control target key start
LH: loop header
LB: loop body
LE: loop exit
PB: predicated region body
PF: predicated region fallthrough
CT: control target
= control target key end

     0   :  { %10 = vsyncpa [#allocation3], 0  ;;  %s805_s0 = inlined_call_operand.hbm [shape: f32[34,128], index: 0, kind: input, shape index: {}]   ;;  %s806_s1 = inlined_call_operand.hbm [shape: f32[1,128], index: 1, kind: input, shape index: {}]   ;;  %s807_s2 = inlined_call_operand.hbm [shape: f32[1,128], index: 2, kind: input, shape index: {}]   ;;  %s808_s3 = inlined_call_operand.hbm [shape: bf16[128,128], index: 3, kind: input, shape index: {}]   ;;  %s809_s4 = inlined_call_operand.hbm [shape: f32[1,128], index: 4, kind: input, shape index: {}]   ;;  %s810_s5 = inlined_call_operand.hbm [shape: f32[34,128], index: 5, kind: output, shape index: {}]  }
   0x1   :  { %11 = vsyncpa [#allocation6], 0 }
   0x2   :  { %12 = vsyncpa [#allocation9], 0 }
   0x3   :  { %13 = vsyncpa [#allocation4], 0  ;;  %s626_s18 = smov [#allocation5]   ;;  %s627_s20 = smov [#allocation8]  }
   0x4   :  { %s32_s19 = sshll.u32 %s626_s18, 4  ;;  %s51_s21 = sshll.u32 %s627_s20, 4  ;;  %s33_s19 = int_to_ptr.vmem [resolvable:$true] %s32_s19  ;;  %s668_s21 = int_to_ptr.vmem [resolvable:$true] %s51_s21 }
   0x5   :  { %s486_s24 = scalar_lea.hbm %s806_s1, 16 }
   0x6   :  { %p487_p0 = scmp.ne.s32.totalorder %s806_s1, %s486_s24  ;;  %p490_p1 = scmp.lt.u32.totalorder %s486_s24, %s806_s1 }
   0x8   :  { %p492_p2 = pnand %p490_p1, %p487_p0 }
   0xa   :  { %495 = shalt.err (!%p492_p2)
}
   0xb   :  { %s496_s29 = scalar_lea.vmem %s33_s19, 16  ;;  %s500_s30 = scalar_lea.vmem %s33_s19, 32 }
   0xc   :  { %p497_p3 = scmp.ne.s32.totalorder %s33_s19, %s496_s29  ;;  %p501_p4 = scmp.lt.s32.totalorder %s33_s19, %s33_s19 }
   0xd   :  { %p502_p5 = scmp.lt.s32.totalorder %s500_s30, %s496_s29 }
   0xf   :  { %p503_p6 = por %p502_p5, %p501_p4 }
  0x11   :  { %p504_p7 = pnand %p503_p6, %p497_p3 }
  0x13   :  { %507 = shalt.err (!%p504_p7)
}
  0x14   :  { %35 = dma.hbm_to_vmem [thread:$0]  %s806_s1, 16, %s33_s19, [#allocation6]  }
  0x15   :  { %s508_s10 = scalar_lea.hbm %s808_s3, 1024 }
  0x16   :  { %p509_p8 = scmp.ne.s32.totalorder %s808_s3, %s508_s10  ;;  %p512_p9 = scmp.lt.u32.totalorder %s508_s10, %s808_s3 }
  0x18   :  { %p514_p10 = pnand %p512_p9, %p509_p8 }
  0x1a   :  { %517 = shalt.err (!%p514_p10)
}
  0x1b   :  { %s518_s15 = scalar_lea.vmem %s668_s21, 1024  ;;  %p523_p12 = scmp.lt.s32.totalorder %s668_s21, %s668_s21 }
  0x1c   :  { %p519_p11 = scmp.ne.s32.totalorder %s668_s21, %s518_s15  ;;  %p524_p13 = scmp.lt.s32.totalorder %s518_s15, %s518_s15 }
  0x1e   :  { %p525_p0 = por %p524_p13, %p523_p12 }
  0x20   :  { %p526_p1 = pnand %p525_p0, %p519_p11 }
  0x22   :  { %529 = shalt.err (!%p526_p1)
}
  0x23   :  { %s628_s1 = smov 64   ;;  %s629_s16 = smov 4  }
  0x24   :  { %57 = dma.hbm_to_vmem [thread:$0]  %s808_s3, 1024, %s668_s21, [#allocation9], %s628_s1, %s628_s1, %s629_s16  }
  0x25   :  { %s630_s19 = smov [#allocation2]   ;;  %s530_s24 = scalar_lea.hbm %s805_s0, 640 }
  0x26   :  { %s19_s20 = sshll.u32 %s630_s19, 4  ;;  %p531_p2 = scmp.ne.s32.totalorder %s805_s0, %s530_s24  ;;  %s20_s20 = int_to_ptr.vmem [resolvable:$true] %s19_s20 }
  0x27   :  { %p534_p3 = scmp.lt.u32.totalorder %s530_s24, %s805_s0 }
  0x29   :  { %p536_p4 = pnand %p534_p3, %p531_p2 }
  0x2b   :  { %539 = shalt.err (!%p536_p4)
}
  0x2c   :  { %s540_s29 = scalar_lea.vmem %s20_s20, 640  ;;  %p545_p6 = scmp.lt.s32.totalorder %s20_s20, %s20_s20 }
  0x2d   :  { %p541_p5 = scmp.ne.s32.totalorder %s20_s20, %s540_s29  ;;  %p546_p7 = scmp.lt.s32.totalorder %s540_s29, %s540_s29 }
  0x2f   :  { %p547_p8 = por %p546_p7, %p545_p6 }
  0x31   :  { %p548_p9 = pnand %p547_p8, %p541_p5 }
  0x33   :  { %551 = shalt.err (!%p548_p9)
}
  0x34   :  { %s631_s3 = smov 128   ;;  %s632_s21 = smov 8  }
  0x35   :  { %25 = dma.hbm_to_vmem [thread:$0]  %s805_s0, 640, %s20_s20, [#allocation3], %s631_s3, %s631_s3, %s632_s21  }
  0x36   :  { %s633_s7 = smov [#allocation7]   ;;  %s634_s9 = smov [#allocation10]  }
  0x37   :  { %s42_s8 = sshll.u32 %s633_s7, 4  ;;  %s64_s10 = sshll.u32 %s634_s9, 4  ;;  %s43_s8 = int_to_ptr.vmem [resolvable:$true] %s42_s8  ;;  %s65_s10 = int_to_ptr.vmem [resolvable:$true] %s64_s10 }
  0x38   :  { %s552_s13 = scalar_lea.hbm %s807_s2, 16 }
  0x39   :  { %p553_p10 = scmp.ne.s32.totalorder %s807_s2, %s552_s13  ;;  %p556_p11 = scmp.lt.u32.totalorder %s552_s13, %s807_s2 }
  0x3b   :  { %p558_p12 = pnand %p556_p11, %p553_p10 }
  0x3d   :  { %561 = shalt.err (!%p558_p12)
}
  0x3e   :  { %s562_s0 = scalar_lea.vmem %s43_s8, 16  ;;  %s566_s17 = scalar_lea.vmem %s43_s8, 32 }
  0x3f   :  { %p563_p13 = scmp.ne.s32.totalorder %s43_s8, %s562_s0  ;;  %p567_p0 = scmp.lt.s32.totalorder %s43_s8, %s43_s8 }
  0x40   :  { %p568_p1 = scmp.lt.s32.totalorder %s566_s17, %s562_s0 }
  0x42   :  { %p569_p2 = por %p568_p1, %p567_p0 }
  0x44   :  { %p570_p3 = pnand %p569_p2, %p563_p13 }
  0x46   :  { %573 = shalt.err (!%p570_p3)
}
  0x47   :  { %45 = dma.hbm_to_vmem [thread:$0]  %s807_s2, 16, %s43_s8, [#allocation6]  }
  0x48   :  { %s574_s23 = scalar_lea.hbm %s809_s4, 16 }
  0x49   :  { %p575_p4 = scmp.ne.s32.totalorder %s809_s4, %s574_s23  ;;  %p578_p5 = scmp.lt.u32.totalorder %s574_s23, %s809_s4 }
  0x4b   :  { %p580_p6 = pnand %p578_p5, %p575_p4 }
  0x4d   :  { %583 = shalt.err (!%p580_p6)
}
  0x4e   :  { %s584_s28 = scalar_lea.vmem %s65_s10, 16  ;;  %s588_s29 = scalar_lea.vmem %s65_s10, 32 }
  0x4f   :  { %p585_p7 = scmp.ne.s32.totalorder %s65_s10, %s584_s28  ;;  %p589_p8 = scmp.lt.s32.totalorder %s65_s10, %s65_s10 }
  0x50   :  { %p590_p9 = scmp.lt.s32.totalorder %s588_s29, %s584_s28 }
  0x52   :  { %p591_p10 = por %p590_p9, %p589_p8 }
  0x54   :  { %p592_p11 = pnand %p591_p10, %p585_p7 }
  0x56   :  { %595 = shalt.err (!%p592_p11)
}
  0x57   :  { %67 = dma.hbm_to_vmem [thread:$0]  %s809_s4, 16, %s65_s10, [#allocation9]  }
  0x58   :  { %618 = dma.done.wait [#allocation3], 640  }
  0x59   :  { %619 = vsyncadd [#allocation3], 4294966656 }
  0x5a   :  { %620 = dma.done.wait [#allocation6], 32  }
  0x5b   :  { %621 = vsyncadd [#allocation6], 4294967264 }
  0x5c   :  { %622 = dma.done.wait [#allocation9], 1040  }
  0x5d   :  { %623 = vsyncadd [#allocation9], 4294966256  ;;  %v738_v0 = vld [vmem:[#allocation2 + $0x10] sm:$0xff]  ;;  %v740_v1 = vld [vmem:[#allocation2 + $0x8] sm:$0xff]  ;;  %vm99_vm0 = vcmask 1041408   ;;  %v635_v13 = vmov 0.0  }
  0x5e   :  { %95 = vadd.xlane.f32.xlu0 %v738_v0  ;;  %93 = vadd.xlane.f32.xlu1 %v740_v1  ;;  %v110_v2 = vmul.f32 %v738_v0, %v738_v0  ;;  %v746_v3 = vld [vmem:[#allocation2 + $0x18] sm:$0xff]  ;;  %v748_v4 = vld [vmem:[#allocation2] sm:$0xff]  ;;  %v109_v10 = vmul.f32 %v740_v1, %v740_v1  ;;  %v458_v12 = vld [vmem:[#allocation8] sm:$0xff]   ;;  %vm636_vm1 = vmmov 0   ;;  %s637_s4 = smov [#allocation11]  }
  0x5f   :  { %v111_v5 = vmul.f32 %v746_v3, %v746_v3  ;;  %v753_v6 = vld [vmem:[#allocation2 + $0x20] sm:$0x3]  ;;  %v108_v7 = vmul.f32 %v748_v4, %v748_v4  ;;  %430 = vmatprep.subr.bf16.mxu1 %v635_v13  ;;  %402 = vmatprep.subr.bf16.mxu0 %v635_v13  ;;  %v459_v14 = vld [vmem:[#allocation8 + $0x8] sm:$0xff]   ;;  %v461_v16 = vld [vmem:[#allocation8 + $0x18] sm:$0xff]   ;;  %s366_s6 = sshll.u32 %s637_s4, 4  ;;  %s367_s6 = int_to_ptr.vmem [resolvable:$true] %s366_s6 }
  0x60   :  { %v100_v8 = vsel %vm99_vm0, %v753_v6, 0.0  ;;  %v112_v9 = vmul.f32 %v753_v6, %v753_v6  ;;  %438 = vmatpush3.bf16.msra.mxu1 %v458_v12  ;;  %403 = vmatpush3.bf16.msra.mxu0 %v458_v12  ;;  %v460_v15 = vld [vmem:[#allocation8 + $0x10] sm:$0xff]   ;;  %v462_v17 = vld [vmem:[#allocation8 + $0x20] sm:$0xff]   ;;  %v463_v18 = vld [vmem:[#allocation8 + $0x28] sm:$0xff]   ;;  %s596_s7 = scalar_lea.vmem %s367_s6, 640  ;;  %p601_p13 = scmp.lt.s32.totalorder %s367_s6, %s367_s6 }
  0x61   :  { %431 = vmatprep.subr.bf16.mxu1 %v635_v13  ;;  %404 = vmatprep.subr.bf16.mxu0 %v635_v13  ;;  %v464_v19 = vld [vmem:[#allocation8 + $0x30] sm:$0xff]   ;;  %v465_v20 = vld [vmem:[#allocation8 + $0x38] sm:$0xff]   ;;  %p597_p12 = scmp.ne.s32.totalorder %s367_s6, %s596_s7  ;;  %p602_p0 = scmp.lt.s32.totalorder %s596_s7, %s596_s7 }
  0x62   :  { %97 = vadd.xlane.f32.xlu0 %v746_v3  ;;  %117 = vadd.xlane.f32.xlu1 %v110_v2  ;;  %v121_v11 = vsel %vm99_vm0, %v112_v9, 0.0  ;;  %v380_v59 = vld [vmem:[#allocation5] ss:$0 sm:$0xff]  ;;  %v381_v2 = vld [vmem:[#allocation7] ss:$0 sm:$0xff] }
  0x63   :  { %422 = vmatprep.mubr.msk.bf16.mxu1 %vm636_vm1, %v635_v13  ;;  %418 = vmatprep.mubr.msk.bf16.mxu0 %vm636_vm1, %v635_v13  ;;  %p603_p1 = por %p602_p0, %p601_p13 }
  0x64   :  { %439 = vmatpush3.bf16.msra.mxu1 %v459_v14  ;;  %405 = vmatpush3.bf16.msra.mxu0 %v459_v14 }
  0x65   :  { %432 = vmatprep.subr.bf16.mxu1 %v635_v13  ;;  %406 = vmatprep.subr.bf16.mxu0 %v635_v13  ;;  %p604_p2 = pnand %p603_p1, %p597_p12 }
  0x66   :  { %119 = vadd.xlane.f32.xlu1 %v111_v5  ;;  %91 = vadd.xlane.f32.xlu0 %v748_v4 }
  0x68   :  { %440 = vmatpush3.bf16.msra.mxu1 %v460_v15  ;;  %407 = vmatpush3.bf16.msra.mxu0 %v460_v15 }
  0x69   :  { %433 = vmatprep.subr.bf16.mxu1 %v635_v13  ;;  %408 = vmatprep.subr.bf16.mxu0 %v635_v13 }
  0x6a   :  { %101 = vadd.xlane.f32.xlu0 %v100_v8  ;;  %113 = vadd.xlane.f32.xlu1 %v108_v7 }
  0x6c   :  { %441 = vmatpush3.bf16.msra.mxu1 %v461_v16  ;;  %409 = vmatpush3.bf16.msra.mxu0 %v461_v16 }
  0x6d   :  { %434 = vmatprep.subr.bf16.mxu1 %v635_v13  ;;  %410 = vmatprep.subr.bf16.mxu0 %v635_v13 }
  0x6e   :  { %115 = vadd.xlane.f32.xlu0 %v109_v10  ;;  %122 = vadd.xlane.f32.xlu1 %v121_v11 }
  0x70   :  { %442 = vmatpush3.bf16.msra.mxu1 %v462_v17  ;;  %411 = vmatpush3.bf16.msra.mxu0 %v462_v17 }
  0x71   :  { %435 = vmatprep.subr.bf16.mxu1 %v635_v13  ;;  %412 = vmatprep.subr.bf16.mxu0 %v635_v13 }
  0x74   :  { %443 = vmatpush3.bf16.msra.mxu1 %v463_v18  ;;  %413 = vmatpush3.bf16.msra.mxu0 %v463_v18 }
  0x75   :  { %436 = vmatprep.subr.bf16.mxu1 %v635_v13  ;;  %414 = vmatprep.subr.bf16.mxu0 %v635_v13 }
  0x78   :  { %444 = vmatpush3.bf16.msra.mxu1 %v464_v19  ;;  %415 = vmatpush3.bf16.msra.mxu0 %v464_v19 }
  0x79   :  { %437 = vmatprep.subr.bf16.mxu1 %v635_v13  ;;  %416 = vmatprep.subr.bf16.mxu0 %v635_v13 }
  0x7c   :  { %445 = vmatpush3.bf16.msra.mxu1 %v465_v20  ;;  %417 = vmatpush3.bf16.msra.mxu0 %v465_v20 }
  0xeb   :  { %v96_v21 = vpop.xlane.xlu0 %95  ;;  %v94_v22 = vpop.xlane.xlu1 %93 }
  0xec   :  { %v105_v23 = vmul.f32 0.015625, %v96_v21  ;;  %v104_v37 = vmul.f32 0.015625, %v94_v22 }
  0xee   :  { %v131_v26 = vmul.f32 %v105_v23, %v105_v23  ;;  %v130_v45 = vmul.f32 %v104_v37, %v104_v37  ;;  %v141_v54 = vsub.f32 %v738_v0, %v105_v23  ;;  %v140_v11 = vsub.f32 %v740_v1, %v104_v37  ;;  %v382_v1 = vld [vmem:[#allocation10] ss:$0 sm:$0xff] }
  0xef   :  { %v98_v24 = vpop.xlane.xlu0 %97  ;;  %v118_v25 = vpop.xlane.xlu1 %117 }
  0xf0   :  { %v106_v27 = vmul.f32 0.015625, %v98_v24  ;;  %v126_v28 = vmul.f32 0.015625, %v118_v25 }
  0xf2   :  { %v136_v29 = vsub.f32 %v126_v28, %v131_v26  ;;  %v132_v32 = vmul.f32 %v106_v27, %v106_v27  ;;  %v142_v60 = vsub.f32 %v746_v3, %v106_v27 }
  0xf3   :  { %v120_v30 = vpop.xlane.xlu1 %119  ;;  %v92_v31 = vpop.xlane.xlu0 %91 }
  0xf4   :  { %v146_v33 = vadd.f32 1e-05, %v136_v29  ;;  %v127_v34 = vmul.f32 0.015625, %v120_v30  ;;  %v103_v35 = vmul.f32 0.015625, %v92_v31 }
  0xf6   :  { %466 = vrsqrt.f32 %v146_v33  ;;  %v137_v36 = vsub.f32 %v127_v34, %v132_v32  ;;  %v129_v41 = vmul.f32 %v103_v35, %v103_v35  ;;  %v139_v5 = vsub.f32 %v748_v4, %v103_v35 }
  0xf7   :  { %v102_v38 = vpop.xlane.xlu0 %101  ;;  %v114_v39 = vpop.xlane.xlu1 %113 }
  0xf8   :  { %v147_v40 = vadd.f32 1e-05, %v137_v36  ;;  %v107_v42 = vmul.f32 0.015625, %v102_v38  ;;  %v124_v43 = vmul.f32 0.015625, %v114_v39 }
  0xfa   :  { %468 = vrsqrt.f32 %v147_v40  ;;  %v134_v44 = vsub.f32 %v124_v43, %v129_v41  ;;  %v133_v48 = vmul.f32 %v107_v42, %v107_v42  ;;  %v143_v15 = vsub.f32 %v753_v6, %v107_v42 }
  0xfb   :  { %v116_v46 = vpop.xlane.xlu0 %115  ;;  %v123_v47 = vpop.xlane.xlu1 %122 }
  0xfc   :  { %v144_v49 = vadd.f32 1e-05, %v134_v44  ;;  %v125_v50 = vmul.f32 0.015625, %v116_v46  ;;  %v128_v51 = vmul.f32 0.015625, %v123_v47 }
  0xfe   :  { %470 = vrsqrt.f32 %v144_v49  ;;  %v135_v52 = vsub.f32 %v125_v50, %v130_v45  ;;  %v138_v53 = vsub.f32 %v128_v51, %v133_v48 }
 0x100   :  { %v467_v55 = vpop.eup %466  ;;  %v145_v56 = vadd.f32 1e-05, %v135_v52  ;;  %v148_v57 = vadd.f32 1e-05, %v138_v53 }
 0x101   :  { %v156_v58 = vmul.f32 %v467_v55, %v141_v54 }
 0x102   :  { %472 = vrsqrt.f32 %v145_v56 }
 0x103   :  { %474 = vrsqrt.f32 %v148_v57  ;;  %v167_v63 = vmul.f32 %v380_v59, %v156_v58 }
 0x104   :  { %v469_v61 = vpop.eup %468 }
 0x105   :  { %v157_v62 = vmul.f32 %v469_v61, %v142_v60  ;;  %v178_v9 = vadd.f32 %v381_v2, %v167_v63 }
 0x107   :  { %v168_v7 = vmul.f32 %v380_v59, %v157_v62 }
 0x108   :  { %v471_v8 = vpop.eup %470 }
 0x109   :  { %v179_v10 = vadd.f32 %v381_v2, %v168_v7  ;;  %v154_v0 = vmul.f32 %v471_v8, %v139_v5 }
 0x10b   :  { %v182_v12 = vpack.c.bf16 %v179_v10, %v178_v9  ;;  %v165_v17 = vmul.f32 %v380_v59, %v154_v0 }
 0x10c   :  { %v473_v14 = vpop.eup %472 }
 0x10d   :  { %v475_v16 = vpop.eup %474  ;;  %423 = vmatmul.mubr.bf16.vlgmr.msra.gmra.mrb[0].mxu1 %v182_v12  ;;  %v155_v3 = vmul.f32 %v473_v14, %v140_v11  ;;  %v176_v20 = vadd.f32 %v381_v2, %v165_v17 }
 0x10e   :  { %426 = vmatprep.mubr.msk.bf16.mxu1 %vm636_vm1, %v635_v13  ;;  %v158_v18 = vmul.f32 %v475_v16, %v143_v15 }
 0x10f   :  { %v166_v4 = vmul.f32 %v380_v59, %v155_v3 }
 0x110   :  { %v169_v19 = vmul.f32 %v380_v59, %v158_v18 }
 0x111   :  { %v177_v21 = vadd.f32 %v381_v2, %v166_v4 }
 0x112   :  { %v180_v22 = vadd.f32 %v381_v2, %v169_v19 }
 0x113   :  { %v181_v23 = vpack.c.bf16 %v177_v21, %v176_v20 }
 0x114   :  { %v183_v24 = vpack.c.bf16 %v180_v22, %v180_v22 }
 0x115   :  { %419 = vmatmul.mubr.bf16.vlgmr.msra.gmra.mrb[0].mxu0 %v181_v23 }
 0x116   :  { %427 = vmatmul.mubr.bf16.gmra.mrb[4].mxu1 %v183_v24 }
 0x1e0   :  { %v297_v25 = vpop.f32.mrb[0].mxu1 }
 0x1e1   :  { %v298_v6 = vadd.f32 %v382_v1, %v297_v25  ;;  %v424_v26 = vpop.f32.mrb[1].mxu1 }
 0x1e2   :  { %v300_v27 = vpop.f32.mrb[2].mxu1 }
 0x1e3   :  { %v318_v28 = vmul.f32 0.044715, %v298_v6  ;;  %v301_v29 = vadd.f32 %v382_v1, %v300_v27  ;;  %v425_v30 = vpop.f32.mrb[3].mxu1  ;;  %v313_v7 = vmul.f32 0.5, %v298_v6 }
 0x1e5   :  { %v323_v31 = vmul.f32 %v318_v28, %v298_v6  ;;  %v319_v13 = vmul.f32 0.044715, %v301_v29  ;;  %v314_v10 = vmul.f32 0.5, %v301_v29 }
 0x1e7   :  { %v328_v32 = vmul.f32 %v323_v31, %v298_v6  ;;  %v324_v33 = vmul.f32 %v319_v13, %v301_v29 }
 0x1e8   :  { %v289_v34 = vpop.f32.mrb[0].mxu0 }
 0x1e9   :  { %v333_v35 = vadd.f32 %v328_v32, %v298_v6  ;;  %v329_v36 = vmul.f32 %v324_v33, %v301_v29  ;;  %v290_v37 = vadd.f32 %v382_v1, %v289_v34  ;;  %v305_v38 = vpop.f32.mrb[4].mxu1  ;;  %v420_v39 = vpop.f32.mrb[1].mxu0 }
 0x1ea   :  { %v306_v40 = vadd.f32 %v382_v1, %v305_v38  ;;  %v428_v41 = vpop.f32.mrb[5].mxu1  ;;  %v292_v42 = vpop.f32.mrb[2].mxu0 }
 0x1eb   :  { %v338_v43 = vmul.f32 0.7978846, %v333_v35  ;;  %v334_v44 = vadd.f32 %v329_v36, %v301_v29  ;;  %v316_v45 = vmul.f32 0.044715, %v290_v37  ;;  %v308_v46 = vpop.f32.mrb[6].mxu1  ;;  %v293_v48 = vadd.f32 %v382_v1, %v292_v42  ;;  %v421_v49 = vpop.f32.mrb[3].mxu0 }
 0x1ec   :  { %v320_v47 = vmul.f32 0.044715, %v306_v40  ;;  %v429_v50 = vpop.f32.mrb[7].mxu1  ;;  %v311_v16 = vmul.f32 0.5, %v290_v37  ;;  %v315_v17 = vmul.f32 0.5, %v306_v40 }
 0x1ed   :  { %476 = vtanh.f32 %v338_v43  ;;  %v339_v51 = vmul.f32 0.7978846, %v334_v44  ;;  %v321_v52 = vmul.f32 %v316_v45, %v290_v37  ;;  %v317_v54 = vmul.f32 0.044715, %v293_v48 }
 0x1ee   :  { %v325_v53 = vmul.f32 %v320_v47, %v306_v40  ;;  %v312_v20 = vmul.f32 0.5, %v293_v48 }
 0x1ef   :  { %478 = vtanh.f32 %v339_v51  ;;  %v326_v55 = vmul.f32 %v321_v52, %v290_v37  ;;  %v322_v57 = vmul.f32 %v317_v54, %v293_v48 }
 0x1f0   :  { %v330_v56 = vmul.f32 %v325_v53, %v306_v40 }
 0x1f1   :  { %v331_v58 = vadd.f32 %v326_v55, %v290_v37  ;;  %v327_v60 = vmul.f32 %v322_v57, %v293_v48 }
 0x1f2   :  { %v335_v59 = vadd.f32 %v330_v56, %v306_v40 }
 0x1f3   :  { %v336_v61 = vmul.f32 0.7978846, %v331_v58  ;;  %v332_v63 = vadd.f32 %v327_v60, %v293_v48 }
 0x1f4   :  { %v340_v62 = vmul.f32 0.7978846, %v335_v59 }
 0x1f5   :  { %480 = vtanh.f32 %v336_v61  ;;  %v337_v2 = vmul.f32 0.7978846, %v332_v63 }
 0x1f6   :  { %482 = vtanh.f32 %v340_v62 }
 0x1f7   :  { %v477_v5 = vpop.eup %476  ;;  %484 = vtanh.f32 %v337_v2 }
 0x1f8   :  { %v348_v8 = vadd.f32 1.0, %v477_v5 }
 0x1f9   :  { %v479_v9 = vpop.eup %478 }
 0x1fa   :  { %v349_v0 = vadd.f32 1.0, %v479_v9  ;;  %v353_v11 = vmul.f32 %v348_v8, %v313_v7 }
 0x1fc   :  { %v354_v12 = vmul.f32 %v349_v0, %v314_v10  ;;  %358 = vst [vmem:[#allocation11 + $0x10] sm:$0xff] %v353_v11 }
 0x1fe   :  { %359 = vst [vmem:[#allocation11 + $0x18] sm:$0xff] %v354_v12 }
 0x1ff   :  { %v481_v14 = vpop.eup %480 }
 0x200   :  { %v483_v15 = vpop.eup %482  ;;  %v346_v3 = vadd.f32 1.0, %v481_v14 }
 0x201   :  { %v350_v18 = vadd.f32 1.0, %v483_v15  ;;  %v485_v4 = vpop.eup %484 }
 0x202   :  { %v351_v19 = vmul.f32 %v346_v3, %v311_v16  ;;  %v347_v21 = vadd.f32 1.0, %v485_v4 }
 0x203   :  { %v355_v22 = vmul.f32 %v350_v18, %v315_v17 }
 0x204   :  { %356 = vst [vmem:[#allocation11] sm:$0xff] %v351_v19  ;;  %v352_v23 = vmul.f32 %v347_v21, %v312_v20 }
 0x205   :  { %360 = vst [vmem:[#allocation11 + $0x20] sm:$0x3] %v355_v22 }
 0x206   :  { %357 = vst [vmem:[#allocation11 + $0x8] sm:$0xff] %v352_v23 }
 0x207   :  { %607 = shalt.err (!%p604_p2)
}
 0x208   :  { %s608_s10 = scalar_lea.hbm %s810_s5, 640 }
 0x209   :  { %p609_p3 = scmp.ne.s32.totalorder %s810_s5, %s608_s10  ;;  %p612_p4 = scmp.lt.u32.totalorder %s608_s10, %s810_s5 }
 0x20b   :  { %p614_p5 = pnand %p612_p4, %p609_p3 }
 0x20d   :  { %617 = shalt.err (!%p614_p5)
}
 0x20e   :  { %372 = dma.vmem_to_hbm [thread:$0]  %s367_s6, 640, %s810_s5, [#allocation4], %s631_s3, %s631_s3, %s632_s21  }
 0x20f   :  { %624 = dma.done.wait [#allocation4], 640  }
 0x210   :  { %625 = vsyncadd [#allocation4], 4294966656 }
 0x211   :  { %376 = vsyncpa [#allocation3], 1 }
 0x212   :  { %377 = vsyncpa [#allocation6], 1 }
 0x213   :  { %378 = vsyncpa [#allocation9], 1 }
 0x214   :  { %379 = vsyncpa [#allocation4], 1 }

// kernel: vit_forward.23
= control target key start
LH: loop header
LB: loop body
LE: loop exit
PB: predicated region body
PF: predicated region fallthrough
CT: control target
= control target key end

     0   :  { %10 = vsyncpa [#allocation3], 0  ;;  %s564_s0 = inlined_call_operand.hbm [shape: f32[2,128], index: 0, kind: input, shape index: {}]   ;;  %s565_s1 = inlined_call_operand.hbm [shape: f32[1,128], index: 1, kind: input, shape index: {}]   ;;  %s566_s2 = inlined_call_operand.hbm [shape: f32[1,128], index: 2, kind: input, shape index: {}]   ;;  %s567_s3 = inlined_call_operand.hbm [shape: bf16[128,128], index: 3, kind: input, shape index: {}]   ;;  %s568_s4 = inlined_call_operand.hbm [shape: f32[1,128], index: 4, kind: input, shape index: {}]   ;;  %s569_s5 = inlined_call_operand.hbm [shape: f32[2,128], index: 5, kind: output, shape index: {}]  }
   0x1   :  { %11 = vsyncpa [#allocation6], 0 }
   0x2   :  { %12 = vsyncpa [#allocation9], 0 }
   0x3   :  { %13 = vsyncpa [#allocation4], 0  ;;  %s445_s18 = smov [#allocation5]   ;;  %s446_s20 = smov [#allocation8]  }
   0x4   :  { %s30_s19 = sshll.u32 %s445_s18, 4  ;;  %s49_s21 = sshll.u32 %s446_s20, 4  ;;  %s31_s19 = int_to_ptr.vmem [resolvable:$true] %s30_s19  ;;  %s485_s21 = int_to_ptr.vmem [resolvable:$true] %s49_s21 }
   0x5   :  { %s305_s24 = scalar_lea.hbm %s565_s1, 16 }
   0x6   :  { %p306_p0 = scmp.ne.s32.totalorder %s565_s1, %s305_s24  ;;  %p309_p1 = scmp.lt.u32.totalorder %s305_s24, %s565_s1 }
   0x8   :  { %p311_p2 = pnand %p309_p1, %p306_p0 }
   0xa   :  { %314 = shalt.err (!%p311_p2)
}
   0xb   :  { %s315_s29 = scalar_lea.vmem %s31_s19, 16  ;;  %s319_s30 = scalar_lea.vmem %s31_s19, 32 }
   0xc   :  { %p316_p3 = scmp.ne.s32.totalorder %s31_s19, %s315_s29  ;;  %p320_p4 = scmp.lt.s32.totalorder %s31_s19, %s31_s19 }
   0xd   :  { %p321_p5 = scmp.lt.s32.totalorder %s319_s30, %s315_s29 }
   0xf   :  { %p322_p6 = por %p321_p5, %p320_p4 }
  0x11   :  { %p323_p7 = pnand %p322_p6, %p316_p3 }
  0x13   :  { %326 = shalt.err (!%p323_p7)
}
  0x14   :  { %33 = dma.hbm_to_vmem [thread:$0]  %s565_s1, 16, %s31_s19, [#allocation6]  }
  0x15   :  { %s327_s10 = scalar_lea.hbm %s567_s3, 1024 }
  0x16   :  { %p328_p8 = scmp.ne.s32.totalorder %s567_s3, %s327_s10  ;;  %p331_p9 = scmp.lt.u32.totalorder %s327_s10, %s567_s3 }
  0x18   :  { %p333_p10 = pnand %p331_p9, %p328_p8 }
  0x1a   :  { %336 = shalt.err (!%p333_p10)
}
  0x1b   :  { %s337_s15 = scalar_lea.vmem %s485_s21, 1024  ;;  %p342_p12 = scmp.lt.s32.totalorder %s485_s21, %s485_s21 }
  0x1c   :  { %p338_p11 = scmp.ne.s32.totalorder %s485_s21, %s337_s15  ;;  %p343_p13 = scmp.lt.s32.totalorder %s337_s15, %s337_s15 }
  0x1e   :  { %p344_p0 = por %p343_p13, %p342_p12 }
  0x20   :  { %p345_p1 = pnand %p344_p0, %p338_p11 }
  0x22   :  { %348 = shalt.err (!%p345_p1)
}
  0x23   :  { %s447_s1 = smov 64   ;;  %s448_s16 = smov 4  }
  0x24   :  { %55 = dma.hbm_to_vmem [thread:$0]  %s567_s3, 1024, %s485_s21, [#allocation9], %s447_s1, %s447_s1, %s448_s16  }
  0x25   :  { %s449_s19 = smov [#allocation2]   ;;  %s450_s22 = smov [#allocation7]  }
  0x26   :  { %s20_s20 = sshll.u32 %s449_s19, 4  ;;  %s40_s23 = sshll.u32 %s450_s22, 4  ;;  %s21_s20 = int_to_ptr.vmem [resolvable:$true] %s20_s20  ;;  %s41_s23 = int_to_ptr.vmem [resolvable:$true] %s40_s23 }
  0x27   :  { %s349_s26 = scalar_lea.hbm %s564_s0, 32 }
  0x28   :  { %p350_p2 = scmp.ne.s32.totalorder %s564_s0, %s349_s26  ;;  %p353_p3 = scmp.lt.u32.totalorder %s349_s26, %s564_s0 }
  0x2a   :  { %p355_p4 = pnand %p353_p3, %p350_p2 }
  0x2c   :  { %358 = shalt.err (!%p355_p4)
}
  0x2d   :  { %s359_s3 = scalar_lea.vmem %s21_s20, 32  ;;  %p364_p6 = scmp.lt.s32.totalorder %s21_s20, %s21_s20 }
  0x2e   :  { %p360_p5 = scmp.ne.s32.totalorder %s21_s20, %s359_s3  ;;  %p365_p7 = scmp.lt.s32.totalorder %s359_s3, %s359_s3 }
  0x30   :  { %p366_p8 = por %p365_p7, %p364_p6 }
  0x32   :  { %p367_p9 = pnand %p366_p8, %p360_p5 }
  0x34   :  { %370 = shalt.err (!%p367_p9)
}
  0x35   :  { %23 = dma.hbm_to_vmem [thread:$0]  %s564_s0, 32, %s21_s20, [#allocation3]  }
  0x36   :  { %s371_s9 = scalar_lea.hbm %s566_s2, 16 }
  0x37   :  { %p372_p10 = scmp.ne.s32.totalorder %s566_s2, %s371_s9  ;;  %p375_p11 = scmp.lt.u32.totalorder %s371_s9, %s566_s2 }
  0x39   :  { %p377_p12 = pnand %p375_p11, %p372_p10 }
  0x3b   :  { %380 = shalt.err (!%p377_p12)
}
  0x3c   :  { %s381_s14 = scalar_lea.vmem %s41_s23, 16  ;;  %s385_s15 = scalar_lea.vmem %s41_s23, 32 }
  0x3d   :  { %p382_p13 = scmp.ne.s32.totalorder %s41_s23, %s381_s14  ;;  %p386_p0 = scmp.lt.s32.totalorder %s41_s23, %s41_s23 }
  0x3e   :  { %p387_p1 = scmp.lt.s32.totalorder %s385_s15, %s381_s14 }
  0x40   :  { %p388_p2 = por %p387_p1, %p386_p0 }
  0x42   :  { %p389_p3 = pnand %p388_p2, %p382_p13 }
  0x44   :  { %392 = shalt.err (!%p389_p3)
}
  0x45   :  { %43 = dma.hbm_to_vmem [thread:$0]  %s566_s2, 16, %s41_s23, [#allocation6]  }
  0x46   :  { %s451_s16 = smov [#allocation10]   ;;  %s393_s20 = scalar_lea.hbm %s568_s4, 16 }
  0x47   :  { %s62_s17 = sshll.u32 %s451_s16, 4  ;;  %p394_p4 = scmp.ne.s32.totalorder %s568_s4, %s393_s20  ;;  %s63_s17 = int_to_ptr.vmem [resolvable:$true] %s62_s17 }
  0x48   :  { %p397_p5 = scmp.lt.u32.totalorder %s393_s20, %s568_s4 }
  0x4a   :  { %p399_p6 = pnand %p397_p5, %p394_p4 }
  0x4c   :  { %402 = shalt.err (!%p399_p6)
}
  0x4d   :  { %s403_s27 = scalar_lea.vmem %s63_s17, 16  ;;  %s407_s2 = scalar_lea.vmem %s63_s17, 32 }
  0x4e   :  { %p404_p7 = scmp.ne.s32.totalorder %s63_s17, %s403_s27  ;;  %p408_p8 = scmp.lt.s32.totalorder %s63_s17, %s63_s17 }
  0x4f   :  { %p409_p9 = scmp.lt.s32.totalorder %s407_s2, %s403_s27 }
  0x51   :  { %p410_p10 = por %p409_p9, %p408_p8 }
  0x53   :  { %p411_p11 = pnand %p410_p10, %p404_p7 }
  0x55   :  { %414 = shalt.err (!%p411_p11)
}
  0x56   :  { %65 = dma.hbm_to_vmem [thread:$0]  %s568_s4, 16, %s63_s17, [#allocation9]  }
  0x57   :  { %437 = dma.done.wait [#allocation3], 32  }
  0x58   :  { %438 = vsyncadd [#allocation3], 4294967264 }
  0x59   :  { %439 = dma.done.wait [#allocation6], 32  }
  0x5a   :  { %440 = vsyncadd [#allocation6], 4294967264 }
  0x5b   :  { %441 = dma.done.wait [#allocation9], 1040  }
  0x5c   :  { %442 = vsyncadd [#allocation9], 4294966256  ;;  %v452_v0 = vmov 0.0   ;;  %vm85_vm0 = vcmask 1041408   ;;  %v82_v1 = vld [vmem:[#allocation2] sm:$0x3] }
  0x5d   :  { %265 = vmatprep.subr.bf16.mxu0 %v452_v0  ;;  %v86_v2 = vsel %vm85_vm0, %v82_v1, 0.0  ;;  %v90_v3 = vmul.f32 %v82_v1, %v82_v1  ;;  %v295_v4 = vld [vmem:[#allocation8] sm:$0xff]   ;;  %v296_v6 = vld [vmem:[#allocation8 + $0x8] sm:$0xff]   ;;  %v297_v7 = vld [vmem:[#allocation8 + $0x10] sm:$0xff]   ;;  %vm453_vm1 = vmmov 0   ;;  %s454_s4 = smov [#allocation11]  }
  0x5e   :  { %87 = vadd.xlane.f32.xlu0 %v86_v2  ;;  %266 = vmatpush3.bf16.msra.mxu0 %v295_v4  ;;  %v298_v8 = vld [vmem:[#allocation8 + $0x18] sm:$0xff]   ;;  %v299_v9 = vld [vmem:[#allocation8 + $0x20] sm:$0xff]   ;;  %v300_v10 = vld [vmem:[#allocation8 + $0x28] sm:$0xff]   ;;  %s234_s29 = sshll.u32 %s454_s4, 4  ;;  %s235_s29 = int_to_ptr.vmem [resolvable:$true] %s234_s29 }
  0x5f   :  { %v91_v5 = vsel %vm85_vm0, %v90_v3, 0.0  ;;  %267 = vmatprep.subr.bf16.mxu0 %v452_v0  ;;  %281 = vmatprep.mubr.msk.bf16.mxu0 %vm453_vm1, %v452_v0  ;;  %v301_v11 = vld [vmem:[#allocation8 + $0x30] sm:$0xff]   ;;  %v302_v12 = vld [vmem:[#allocation8 + $0x38] sm:$0xff]   ;;  %v247_v28 = vld [vmem:[#allocation10] ss:$0 sm:$0xff]  ;;  %s415_s30 = scalar_lea.vmem %s235_s29, 32  ;;  %p420_p13 = scmp.lt.s32.totalorder %s235_s29, %s235_s29 }
  0x60   :  { %v245_v22 = vld [vmem:[#allocation5] ss:$0 sm:$0xff]  ;;  %v246_v24 = vld [vmem:[#allocation7] ss:$0 sm:$0xff]  ;;  %p416_p12 = scmp.ne.s32.totalorder %s235_s29, %s415_s30  ;;  %p421_p0 = scmp.lt.s32.totalorder %s415_s30, %s415_s30 }
  0x62   :  { %92 = vadd.xlane.f32.xlu0 %v91_v5  ;;  %268 = vmatpush3.bf16.msra.mxu0 %v296_v6  ;;  %p422_p1 = por %p421_p0, %p420_p13 }
  0x63   :  { %269 = vmatprep.subr.bf16.mxu0 %v452_v0 }
  0x64   :  { %p423_p2 = pnand %p422_p1, %p416_p12 }
  0x66   :  { %270 = vmatpush3.bf16.msra.mxu0 %v297_v7 }
  0x67   :  { %271 = vmatprep.subr.bf16.mxu0 %v452_v0 }
  0x6a   :  { %272 = vmatpush3.bf16.msra.mxu0 %v298_v8 }
  0x6b   :  { %273 = vmatprep.subr.bf16.mxu0 %v452_v0 }
  0x6e   :  { %274 = vmatpush3.bf16.msra.mxu0 %v299_v9 }
  0x6f   :  { %275 = vmatprep.subr.bf16.mxu0 %v452_v0 }
  0x72   :  { %276 = vmatpush3.bf16.msra.mxu0 %v300_v10 }
  0x73   :  { %277 = vmatprep.subr.bf16.mxu0 %v452_v0 }
  0x76   :  { %278 = vmatpush3.bf16.msra.mxu0 %v301_v11 }
  0x77   :  { %279 = vmatprep.subr.bf16.mxu0 %v452_v0 }
  0x7a   :  { %280 = vmatpush3.bf16.msra.mxu0 %v302_v12 }
  0xeb   :  { %v88_v13 = vpop.xlane.xlu0 %87 }
  0xec   :  { %v89_v14 = vmul.f32 0.015625, %v88_v13 }
  0xee   :  { %v95_v16 = vmul.f32 %v89_v14, %v89_v14  ;;  %v97_v20 = vsub.f32 %v82_v1, %v89_v14 }
  0xef   :  { %v93_v15 = vpop.xlane.xlu0 %92 }
  0xf0   :  { %v94_v17 = vmul.f32 0.015625, %v93_v15 }
  0xf2   :  { %v96_v18 = vsub.f32 %v94_v17, %v95_v16 }
  0xf4   :  { %v98_v19 = vadd.f32 1e-05, %v96_v18 }
  0xf6   :  { %303 = vrsqrt.f32 %v98_v19 }
 0x100   :  { %v304_v21 = vpop.eup %303 }
 0x101   :  { %v100_v23 = vmul.f32 %v304_v21, %v97_v20 }
 0x103   :  { %v107_v25 = vmul.f32 %v245_v22, %v100_v23 }
 0x105   :  { %v114_v26 = vadd.f32 %v246_v24, %v107_v25 }
 0x107   :  { %v115_v27 = vpack.c.bf16 %v114_v26, %v114_v26 }
 0x109   :  { %282 = vmatmul.mubr.bf16.vlgmr.msra.gmra.mrb[0].mxu0 %v115_v27 }
 0x1dc   :  { %v221_v29 = vpop.f32.mrb[0].mxu0 }
 0x1dd   :  { %v222_v30 = vadd.f32 %v247_v28, %v221_v29  ;;  %v283_v31 = vpop.f32.mrb[1].mxu0 }
 0x1de   :  { %v224_v32 = vpop.f32.mrb[2].mxu0 }
 0x1df   :  { %227 = vst [vmem:[#allocation11] sm:$0x3] %v222_v30  ;;  %v284_v33 = vpop.f32.mrb[3].mxu0 }
 0x1e0   :  { %426 = shalt.err (!%p423_p2)
}
 0x1e1   :  { %s427_s6 = scalar_lea.hbm %s569_s5, 32 }
 0x1e2   :  { %p428_p3 = scmp.ne.s32.totalorder %s569_s5, %s427_s6  ;;  %p431_p4 = scmp.lt.u32.totalorder %s427_s6, %s569_s5 }
 0x1e4   :  { %p433_p5 = pnand %p431_p4, %p428_p3 }
 0x1e6   :  { %436 = shalt.err (!%p433_p5)
}
 0x1e7   :  { %237 = dma.vmem_to_hbm [thread:$0]  %s235_s29, 32, %s569_s5, [#allocation4]  }
 0x1e8   :  { %443 = dma.done.wait [#allocation4], 32  }
 0x1e9   :  { %444 = vsyncadd [#allocation4], 4294967264 }
 0x1ea   :  { %241 = vsyncpa [#allocation3], 1 }
 0x1eb   :  { %242 = vsyncpa [#allocation6], 1 }
 0x1ec   :  { %243 = vsyncpa [#allocation9], 1 }
 0x1ed   :  { %244 = vsyncpa [#allocation4], 1 }

</bundles_post_ra>
